<compile_context>
chip_gen: v5e
topology: v5e:2x2
jax: 0.10.0
libtpu: 0.0.40
codegen_flags: <defaults>
</compile_context>

<pallas_src>
import jax
import jax.numpy as jnp
from jax.experimental import pallas as pl
from jax.experimental.pallas import tpu as pltpu

HIDDEN_HEIGHT = 200     # fixed by the module
HIDDEN_DEPTH = 200      # fixed by the module
LAYERS_PER_STEP = 25    # L: hidden layers per grid step (must divide 200)


def _circular_nn_kernel(x_ref, w_in_ref, b_in_ref,
                        w_hid_ref, b_hid_ref,
                        w_out_ref, b_out_ref,
                        o_ref, act_ref):
    d = pl.program_id(0)

    # First grid step: input layer  Linear(num_in, H) + ReLU
    @pl.when(d == 0)
    def _():
        h = jnp.dot(x_ref[...], w_in_ref[...],
                    preferred_element_type=jnp.float32) + b_in_ref[...]
        act_ref[...] = jnp.maximum(h, 0.0)

    # L hidden layers per grid step: Linear(H, H) + ReLU, unrolled so the
    # LLO scheduler sees the whole chain inside one pipeline stage.
    def layer(l, act):
        w = w_hid_ref[l]                     # (H, H)
        b = b_hid_ref[pl.ds(l, 1), :]        # (1, H)
        h = jnp.dot(act, w, preferred_element_type=jnp.float32) + b
        return jnp.maximum(h, 0.0)

    act_ref[...] = jax.lax.fori_loop(0, LAYERS_PER_STEP, layer, act_ref[...],
                                     unroll=True)

    # Last grid step: output layer Linear(H, num_out) + Sigmoid
    @pl.when(d == pl.num_programs(0) - 1)
    def _():
        z = jnp.dot(act_ref[...], w_out_ref[...],
                    preferred_element_type=jnp.float32) + b_out_ref[...]
        o_ref[...] = jax.nn.sigmoid(z)


def circular_nn_forward(x_nchw, params):
    """x_nchw: (B, C, H, W) float32.  Returns (B, num_out) float32."""
    w_in, b_in, w_hid, b_hid, w_out, b_out = params
    B = x_nchw.shape[0]
    x = x_nchw.reshape(B, -1)                       # Flatten (glue)
    num_in = x.shape[1]
    H = HIDDEN_HEIGHT
    D = HIDDEN_DEPTH
    L = LAYERS_PER_STEP
    assert D % L == 0, "LAYERS_PER_STEP must divide HIDDEN_DEPTH"
    num_steps = D // L
    num_out = w_out.shape[1]

    # Reshape biases to (num_steps, L, H) so the per-step block's last two
    # dims equal the full array dims (clean tiling, one DMA per step).
    b_hid_blocked = b_hid.reshape(num_steps, L, H)

    return pl.pallas_call(
        _circular_nn_kernel,
        out_shape=jax.ShapeDtypeStruct((B, num_out), jnp.float32),
        grid_spec=pltpu.PrefetchScalarGridSpec(
            num_scalar_prefetch=0,
            grid=(num_steps,),
            in_specs=[
                pl.BlockSpec((B, num_in), lambda d: (0, 0)),        # x
                pl.BlockSpec((num_in, H), lambda d: (0, 0)),        # w_in
                pl.BlockSpec((1, H), lambda d: (0, 0)),             # b_in
                pl.BlockSpec((L, H, H), lambda d: (d, 0, 0)),       # w_hid blk
                pl.BlockSpec((None, L, H), lambda d: (d, 0, 0)),    # b_hid blk
                pl.BlockSpec((H, num_out), lambda d: (0, 0)),       # w_out
                pl.BlockSpec((1, num_out), lambda d: (0, 0)),       # b_out
            ],
            out_specs=pl.BlockSpec((B, num_out), lambda d: (0, 0)),
            scratch_shapes=[pltpu.VMEM((B, H), jnp.float32)],       # activation
        ),
        compiler_params=pltpu.CompilerParams(
            dimension_semantics=("arbitrary",),   # sequential layer dependency
            vmem_limit_bytes=24 << 20,            # ~10.5 MiB used; v7x-safe
        ),
    )(x, w_in, b_in, w_hid, b_hid_blocked, w_out, b_out)


def init_params(key, num_in, num_out):
    """Deterministic synthetic parameters matching the module's layer shapes.

    Layout is (in_features, out_features) per Linear; transpose PyTorch
    nn.Linear weights when importing real parameters.
    """
    H, D = HIDDEN_HEIGHT, HIDDEN_DEPTH
    k = jax.random.split(key, 6)
    scale = 0.05
    w_in = scale * jax.random.normal(k[0], (num_in, H), jnp.float32)
    b_in = scale * jax.random.normal(k[1], (1, H), jnp.float32)
    w_hid = scale * jax.random.normal(k[2], (D, H, H), jnp.float32)
    b_hid = scale * jax.random.normal(k[3], (D, H), jnp.float32)
    w_out = scale * jax.random.normal(k[4], (H, num_out), jnp.float32)
    b_out = scale * jax.random.normal(k[5], (1, num_out), jnp.float32)
    return (w_in, b_in, w_hid, b_hid, w_out, b_out)


if __name__ == "__main__":
    # Module hyperparameters (small, consistent with the forward pass):
    #   num_inputs=12, num_state=4  -> num_in  = 16  (must equal C*H*W)
    #   num_outputs=4, num_state=4  -> num_out = 8
    num_inputs, num_outputs, num_state = 12, 4, 4
    num_in = num_inputs + num_state
    num_out = num_outputs + num_state

    key = jax.random.PRNGKey(0)
    kx, kp = jax.random.split(key)

    B, C, Hs, Ws = 8, 4, 2, 2                  # C*Hs*Ws == num_in == 16
    x = jax.random.normal(kx, (B, C, Hs, Ws), jnp.float32)
    params = init_params(kp, num_in, num_out)

    out = circular_nn_forward(x, params)
    out = jax.block_until_ready(out)
    assert out.shape == (B, num_out) and out.dtype == jnp.float32
    print("KERNEL_OK")
</pallas_src>

<mosaic_0001>
module attributes {stable_mosaic.version = 11 : i64} {
  func.func @_circular_nn_kernel(%arg0: i32, %arg1: memref<8x16xf32, #tpu.memory_space<vmem>>, %arg2: memref<16x200xf32, #tpu.memory_space<vmem>>, %arg3: memref<1x200xf32, #tpu.memory_space<vmem>>, %arg4: memref<25x200x200xf32, #tpu.memory_space<vmem>>, %arg5: memref<1x25x200xf32, #tpu.memory_space<vmem>>, %arg6: memref<200x8xf32, #tpu.memory_space<vmem>>, %arg7: memref<1x8xf32, #tpu.memory_space<vmem>>, %arg8: memref<8x8xf32, #tpu.memory_space<vmem>>, %arg9: memref<8x200xf32, #tpu.memory_space<vmem>>) attributes {dimension_semantics = [#tpu.dimension_semantics<arbitrary>], iteration_bounds = array<i64: 8>, scalar_prefetch = 0 : i64, scratch_operands = 1 : i64, tpu.core_type = #tpu.core_type<tc>, window_params = [{pipeline_mode = #tpu.pipeline_mode<synchronous>, transform_indices = @transform_0, window_bounds = array<i64: 8, 16>}, {pipeline_mode = #tpu.pipeline_mode<synchronous>, transform_indices = @transform_1, window_bounds = array<i64: 16, 200>}, {pipeline_mode = #tpu.pipeline_mode<synchronous>, transform_indices = @transform_2, window_bounds = array<i64: 1, 200>}, {transform_indices = @transform_3, window_bounds = array<i64: 25, 200, 200>}, {transform_indices = @transform_4, window_bounds = array<i64: 1, 25, 200>}, {pipeline_mode = #tpu.pipeline_mode<synchronous>, transform_indices = @transform_5, window_bounds = array<i64: 200, 8>}, {pipeline_mode = #tpu.pipeline_mode<synchronous>, transform_indices = @transform_6, window_bounds = array<i64: 1, 8>}, {pipeline_mode = #tpu.pipeline_mode<synchronous>, transform_indices = @transform_7, window_bounds = array<i64: 8, 8>}]} {
    %c0_i32 = arith.constant 0 : i32
    %0 = arith.cmpi eq, %arg0, %c0_i32 : i32
    %1 = arith.extui %0 : i1 to i32
    %c0_i32_0 = arith.constant 0 : i32
    %2 = arith.cmpi ne, %1, %c0_i32_0 : i32
    scf.if %2 {
      %c0_156 = arith.constant 0 : index
      %c0_157 = arith.constant 0 : index
      %283 = vector.load %arg1[%c0_156, %c0_157] : memref<8x16xf32, #tpu.memory_space<vmem>>, vector<8x16xf32>
      %c0_158 = arith.constant 0 : index
      %c0_159 = arith.constant 0 : index
      %284 = vector.load %arg2[%c0_158, %c0_159] : memref<16x200xf32, #tpu.memory_space<vmem>>, vector<16x200xf32>
      %cst_160 = arith.constant dense<0.000000e+00> : vector<8x200xf32>
      %285 = tpu.matmul %283, %284, %cst_160 {dimension_numbers = #tpu.dot_dimension_numbers<[1], [0], [0], [1], [0, 0, 1, 1], [], []>} : vector<8x16xf32>, vector<16x200xf32>, vector<8x200xf32> -> vector<8x200xf32>
      %c0_161 = arith.constant 0 : index
      %c0_162 = arith.constant 0 : index
      %286 = vector.load %arg3[%c0_161, %c0_162] : memref<1x200xf32, #tpu.memory_space<vmem>>, vector<1x200xf32>
      %287 = vector.broadcast %286 : vector<1x200xf32> to vector<8x200xf32>
      %288 = arith.addf %285, %287 : vector<8x200xf32>
      %cst_163 = arith.constant 0.000000e+00 : f32
      %289 = vector.broadcast %cst_163 : f32 to vector<8x200xf32>
      %290 = arith.maximumf %288, %289 : vector<8x200xf32>
      %c0_164 = arith.constant 0 : index
      %c0_165 = arith.constant 0 : index
      %291 = vector.load %arg9[%c0_164, %c0_165] : memref<8x200xf32, #tpu.memory_space<vmem>>, vector<8x200xf32>
      tpu.vector_store %arg9[%c0_164, %c0_165], %290 {strides = array<i32>} : memref<8x200xf32, #tpu.memory_space<vmem>>, vector<8x200xf32>,
    } else {
    }
    %c0 = arith.constant 0 : index
    %c0_1 = arith.constant 0 : index
    %3 = vector.load %arg9[%c0, %c0_1] : memref<8x200xf32, #tpu.memory_space<vmem>>, vector<8x200xf32>
    %c0_i32_2 = arith.constant 0 : i32
    %4 = arith.index_cast %c0_i32_2 : i32 to index
    %c0_3 = arith.constant 0 : index
    %c0_4 = arith.constant 0 : index
    %5 = vector.load %arg4[%4, %c0_3, %c0_4] : memref<25x200x200xf32, #tpu.memory_space<vmem>>, vector<1x200x200xf32>
    %6 = vector.shape_cast %5 : vector<1x200x200xf32> to vector<200x200xf32>
    %c0_5 = arith.constant 0 : index
    %7 = arith.index_cast %c0_i32_2 : i32 to index
    %c0_6 = arith.constant 0 : index
    %8 = vector.load %arg5[%c0_5, %7, %c0_6] : memref<1x25x200xf32, #tpu.memory_space<vmem>>, vector<1x1x200xf32>
    %9 = vector.shape_cast %8 : vector<1x1x200xf32> to vector<1x200xf32>
    %cst = arith.constant dense<0.000000e+00> : vector<8x200xf32>
    %10 = tpu.matmul %3, %6, %cst {dimension_numbers = #tpu.dot_dimension_numbers<[1], [0], [0], [1], [0, 0, 1, 1], [], []>} : vector<8x200xf32>, vector<200x200xf32>, vector<8x200xf32> -> vector<8x200xf32>
    %11 = vector.broadcast %9 : vector<1x200xf32> to vector<8x200xf32>
    %12 = arith.addf %10, %11 : vector<8x200xf32>
    %cst_7 = arith.constant 0.000000e+00 : f32
    %13 = vector.broadcast %cst_7 : f32 to vector<8x200xf32>
    %14 = arith.maximumf %12, %13 : vector<8x200xf32>
    %c1_i32 = arith.constant 1 : i32
    %15 = arith.index_cast %c1_i32 : i32 to index
    %c0_8 = arith.constant 0 : index
    %c0_9 = arith.constant 0 : index
    %16 = vector.load %arg4[%15, %c0_8, %c0_9] : memref<25x200x200xf32, #tpu.memory_space<vmem>>, vector<1x200x200xf32>
    %17 = vector.shape_cast %16 : vector<1x200x200xf32> to vector<200x200xf32>
    %c0_10 = arith.constant 0 : index
    %18 = arith.index_cast %c1_i32 : i32 to index
    %c0_11 = arith.constant 0 : index
    %19 = vector.load %arg5[%c0_10, %18, %c0_11] : memref<1x25x200xf32, #tpu.memory_space<vmem>>, vector<1x1x200xf32>
    %20 = vector.shape_cast %19 : vector<1x1x200xf32> to vector<1x200xf32>
    %cst_12 = arith.constant dense<0.000000e+00> : vector<8x200xf32>
    %21 = tpu.matmul %14, %17, %cst_12 {dimension_numbers = #tpu.dot_dimension_numbers<[1], [0], [0], [1], [0, 0, 1, 1], [], []>} : vector<8x200xf32>, vector<200x200xf32>, vector<8x200xf32> -> vector<8x200xf32>
    %22 = vector.broadcast %20 : vector<1x200xf32> to vector<8x200xf32>
    %23 = arith.addf %21, %22 : vector<8x200xf32>
    %cst_13 = arith.constant 0.000000e+00 : f32
    %24 = vector.broadcast %cst_13 : f32 to vector<8x200xf32>
    %25 = arith.maximumf %23, %24 : vector<8x200xf32>
    %c2_i32 = arith.constant 2 : i32
    %26 = arith.index_cast %c2_i32 : i32 to index
    %c0_14 = arith.constant 0 : index
    %c0_15 = arith.constant 0 : index
    %27 = vector.load %arg4[%26, %c0_14, %c0_15] : memref<25x200x200xf32, #tpu.memory_space<vmem>>, vector<1x200x200xf32>
    %28 = vector.shape_cast %27 : vector<1x200x200xf32> to vector<200x200xf32>
    %c0_16 = arith.constant 0 : index
    %29 = arith.index_cast %c2_i32 : i32 to index
    %c0_17 = arith.constant 0 : index
    %30 = vector.load %arg5[%c0_16, %29, %c0_17] : memref<1x25x200xf32, #tpu.memory_space<vmem>>, vector<1x1x200xf32>
    %31 = vector.shape_cast %30 : vector<1x1x200xf32> to vector<1x200xf32>
    %cst_18 = arith.constant dense<0.000000e+00> : vector<8x200xf32>
    %32 = tpu.matmul %25, %28, %cst_18 {dimension_numbers = #tpu.dot_dimension_numbers<[1], [0], [0], [1], [0, 0, 1, 1], [], []>} : vector<8x200xf32>, vector<200x200xf32>, vector<8x200xf32> -> vector<8x200xf32>
    %33 = vector.broadcast %31 : vector<1x200xf32> to vector<8x200xf32>
    %34 = arith.addf %32, %33 : vector<8x200xf32>
    %cst_19 = arith.constant 0.000000e+00 : f32
    %35 = vector.broadcast %cst_19 : f32 to vector<8x200xf32>
    %36 = arith.maximumf %34, %35 : vector<8x200xf32>
    %c3_i32 = arith.constant 3 : i32
    %37 = arith.index_cast %c3_i32 : i32 to index
    %c0_20 = arith.constant 0 : index
    %c0_21 = arith.constant 0 : index
    %38 = vector.load %arg4[%37, %c0_20, %c0_21] : memref<25x200x200xf32, #tpu.memory_space<vmem>>, vector<1x200x200xf32>
    %39 = vector.shape_cast %38 : vector<1x200x200xf32> to vector<200x200xf32>
    %c0_22 = arith.constant 0 : index
    %40 = arith.index_cast %c3_i32 : i32 to index
    %c0_23 = arith.constant 0 : index
    %41 = vector.load %arg5[%c0_22, %40, %c0_23] : memref<1x25x200xf32, #tpu.memory_space<vmem>>, vector<1x1x200xf32>
    %42 = vector.shape_cast %41 : vector<1x1x200xf32> to vector<1x200xf32>
    %cst_24 = arith.constant dense<0.000000e+00> : vector<8x200xf32>
    %43 = tpu.matmul %36, %39, %cst_24 {dimension_numbers = #tpu.dot_dimension_numbers<[1], [0], [0], [1], [0, 0, 1, 1], [], []>} : vector<8x200xf32>, vector<200x200xf32>, vector<8x200xf32> -> vector<8x200xf32>
    %44 = vector.broadcast %42 : vector<1x200xf32> to vector<8x200xf32>
    %45 = arith.addf %43, %44 : vector<8x200xf32>
    %cst_25 = arith.constant 0.000000e+00 : f32
    %46 = vector.broadcast %cst_25 : f32 to vector<8x200xf32>
    %47 = arith.maximumf %45, %46 : vector<8x200xf32>
    %c4_i32 = arith.constant 4 : i32
    %48 = arith.index_cast %c4_i32 : i32 to index
    %c0_26 = arith.constant 0 : index
    %c0_27 = arith.constant 0 : index
    %49 = vector.load %arg4[%48, %c0_26, %c0_27] : memref<25x200x200xf32, #tpu.memory_space<vmem>>, vector<1x200x200xf32>
    %50 = vector.shape_cast %49 : vector<1x200x200xf32> to vector<200x200xf32>
    %c0_28 = arith.constant 0 : index
    %51 = arith.index_cast %c4_i32 : i32 to index
    %c0_29 = arith.constant 0 : index
    %52 = vector.load %arg5[%c0_28, %51, %c0_29] : memref<1x25x200xf32, #tpu.memory_space<vmem>>, vector<1x1x200xf32>
    %53 = vector.shape_cast %52 : vector<1x1x200xf32> to vector<1x200xf32>
    %cst_30 = arith.constant dense<0.000000e+00> : vector<8x200xf32>
    %54 = tpu.matmul %47, %50, %cst_30 {dimension_numbers = #tpu.dot_dimension_numbers<[1], [0], [0], [1], [0, 0, 1, 1], [], []>} : vector<8x200xf32>, vector<200x200xf32>, vector<8x200xf32> -> vector<8x200xf32>
    %55 = vector.broadcast %53 : vector<1x200xf32> to vector<8x200xf32>
    %56 = arith.addf %54, %55 : vector<8x200xf32>
    %cst_31 = arith.constant 0.000000e+00 : f32
    %57 = vector.broadcast %cst_31 : f32 to vector<8x200xf32>
    %58 = arith.maximumf %56, %57 : vector<8x200xf32>
    %c5_i32 = arith.constant 5 : i32
    %59 = arith.index_cast %c5_i32 : i32 to index
    %c0_32 = arith.constant 0 : index
    %c0_33 = arith.constant 0 : index
    %60 = vector.load %arg4[%59, %c0_32, %c0_33] : memref<25x200x200xf32, #tpu.memory_space<vmem>>, vector<1x200x200xf32>
    %61 = vector.shape_cast %60 : vector<1x200x200xf32> to vector<200x200xf32>
    %c0_34 = arith.constant 0 : index
    %62 = arith.index_cast %c5_i32 : i32 to index
    %c0_35 = arith.constant 0 : index
    %63 = vector.load %arg5[%c0_34, %62, %c0_35] : memref<1x25x200xf32, #tpu.memory_space<vmem>>, vector<1x1x200xf32>
    %64 = vector.shape_cast %63 : vector<1x1x200xf32> to vector<1x200xf32>
    %cst_36 = arith.constant dense<0.000000e+00> : vector<8x200xf32>
    %65 = tpu.matmul %58, %61, %cst_36 {dimension_numbers = #tpu.dot_dimension_numbers<[1], [0], [0], [1], [0, 0, 1, 1], [], []>} : vector<8x200xf32>, vector<200x200xf32>, vector<8x200xf32> -> vector<8x200xf32>
    %66 = vector.broadcast %64 : vector<1x200xf32> to vector<8x200xf32>
    %67 = arith.addf %65, %66 : vector<8x200xf32>
    %cst_37 = arith.constant 0.000000e+00 : f32
    %68 = vector.broadcast %cst_37 : f32 to vector<8x200xf32>
    %69 = arith.maximumf %67, %68 : vector<8x200xf32>
    %c6_i32 = arith.constant 6 : i32
    %70 = arith.index_cast %c6_i32 : i32 to index
    %c0_38 = arith.constant 0 : index
    %c0_39 = arith.constant 0 : index
    %71 = vector.load %arg4[%70, %c0_38, %c0_39] : memref<25x200x200xf32, #tpu.memory_space<vmem>>, vector<1x200x200xf32>
    %72 = vector.shape_cast %71 : vector<1x200x200xf32> to vector<200x200xf32>
    %c0_40 = arith.constant 0 : index
    %73 = arith.index_cast %c6_i32 : i32 to index
    %c0_41 = arith.constant 0 : index
    %74 = vector.load %arg5[%c0_40, %73, %c0_41] : memref<1x25x200xf32, #tpu.memory_space<vmem>>, vector<1x1x200xf32>
    %75 = vector.shape_cast %74 : vector<1x1x200xf32> to vector<1x200xf32>
    %cst_42 = arith.constant dense<0.000000e+00> : vector<8x200xf32>
    %76 = tpu.matmul %69, %72, %cst_42 {dimension_numbers = #tpu.dot_dimension_numbers<[1], [0], [0], [1], [0, 0, 1, 1], [], []>} : vector<8x200xf32>, vector<200x200xf32>, vector<8x200xf32> -> vector<8x200xf32>
    %77 = vector.broadcast %75 : vector<1x200xf32> to vector<8x200xf32>
    %78 = arith.addf %76, %77 : vector<8x200xf32>
    %cst_43 = arith.constant 0.000000e+00 : f32
    %79 = vector.broadcast %cst_43 : f32 to vector<8x200xf32>
    %80 = arith.maximumf %78, %79 : vector<8x200xf32>
    %c7_i32 = arith.constant 7 : i32
    %81 = arith.index_cast %c7_i32 : i32 to index
    %c0_44 = arith.constant 0 : index
    %c0_45 = arith.constant 0 : index
    %82 = vector.load %arg4[%81, %c0_44, %c0_45] : memref<25x200x200xf32, #tpu.memory_space<vmem>>, vector<1x200x200xf32>
    %83 = vector.shape_cast %82 : vector<1x200x200xf32> to vector<200x200xf32>
    %c0_46 = arith.constant 0 : index
    %84 = arith.index_cast %c7_i32 : i32 to index
    %c0_47 = arith.constant 0 : index
    %85 = vector.load %arg5[%c0_46, %84, %c0_47] : memref<1x25x200xf32, #tpu.memory_space<vmem>>, vector<1x1x200xf32>
    %86 = vector.shape_cast %85 : vector<1x1x200xf32> to vector<1x200xf32>
    %cst_48 = arith.constant dense<0.000000e+00> : vector<8x200xf32>
    %87 = tpu.matmul %80, %83, %cst_48 {dimension_numbers = #tpu.dot_dimension_numbers<[1], [0], [0], [1], [0, 0, 1, 1], [], []>} : vector<8x200xf32>, vector<200x200xf32>, vector<8x200xf32> -> vector<8x200xf32>
    %88 = vector.broadcast %86 : vector<1x200xf32> to vector<8x200xf32>
    %89 = arith.addf %87, %88 : vector<8x200xf32>
    %cst_49 = arith.constant 0.000000e+00 : f32
    %90 = vector.broadcast %cst_49 : f32 to vector<8x200xf32>
    %91 = arith.maximumf %89, %90 : vector<8x200xf32>
    %c8_i32 = arith.constant 8 : i32
    %92 = arith.index_cast %c8_i32 : i32 to index
    %c0_50 = arith.constant 0 : index
    %c0_51 = arith.constant 0 : index
    %93 = vector.load %arg4[%92, %c0_50, %c0_51] : memref<25x200x200xf32, #tpu.memory_space<vmem>>, vector<1x200x200xf32>
    %94 = vector.shape_cast %93 : vector<1x200x200xf32> to vector<200x200xf32>
    %c0_52 = arith.constant 0 : index
    %95 = arith.index_cast %c8_i32 : i32 to index
    %c0_53 = arith.constant 0 : index
    %96 = vector.load %arg5[%c0_52, %95, %c0_53] : memref<1x25x200xf32, #tpu.memory_space<vmem>>, vector<1x1x200xf32>
    %97 = vector.shape_cast %96 : vector<1x1x200xf32> to vector<1x200xf32>
    %cst_54 = arith.constant dense<0.000000e+00> : vector<8x200xf32>
    %98 = tpu.matmul %91, %94, %cst_54 {dimension_numbers = #tpu.dot_dimension_numbers<[1], [0], [0], [1], [0, 0, 1, 1], [], []>} : vector<8x200xf32>, vector<200x200xf32>, vector<8x200xf32> -> vector<8x200xf32>
    %99 = vector.broadcast %97 : vector<1x200xf32> to vector<8x200xf32>
    %100 = arith.addf %98, %99 : vector<8x200xf32>
    %cst_55 = arith.constant 0.000000e+00 : f32
    %101 = vector.broadcast %cst_55 : f32 to vector<8x200xf32>
    %102 = arith.maximumf %100, %101 : vector<8x200xf32>
    %c9_i32 = arith.constant 9 : i32
    %103 = arith.index_cast %c9_i32 : i32 to index
    %c0_56 = arith.constant 0 : index
    %c0_57 = arith.constant 0 : index
    %104 = vector.load %arg4[%103, %c0_56, %c0_57] : memref<25x200x200xf32, #tpu.memory_space<vmem>>, vector<1x200x200xf32>
    %105 = vector.shape_cast %104 : vector<1x200x200xf32> to vector<200x200xf32>
    %c0_58 = arith.constant 0 : index
    %106 = arith.index_cast %c9_i32 : i32 to index
    %c0_59 = arith.constant 0 : index
    %107 = vector.load %arg5[%c0_58, %106, %c0_59] : memref<1x25x200xf32, #tpu.memory_space<vmem>>, vector<1x1x200xf32>
    %108 = vector.shape_cast %107 : vector<1x1x200xf32> to vector<1x200xf32>
    %cst_60 = arith.constant dense<0.000000e+00> : vector<8x200xf32>
    %109 = tpu.matmul %102, %105, %cst_60 {dimension_numbers = #tpu.dot_dimension_numbers<[1], [0], [0], [1], [0, 0, 1, 1], [], []>} : vector<8x200xf32>, vector<200x200xf32>, vector<8x200xf32> -> vector<8x200xf32>
    %110 = vector.broadcast %108 : vector<1x200xf32> to vector<8x200xf32>
    %111 = arith.addf %109, %110 : vector<8x200xf32>
    %cst_61 = arith.constant 0.000000e+00 : f32
    %112 = vector.broadcast %cst_61 : f32 to vector<8x200xf32>
    %113 = arith.maximumf %111, %112 : vector<8x200xf32>
    %c10_i32 = arith.constant 10 : i32
    %114 = arith.index_cast %c10_i32 : i32 to index
    %c0_62 = arith.constant 0 : index
    %c0_63 = arith.constant 0 : index
    %115 = vector.load %arg4[%114, %c0_62, %c0_63] : memref<25x200x200xf32, #tpu.memory_space<vmem>>, vector<1x200x200xf32>
    %116 = vector.shape_cast %115 : vector<1x200x200xf32> to vector<200x200xf32>
    %c0_64 = arith.constant 0 : index
    %117 = arith.index_cast %c10_i32 : i32 to index
    %c0_65 = arith.constant 0 : index
    %118 = vector.load %arg5[%c0_64, %117, %c0_65] : memref<1x25x200xf32, #tpu.memory_space<vmem>>, vector<1x1x200xf32>
    %119 = vector.shape_cast %118 : vector<1x1x200xf32> to vector<1x200xf32>
    %cst_66 = arith.constant dense<0.000000e+00> : vector<8x200xf32>
    %120 = tpu.matmul %113, %116, %cst_66 {dimension_numbers = #tpu.dot_dimension_numbers<[1], [0], [0], [1], [0, 0, 1, 1], [], []>} : vector<8x200xf32>, vector<200x200xf32>, vector<8x200xf32> -> vector<8x200xf32>
    %121 = vector.broadcast %119 : vector<1x200xf32> to vector<8x200xf32>
    %122 = arith.addf %120, %121 : vector<8x200xf32>
    %cst_67 = arith.constant 0.000000e+00 : f32
    %123 = vector.broadcast %cst_67 : f32 to vector<8x200xf32>
    %124 = arith.maximumf %122, %123 : vector<8x200xf32>
    %c11_i32 = arith.constant 11 : i32
    %125 = arith.index_cast %c11_i32 : i32 to index
    %c0_68 = arith.constant 0 : index
    %c0_69 = arith.constant 0 : index
    %126 = vector.load %arg4[%125, %c0_68, %c0_69] : memref<25x200x200xf32, #tpu.memory_space<vmem>>, vector<1x200x200xf32>
    %127 = vector.shape_cast %126 : vector<1x200x200xf32> to vector<200x200xf32>
    %c0_70 = arith.constant 0 : index
    %128 = arith.index_cast %c11_i32 : i32 to index
    %c0_71 = arith.constant 0 : index
    %129 = vector.load %arg5[%c0_70, %128, %c0_71] : memref<1x25x200xf32, #tpu.memory_space<vmem>>, vector<1x1x200xf32>
    %130 = vector.shape_cast %129 : vector<1x1x200xf32> to vector<1x200xf32>
    %cst_72 = arith.constant dense<0.000000e+00> : vector<8x200xf32>
    %131 = tpu.matmul %124, %127, %cst_72 {dimension_numbers = #tpu.dot_dimension_numbers<[1], [0], [0], [1], [0, 0, 1, 1], [], []>} : vector<8x200xf32>, vector<200x200xf32>, vector<8x200xf32> -> vector<8x200xf32>
    %132 = vector.broadcast %130 : vector<1x200xf32> to vector<8x200xf32>
    %133 = arith.addf %131, %132 : vector<8x200xf32>
    %cst_73 = arith.constant 0.000000e+00 : f32
    %134 = vector.broadcast %cst_73 : f32 to vector<8x200xf32>
    %135 = arith.maximumf %133, %134 : vector<8x200xf32>
    %c12_i32 = arith.constant 12 : i32
    %136 = arith.index_cast %c12_i32 : i32 to index
    %c0_74 = arith.constant 0 : index
    %c0_75 = arith.constant 0 : index
    %137 = vector.load %arg4[%136, %c0_74, %c0_75] : memref<25x200x200xf32, #tpu.memory_space<vmem>>, vector<1x200x200xf32>
    %138 = vector.shape_cast %137 : vector<1x200x200xf32> to vector<200x200xf32>
    %c0_76 = arith.constant 0 : index
    %139 = arith.index_cast %c12_i32 : i32 to index
    %c0_77 = arith.constant 0 : index
    %140 = vector.load %arg5[%c0_76, %139, %c0_77] : memref<1x25x200xf32, #tpu.memory_space<vmem>>, vector<1x1x200xf32>
    %141 = vector.shape_cast %140 : vector<1x1x200xf32> to vector<1x200xf32>
    %cst_78 = arith.constant dense<0.000000e+00> : vector<8x200xf32>
    %142 = tpu.matmul %135, %138, %cst_78 {dimension_numbers = #tpu.dot_dimension_numbers<[1], [0], [0], [1], [0, 0, 1, 1], [], []>} : vector<8x200xf32>, vector<200x200xf32>, vector<8x200xf32> -> vector<8x200xf32>
    %143 = vector.broadcast %141 : vector<1x200xf32> to vector<8x200xf32>
    %144 = arith.addf %142, %143 : vector<8x200xf32>
    %cst_79 = arith.constant 0.000000e+00 : f32
    %145 = vector.broadcast %cst_79 : f32 to vector<8x200xf32>
    %146 = arith.maximumf %144, %145 : vector<8x200xf32>
    %c13_i32 = arith.constant 13 : i32
    %147 = arith.index_cast %c13_i32 : i32 to index
    %c0_80 = arith.constant 0 : index
    %c0_81 = arith.constant 0 : index
    %148 = vector.load %arg4[%147, %c0_80, %c0_81] : memref<25x200x200xf32, #tpu.memory_space<vmem>>, vector<1x200x200xf32>
    %149 = vector.shape_cast %148 : vector<1x200x200xf32> to vector<200x200xf32>
    %c0_82 = arith.constant 0 : index
    %150 = arith.index_cast %c13_i32 : i32 to index
    %c0_83 = arith.constant 0 : index
    %151 = vector.load %arg5[%c0_82, %150, %c0_83] : memref<1x25x200xf32, #tpu.memory_space<vmem>>, vector<1x1x200xf32>
    %152 = vector.shape_cast %151 : vector<1x1x200xf32> to vector<1x200xf32>
    %cst_84 = arith.constant dense<0.000000e+00> : vector<8x200xf32>
    %153 = tpu.matmul %146, %149, %cst_84 {dimension_numbers = #tpu.dot_dimension_numbers<[1], [0], [0], [1], [0, 0, 1, 1], [], []>} : vector<8x200xf32>, vector<200x200xf32>, vector<8x200xf32> -> vector<8x200xf32>
    %154 = vector.broadcast %152 : vector<1x200xf32> to vector<8x200xf32>
    %155 = arith.addf %153, %154 : vector<8x200xf32>
    %cst_85 = arith.constant 0.000000e+00 : f32
    %156 = vector.broadcast %cst_85 : f32 to vector<8x200xf32>
    %157 = arith.maximumf %155, %156 : vector<8x200xf32>
    %c14_i32 = arith.constant 14 : i32
    %158 = arith.index_cast %c14_i32 : i32 to index
    %c0_86 = arith.constant 0 : index
    %c0_87 = arith.constant 0 : index
    %159 = vector.load %arg4[%158, %c0_86, %c0_87] : memref<25x200x200xf32, #tpu.memory_space<vmem>>, vector<1x200x200xf32>
    %160 = vector.shape_cast %159 : vector<1x200x200xf32> to vector<200x200xf32>
    %c0_88 = arith.constant 0 : index
    %161 = arith.index_cast %c14_i32 : i32 to index
    %c0_89 = arith.constant 0 : index
    %162 = vector.load %arg5[%c0_88, %161, %c0_89] : memref<1x25x200xf32, #tpu.memory_space<vmem>>, vector<1x1x200xf32>
    %163 = vector.shape_cast %162 : vector<1x1x200xf32> to vector<1x200xf32>
    %cst_90 = arith.constant dense<0.000000e+00> : vector<8x200xf32>
    %164 = tpu.matmul %157, %160, %cst_90 {dimension_numbers = #tpu.dot_dimension_numbers<[1], [0], [0], [1], [0, 0, 1, 1], [], []>} : vector<8x200xf32>, vector<200x200xf32>, vector<8x200xf32> -> vector<8x200xf32>
    %165 = vector.broadcast %163 : vector<1x200xf32> to vector<8x200xf32>
    %166 = arith.addf %164, %165 : vector<8x200xf32>
    %cst_91 = arith.constant 0.000000e+00 : f32
    %167 = vector.broadcast %cst_91 : f32 to vector<8x200xf32>
    %168 = arith.maximumf %166, %167 : vector<8x200xf32>
    %c15_i32 = arith.constant 15 : i32
    %169 = arith.index_cast %c15_i32 : i32 to index
    %c0_92 = arith.constant 0 : index
    %c0_93 = arith.constant 0 : index
    %170 = vector.load %arg4[%169, %c0_92, %c0_93] : memref<25x200x200xf32, #tpu.memory_space<vmem>>, vector<1x200x200xf32>
    %171 = vector.shape_cast %170 : vector<1x200x200xf32> to vector<200x200xf32>
    %c0_94 = arith.constant 0 : index
    %172 = arith.index_cast %c15_i32 : i32 to index
    %c0_95 = arith.constant 0 : index
    %173 = vector.load %arg5[%c0_94, %172, %c0_95] : memref<1x25x200xf32, #tpu.memory_space<vmem>>, vector<1x1x200xf32>
    %174 = vector.shape_cast %173 : vector<1x1x200xf32> to vector<1x200xf32>
    %cst_96 = arith.constant dense<0.000000e+00> : vector<8x200xf32>
    %175 = tpu.matmul %168, %171, %cst_96 {dimension_numbers = #tpu.dot_dimension_numbers<[1], [0], [0], [1], [0, 0, 1, 1], [], []>} : vector<8x200xf32>, vector<200x200xf32>, vector<8x200xf32> -> vector<8x200xf32>
    %176 = vector.broadcast %174 : vector<1x200xf32> to vector<8x200xf32>
    %177 = arith.addf %175, %176 : vector<8x200xf32>
    %cst_97 = arith.constant 0.000000e+00 : f32
    %178 = vector.broadcast %cst_97 : f32 to vector<8x200xf32>
    %179 = arith.maximumf %177, %178 : vector<8x200xf32>
    %c16_i32 = arith.constant 16 : i32
    %180 = arith.index_cast %c16_i32 : i32 to index
    %c0_98 = arith.constant 0 : index
    %c0_99 = arith.constant 0 : index
    %181 = vector.load %arg4[%180, %c0_98, %c0_99] : memref<25x200x200xf32, #tpu.memory_space<vmem>>, vector<1x200x200xf32>
    %182 = vector.shape_cast %181 : vector<1x200x200xf32> to vector<200x200xf32>
    %c0_100 = arith.constant 0 : index
    %183 = arith.index_cast %c16_i32 : i32 to index
    %c0_101 = arith.constant 0 : index
    %184 = vector.load %arg5[%c0_100, %183, %c0_101] : memref<1x25x200xf32, #tpu.memory_space<vmem>>, vector<1x1x200xf32>
    %185 = vector.shape_cast %184 : vector<1x1x200xf32> to vector<1x200xf32>
    %cst_102 = arith.constant dense<0.000000e+00> : vector<8x200xf32>
    %186 = tpu.matmul %179, %182, %cst_102 {dimension_numbers = #tpu.dot_dimension_numbers<[1], [0], [0], [1], [0, 0, 1, 1], [], []>} : vector<8x200xf32>, vector<200x200xf32>, vector<8x200xf32> -> vector<8x200xf32>
    %187 = vector.broadcast %185 : vector<1x200xf32> to vector<8x200xf32>
    %188 = arith.addf %186, %187 : vector<8x200xf32>
    %cst_103 = arith.constant 0.000000e+00 : f32
    %189 = vector.broadcast %cst_103 : f32 to vector<8x200xf32>
    %190 = arith.maximumf %188, %189 : vector<8x200xf32>
    %c17_i32 = arith.constant 17 : i32
    %191 = arith.index_cast %c17_i32 : i32 to index
    %c0_104 = arith.constant 0 : index
    %c0_105 = arith.constant 0 : index
    %192 = vector.load %arg4[%191, %c0_104, %c0_105] : memref<25x200x200xf32, #tpu.memory_space<vmem>>, vector<1x200x200xf32>
    %193 = vector.shape_cast %192 : vector<1x200x200xf32> to vector<200x200xf32>
    %c0_106 = arith.constant 0 : index
    %194 = arith.index_cast %c17_i32 : i32 to index
    %c0_107 = arith.constant 0 : index
    %195 = vector.load %arg5[%c0_106, %194, %c0_107] : memref<1x25x200xf32, #tpu.memory_space<vmem>>, vector<1x1x200xf32>
    %196 = vector.shape_cast %195 : vector<1x1x200xf32> to vector<1x200xf32>
    %cst_108 = arith.constant dense<0.000000e+00> : vector<8x200xf32>
    %197 = tpu.matmul %190, %193, %cst_108 {dimension_numbers = #tpu.dot_dimension_numbers<[1], [0], [0], [1], [0, 0, 1, 1], [], []>} : vector<8x200xf32>, vector<200x200xf32>, vector<8x200xf32> -> vector<8x200xf32>
    %198 = vector.broadcast %196 : vector<1x200xf32> to vector<8x200xf32>
    %199 = arith.addf %197, %198 : vector<8x200xf32>
    %cst_109 = arith.constant 0.000000e+00 : f32
    %200 = vector.broadcast %cst_109 : f32 to vector<8x200xf32>
    %201 = arith.maximumf %199, %200 : vector<8x200xf32>
    %c18_i32 = arith.constant 18 : i32
    %202 = arith.index_cast %c18_i32 : i32 to index
    %c0_110 = arith.constant 0 : index
    %c0_111 = arith.constant 0 : index
    %203 = vector.load %arg4[%202, %c0_110, %c0_111] : memref<25x200x200xf32, #tpu.memory_space<vmem>>, vector<1x200x200xf32>
    %204 = vector.shape_cast %203 : vector<1x200x200xf32> to vector<200x200xf32>
    %c0_112 = arith.constant 0 : index
    %205 = arith.index_cast %c18_i32 : i32 to index
    %c0_113 = arith.constant 0 : index
    %206 = vector.load %arg5[%c0_112, %205, %c0_113] : memref<1x25x200xf32, #tpu.memory_space<vmem>>, vector<1x1x200xf32>
    %207 = vector.shape_cast %206 : vector<1x1x200xf32> to vector<1x200xf32>
    %cst_114 = arith.constant dense<0.000000e+00> : vector<8x200xf32>
    %208 = tpu.matmul %201, %204, %cst_114 {dimension_numbers = #tpu.dot_dimension_numbers<[1], [0], [0], [1], [0, 0, 1, 1], [], []>} : vector<8x200xf32>, vector<200x200xf32>, vector<8x200xf32> -> vector<8x200xf32>
    %209 = vector.broadcast %207 : vector<1x200xf32> to vector<8x200xf32>
    %210 = arith.addf %208, %209 : vector<8x200xf32>
    %cst_115 = arith.constant 0.000000e+00 : f32
    %211 = vector.broadcast %cst_115 : f32 to vector<8x200xf32>
    %212 = arith.maximumf %210, %211 : vector<8x200xf32>
    %c19_i32 = arith.constant 19 : i32
    %213 = arith.index_cast %c19_i32 : i32 to index
    %c0_116 = arith.constant 0 : index
    %c0_117 = arith.constant 0 : index
    %214 = vector.load %arg4[%213, %c0_116, %c0_117] : memref<25x200x200xf32, #tpu.memory_space<vmem>>, vector<1x200x200xf32>
    %215 = vector.shape_cast %214 : vector<1x200x200xf32> to vector<200x200xf32>
    %c0_118 = arith.constant 0 : index
    %216 = arith.index_cast %c19_i32 : i32 to index
    %c0_119 = arith.constant 0 : index
    %217 = vector.load %arg5[%c0_118, %216, %c0_119] : memref<1x25x200xf32, #tpu.memory_space<vmem>>, vector<1x1x200xf32>
    %218 = vector.shape_cast %217 : vector<1x1x200xf32> to vector<1x200xf32>
    %cst_120 = arith.constant dense<0.000000e+00> : vector<8x200xf32>
    %219 = tpu.matmul %212, %215, %cst_120 {dimension_numbers = #tpu.dot_dimension_numbers<[1], [0], [0], [1], [0, 0, 1, 1], [], []>} : vector<8x200xf32>, vector<200x200xf32>, vector<8x200xf32> -> vector<8x200xf32>
    %220 = vector.broadcast %218 : vector<1x200xf32> to vector<8x200xf32>
    %221 = arith.addf %219, %220 : vector<8x200xf32>
    %cst_121 = arith.constant 0.000000e+00 : f32
    %222 = vector.broadcast %cst_121 : f32 to vector<8x200xf32>
    %223 = arith.maximumf %221, %222 : vector<8x200xf32>
    %c20_i32 = arith.constant 20 : i32
    %224 = arith.index_cast %c20_i32 : i32 to index
    %c0_122 = arith.constant 0 : index
    %c0_123 = arith.constant 0 : index
    %225 = vector.load %arg4[%224, %c0_122, %c0_123] : memref<25x200x200xf32, #tpu.memory_space<vmem>>, vector<1x200x200xf32>
    %226 = vector.shape_cast %225 : vector<1x200x200xf32> to vector<200x200xf32>
    %c0_124 = arith.constant 0 : index
    %227 = arith.index_cast %c20_i32 : i32 to index
    %c0_125 = arith.constant 0 : index
    %228 = vector.load %arg5[%c0_124, %227, %c0_125] : memref<1x25x200xf32, #tpu.memory_space<vmem>>, vector<1x1x200xf32>
    %229 = vector.shape_cast %228 : vector<1x1x200xf32> to vector<1x200xf32>
    %cst_126 = arith.constant dense<0.000000e+00> : vector<8x200xf32>
    %230 = tpu.matmul %223, %226, %cst_126 {dimension_numbers = #tpu.dot_dimension_numbers<[1], [0], [0], [1], [0, 0, 1, 1], [], []>} : vector<8x200xf32>, vector<200x200xf32>, vector<8x200xf32> -> vector<8x200xf32>
    %231 = vector.broadcast %229 : vector<1x200xf32> to vector<8x200xf32>
    %232 = arith.addf %230, %231 : vector<8x200xf32>
    %cst_127 = arith.constant 0.000000e+00 : f32
    %233 = vector.broadcast %cst_127 : f32 to vector<8x200xf32>
    %234 = arith.maximumf %232, %233 : vector<8x200xf32>
    %c21_i32 = arith.constant 21 : i32
    %235 = arith.index_cast %c21_i32 : i32 to index
    %c0_128 = arith.constant 0 : index
    %c0_129 = arith.constant 0 : index
    %236 = vector.load %arg4[%235, %c0_128, %c0_129] : memref<25x200x200xf32, #tpu.memory_space<vmem>>, vector<1x200x200xf32>
    %237 = vector.shape_cast %236 : vector<1x200x200xf32> to vector<200x200xf32>
    %c0_130 = arith.constant 0 : index
    %238 = arith.index_cast %c21_i32 : i32 to index
    %c0_131 = arith.constant 0 : index
    %239 = vector.load %arg5[%c0_130, %238, %c0_131] : memref<1x25x200xf32, #tpu.memory_space<vmem>>, vector<1x1x200xf32>
    %240 = vector.shape_cast %239 : vector<1x1x200xf32> to vector<1x200xf32>
    %cst_132 = arith.constant dense<0.000000e+00> : vector<8x200xf32>
    %241 = tpu.matmul %234, %237, %cst_132 {dimension_numbers = #tpu.dot_dimension_numbers<[1], [0], [0], [1], [0, 0, 1, 1], [], []>} : vector<8x200xf32>, vector<200x200xf32>, vector<8x200xf32> -> vector<8x200xf32>
    %242 = vector.broadcast %240 : vector<1x200xf32> to vector<8x200xf32>
    %243 = arith.addf %241, %242 : vector<8x200xf32>
    %cst_133 = arith.constant 0.000000e+00 : f32
    %244 = vector.broadcast %cst_133 : f32 to vector<8x200xf32>
    %245 = arith.maximumf %243, %244 : vector<8x200xf32>
    %c22_i32 = arith.constant 22 : i32
    %246 = arith.index_cast %c22_i32 : i32 to index
    %c0_134 = arith.constant 0 : index
    %c0_135 = arith.constant 0 : index
    %247 = vector.load %arg4[%246, %c0_134, %c0_135] : memref<25x200x200xf32, #tpu.memory_space<vmem>>, vector<1x200x200xf32>
    %248 = vector.shape_cast %247 : vector<1x200x200xf32> to vector<200x200xf32>
    %c0_136 = arith.constant 0 : index
    %249 = arith.index_cast %c22_i32 : i32 to index
    %c0_137 = arith.constant 0 : index
    %250 = vector.load %arg5[%c0_136, %249, %c0_137] : memref<1x25x200xf32, #tpu.memory_space<vmem>>, vector<1x1x200xf32>
    %251 = vector.shape_cast %250 : vector<1x1x200xf32> to vector<1x200xf32>
    %cst_138 = arith.constant dense<0.000000e+00> : vector<8x200xf32>
    %252 = tpu.matmul %245, %248, %cst_138 {dimension_numbers = #tpu.dot_dimension_numbers<[1], [0], [0], [1], [0, 0, 1, 1], [], []>} : vector<8x200xf32>, vector<200x200xf32>, vector<8x200xf32> -> vector<8x200xf32>
    %253 = vector.broadcast %251 : vector<1x200xf32> to vector<8x200xf32>
    %254 = arith.addf %252, %253 : vector<8x200xf32>
    %cst_139 = arith.constant 0.000000e+00 : f32
    %255 = vector.broadcast %cst_139 : f32 to vector<8x200xf32>
    %256 = arith.maximumf %254, %255 : vector<8x200xf32>
    %c23_i32 = arith.constant 23 : i32
    %257 = arith.index_cast %c23_i32 : i32 to index
    %c0_140 = arith.constant 0 : index
    %c0_141 = arith.constant 0 : index
    %258 = vector.load %arg4[%257, %c0_140, %c0_141] : memref<25x200x200xf32, #tpu.memory_space<vmem>>, vector<1x200x200xf32>
    %259 = vector.shape_cast %258 : vector<1x200x200xf32> to vector<200x200xf32>
    %c0_142 = arith.constant 0 : index
    %260 = arith.index_cast %c23_i32 : i32 to index
    %c0_143 = arith.constant 0 : index
    %261 = vector.load %arg5[%c0_142, %260, %c0_143] : memref<1x25x200xf32, #tpu.memory_space<vmem>>, vector<1x1x200xf32>
    %262 = vector.shape_cast %261 : vector<1x1x200xf32> to vector<1x200xf32>
    %cst_144 = arith.constant dense<0.000000e+00> : vector<8x200xf32>
    %263 = tpu.matmul %256, %259, %cst_144 {dimension_numbers = #tpu.dot_dimension_numbers<[1], [0], [0], [1], [0, 0, 1, 1], [], []>} : vector<8x200xf32>, vector<200x200xf32>, vector<8x200xf32> -> vector<8x200xf32>
    %264 = vector.broadcast %262 : vector<1x200xf32> to vector<8x200xf32>
    %265 = arith.addf %263, %264 : vector<8x200xf32>
    %cst_145 = arith.constant 0.000000e+00 : f32
    %266 = vector.broadcast %cst_145 : f32 to vector<8x200xf32>
    %267 = arith.maximumf %265, %266 : vector<8x200xf32>
    %c24_i32 = arith.constant 24 : i32
    %268 = arith.index_cast %c24_i32 : i32 to index
    %c0_146 = arith.constant 0 : index
    %c0_147 = arith.constant 0 : index
    %269 = vector.load %arg4[%268, %c0_146, %c0_147] : memref<25x200x200xf32, #tpu.memory_space<vmem>>, vector<1x200x200xf32>
    %270 = vector.shape_cast %269 : vector<1x200x200xf32> to vector<200x200xf32>
    %c0_148 = arith.constant 0 : index
    %271 = arith.index_cast %c24_i32 : i32 to index
    %c0_149 = arith.constant 0 : index
    %272 = vector.load %arg5[%c0_148, %271, %c0_149] : memref<1x25x200xf32, #tpu.memory_space<vmem>>, vector<1x1x200xf32>
    %273 = vector.shape_cast %272 : vector<1x1x200xf32> to vector<1x200xf32>
    %cst_150 = arith.constant dense<0.000000e+00> : vector<8x200xf32>
    %274 = tpu.matmul %267, %270, %cst_150 {dimension_numbers = #tpu.dot_dimension_numbers<[1], [0], [0], [1], [0, 0, 1, 1], [], []>} : vector<8x200xf32>, vector<200x200xf32>, vector<8x200xf32> -> vector<8x200xf32>
    %275 = vector.broadcast %273 : vector<1x200xf32> to vector<8x200xf32>
    %276 = arith.addf %274, %275 : vector<8x200xf32>
    %cst_151 = arith.constant 0.000000e+00 : f32
    %277 = vector.broadcast %cst_151 : f32 to vector<8x200xf32>
    %278 = arith.maximumf %276, %277 : vector<8x200xf32>
    %c25_i32 = arith.constant 25 : i32
    %c0_152 = arith.constant 0 : index
    %c0_153 = arith.constant 0 : index
    %279 = vector.load %arg9[%c0_152, %c0_153] : memref<8x200xf32, #tpu.memory_space<vmem>>, vector<8x200xf32>
    tpu.vector_store %arg9[%c0_152, %c0_153], %278 {strides = array<i32>} : memref<8x200xf32, #tpu.memory_space<vmem>>, vector<8x200xf32>,
    %c7_i32_154 = arith.constant 7 : i32
    %280 = arith.cmpi eq, %arg0, %c7_i32_154 : i32
    %281 = arith.extui %280 : i1 to i32
    %c0_i32_155 = arith.constant 0 : i32
    %282 = arith.cmpi ne, %281, %c0_i32_155 : i32
    scf.if %282 {
      %c0_156 = arith.constant 0 : index
      %c0_157 = arith.constant 0 : index
      %283 = vector.load %arg9[%c0_156, %c0_157] : memref<8x200xf32, #tpu.memory_space<vmem>>, vector<8x200xf32>
      %c0_158 = arith.constant 0 : index
      %c0_159 = arith.constant 0 : index
      %284 = vector.load %arg6[%c0_158, %c0_159] : memref<200x8xf32, #tpu.memory_space<vmem>>, vector<200x8xf32>
      %cst_160 = arith.constant dense<0.000000e+00> : vector<8x8xf32>
      %285 = tpu.matmul %283, %284, %cst_160 {dimension_numbers = #tpu.dot_dimension_numbers<[1], [0], [0], [1], [0, 0, 1, 1], [], []>} : vector<8x200xf32>, vector<200x8xf32>, vector<8x8xf32> -> vector<8x8xf32>
      %c0_161 = arith.constant 0 : index
      %c0_162 = arith.constant 0 : index
      %286 = vector.load %arg7[%c0_161, %c0_162] : memref<1x8xf32, #tpu.memory_space<vmem>>, vector<1x8xf32>
      %287 = vector.broadcast %286 : vector<1x8xf32> to vector<8x8xf32>
      %288 = arith.addf %285, %287 : vector<8x8xf32>
      %289 = arith.negf %288 : vector<8x8xf32>
      %290 = math.exp %289 : vector<8x8xf32>
      %cst_163 = arith.constant 1.000000e+00 : f32
      %291 = vector.broadcast %cst_163 : f32 to vector<8x8xf32>
      %292 = arith.addf %291, %290 : vector<8x8xf32>
      %293 = arith.divf %291, %292 : vector<8x8xf32>
      %c0_164 = arith.constant 0 : index
      %c0_165 = arith.constant 0 : index
      %294 = vector.load %arg8[%c0_164, %c0_165] : memref<8x8xf32, #tpu.memory_space<vmem>>, vector<8x8xf32>
      tpu.vector_store %arg8[%c0_164, %c0_165], %293 {strides = array<i32>} : memref<8x8xf32, #tpu.memory_space<vmem>>, vector<8x8xf32>,
    } else {
    }
    return
  }
  func.func @transform_0(%arg0: i32) -> (i32, i32) {
    %c0_i32 = arith.constant 0 : i32
    %c0_i32_0 = arith.constant 0 : i32
    %c0_i32_1 = arith.constant 0 : i32
    return %c0_i32, %c0_i32_0 : i32, i32
  }
  func.func @transform_1(%arg0: i32) -> (i32, i32) {
    %c0_i32 = arith.constant 0 : i32
    %c0_i32_0 = arith.constant 0 : i32
    %c0_i32_1 = arith.constant 0 : i32
    return %c0_i32, %c0_i32_0 : i32, i32
  }
  func.func @transform_2(%arg0: i32) -> (i32, i32) {
    %c0_i32 = arith.constant 0 : i32
    %c0_i32_0 = arith.constant 0 : i32
    %c0_i32_1 = arith.constant 0 : i32
    return %c0_i32, %c0_i32_0 : i32, i32
  }
  func.func @transform_3(%arg0: i32) -> (i32, i32, i32) {
    %c0_i32 = arith.constant 0 : i32
    %c0_i32_0 = arith.constant 0 : i32
    %c0_i32_1 = arith.constant 0 : i32
    return %arg0, %c0_i32, %c0_i32_0 : i32, i32, i32
  }
  func.func @transform_4(%arg0: i32) -> (i32, i32, i32) {
    %c0_i32 = arith.constant 0 : i32
    %c0_i32_0 = arith.constant 0 : i32
    %c0_i32_1 = arith.constant 0 : i32
    return %arg0, %c0_i32, %c0_i32_0 : i32, i32, i32
  }
  func.func @transform_5(%arg0: i32) -> (i32, i32) {
    %c0_i32 = arith.constant 0 : i32
    %c0_i32_0 = arith.constant 0 : i32
    %c0_i32_1 = arith.constant 0 : i32
    return %c0_i32, %c0_i32_0 : i32, i32
  }
  func.func @transform_6(%arg0: i32) -> (i32, i32) {
    %c0_i32 = arith.constant 0 : i32
    %c0_i32_0 = arith.constant 0 : i32
    %c0_i32_1 = arith.constant 0 : i32
    return %c0_i32, %c0_i32_0 : i32, i32
  }
  func.func @transform_7(%arg0: i32) -> (i32, i32) {
    %c0_i32 = arith.constant 0 : i32
    %c0_i32_0 = arith.constant 0 : i32
    %c0_i32_1 = arith.constant 0 : i32
    return %c0_i32, %c0_i32_0 : i32, i32
  }
}

</mosaic_0001>

<bundles_post_ra>
// kernel: tpu_custom_call.1
= control target key start
LH: loop header
LB: loop body
LE: loop exit
PB: predicated region body
PF: predicated region fallthrough
CT: control target
= control target key end

     0   :  { %12 = vsyncpa [#allocation4], 0  ;;  %s7450_s0 = inlined_call_operand.hbm [shape: f32[8,16], index: 0, kind: input, shape index: {}]   ;;  %s7451_s1 = inlined_call_operand.hbm [shape: f32[16,200], index: 1, kind: input, shape index: {}]   ;;  %s7452_s2 = inlined_call_operand.hbm [shape: f32[1,200], index: 2, kind: input, shape index: {}]   ;;  %s7453_s3 = inlined_call_operand.hbm [shape: f32[200,200,200], index: 3, kind: input, shape index: {}]   ;;  %s7454_s4 = inlined_call_operand.vmem [shape: f32[8,25,200], index: 4, kind: input, shape index: {}]   ;;  %s7455_s5 = inlined_call_operand.vmem [shape: f32[200,8], index: 5, kind: input, shape index: {}]   ;;  %s7456_s6 = inlined_call_operand.hbm [shape: f32[1,8], index: 6, kind: input, shape index: {}]   ;;  %s7457_s7 = inlined_call_operand.hbm [shape: f32[8,8], index: 7, kind: output, shape index: {}]  }
   0x1   :  { %13 = vsyncpa [#allocation7], 0 }
   0x2   :  { %14 = vsyncpa [#allocation10], 0 }
   0x3   :  { %16 = vsyncpa [#allocation10 + $0x1], 0 }
   0x4   :  { %17 = vsyncpa [#allocation5], 0  ;;  %s5896_s24 = smov 0   ;;  %s5898_s25 = smov 0  }
   0x5   :  { %s5900_s26 = smov 0   ;;  %s5902_s27 = smov 0  }
   0x6 LB: > { %s5915_s28 = sadd.s32 4294967295, %s5847_s27   ;;  %p106_p0 = scmp.ne.s32.totalorder %s5839_s25, %s5835_s24  ;;  %s5847_s27 = sphi %s5902_s27, %s7469_s27   ;;  %s5843_s26 = sphi %s5900_s26, %s7468_s26   ;;  %s5839_s25 = sphi %s5898_s25, %s7467_s25   ;;  %s5835_s24 = sphi %s5896_s24, %s7466_s24  }
   0x7   : > { %p107_p1 = scmp.eq.s32.totalorder %s5915_s28, 0  ;;  %p4222_p2 = scmp.ge.s32.totalorder %s5847_s27, 1 }
   0x8   : > { %p206_p3 = scmp.lt.s32.totalorder %s5847_s27, 9  ;;  %p4223_p4 = scmp.ne.s32.totalorder %s5915_s28, 0 }
   0x9   : > { %p5924_p5 = por %p107_p1, %p106_p0  ;;  %s229_s9 = sshll.u32 %s7451_s1, 4  ;;  %s230_s9 = int_to_ptr.hbm [resolvable:$true] %s229_s9 }
   0xa   : > { %p5931_p6 = pnand %p4222_p2, %p206_p3  ;;  %s5849_s11 = smov [#allocation6]  }
   0xb   : > { %s231_s12 = sshll.u32 %s5849_s11, 4  ;;  %s259_s16 = sshll.u32 %s7456_s6, 4  ;;  %s232_s12 = int_to_ptr.vmem [resolvable:$true] %s231_s12  ;;  %s260_s16 = int_to_ptr.hbm [resolvable:$true] %s259_s16 }
   0xc   : > { %p5546_p7 = pneg %p5931_p6  ;;  %s7458_s17 = smov 256  }
   0xd   : > { %s7459_s18 = smov 16   ;;  %s218_s21 = sshll.u32 %s7450_s0, 4  ;;  %s219_s21 = int_to_ptr.hbm [resolvable:$true] %s218_s21 }
   0xe   : > { %p5939_p8 = pnand %p5546_p7, %p107_p1  ;;  %s5852_s22 = smov [#allocation11]  }
   0xf   : > { %s261_s23 = sshll.u32 %s5852_s22, 4  ;;  %s5853_s24 = smov [#allocation3]   ;;  %s262_s23 = int_to_ptr.vmem [resolvable:$true] %s261_s23 }
  0x10   : > { %5552 = dma.hbm_to_vmem [thread:$0]  (!%p5939_p8), %s230_s9, 512, %s232_s12, [#allocation7], %s7458_s17, %s7458_s17, %s7459_s18  }
  0x11   : > { %5558 = dma.hbm_to_vmem [thread:$0]  (!%p5939_p8), %s260_s16, 16, %s262_s23, [#allocation10]  }
  0x12   : > { %s220_s30 = sshll.u32 %s5853_s24, 4  ;;  %s244_s11 = sshll.u32 %s7452_s2, 4  ;;  %s221_s30 = int_to_ptr.vmem [resolvable:$true] %s220_s30  ;;  %s245_s11 = int_to_ptr.hbm [resolvable:$true] %s244_s11 }
  0x13   : > { %5549 = dma.hbm_to_vmem [thread:$0]  (!%p5939_p8), %s219_s21, 128, %s221_s30, [#allocation4]  }
  0x14   : > { %s5854_s12 = smov [#allocation8]   ;;  %s5962_s15 = sadd.s32 1, %s5847_s27  }
  0x15   : > { %s246_s14 = sshll.u32 %s5854_s12, 4  ;;  %s90_s16 = ssub.s32 %s5847_s27, %s5962_s15  ;;  %s247_s14 = int_to_ptr.vmem [resolvable:$true] %s246_s14 }
  0x16   : > { %5555 = dma.hbm_to_vmem [thread:$0]  (!%p5939_p8), %s245_s11, 32, %s247_s14, [#allocation7]  }
  0x17   : > { %s93_s19 = sadd.s32 1, %s5843_s26  ;;  %p91_p9 = scmp.eq.s32.totalorder %s90_s16, 0 }
  0x18   : > { %p100_p10 = scmp.ne.s32.totalorder %s5843_s26, %s5839_s25  ;;  %p101_p11 = scmp.eq.s32.totalorder %s5847_s27, 0 }
  0x19   : > { %p5567_p12 = scmp.lt.s32.totalorder %s5847_s27, 8  ;;  %s272_s22 = sand.u32 1, %s5847_s27  }
  0x1a   : > { %s5974_s20 = scalar_select %p91_p9, %s5843_s26, %s93_s19  }
  0x1b   : > { %p102_p13 = por %p101_p11, %p100_p10  ;;  %s274_s21 = sand.u32 1, %s5843_s26  }
  0x1c   : > { %s5521_s23 = smul.u32 10000, %s274_s21  ;;  %s273_s16 = scalar_lea.sflag [#allocation10], %s272_s22 }
  0x1d   : > { %p5978_p0 = pnand %p5567_p12, %p102_p13  ;;  %s5568_s13 = smul.u32 10000, %s5847_s27 }
  0x1e   : > { %s276_s11 = scalar_lea.vmem [#allocation9], %s5521_s23  ;;  %s5746_s18 = scalar_lea.hbm %s7453_s3, 80000 }
  0x1f   : > { %s282_s9 = scalar_lea.hbm %s7453_s3, %s5568_s13  ;;  %s285_s12 = sshll.u32 %s276_s11, 4  ;;  %s286_s12 = int_to_ptr.vmem [resolvable:$true] %s285_s12 }
  0x20   : > { %s283_s14 = sshll.u32 %s282_s9, 4  ;;  %p5743_p3 = pneg %p5978_p0  ;;  %s284_s14 = int_to_ptr.hbm [resolvable:$true] %s283_s14 }
  0x21   : > { %s5739_s19 = sshra.s32 %s284_s14, 4  ;;  %s5740_s19 = int_to_ptr.hbm [resolvable:$true] %s5739_s19 }
  0x22   : > { %s5741_s17 = scalar_lea.hbm %s5740_s19, 10000  ;;  %p5747_p9 = scmp.lt.s32.totalorder %s5740_s19, %s7453_s3 }
  0x23   : > { %p5742_p2 = scmp.ne.s32.totalorder %s5740_s19, %s5741_s17  ;;  %p5748_p10 = scmp.lt.s32.totalorder %s5746_s18, %s5741_s17 }
  0x25   : > { %p5744_p7 = pnand %p5743_p3, %p5742_p2  ;;  %p5749_p11 = por %p5748_p10, %p5747_p9 }
  0x27   : > { %p5745_p8 = pneg %p5744_p7 }
  0x29   : > { %p5750_p12 = pnand %p5749_p11, %p5745_p8 }
  0x2b   : > { %5753 = shalt.err (!%p5750_p12)
}
  0x2c   : > { %s7464_s22 = smov 16   ;;  %s7465_s23 = smov 256  }
  0x2d   : > { %5562 = dma.hbm_to_vmem [thread:$0]  (!%p5978_p0), %s284_s14, 160000, %s286_s12, %s273_s16, %s7465_s23, %s7465_s23, %s7464_s22  }
  0x2e   : > { %305 = sbr.rel (%p5931_p6) target bundleno = 3870 (0xf1e), region = 48 }
  0x33   : > { %5814 = dma.done.wait (%p107_p1), [#allocation4], 128  }
  0x34   : > { %5816 = vsyncadd (%p107_p1), [#allocation4], 4294967168 }
  0x35   : > { %5818 = dma.done.wait (%p107_p1), [#allocation7], 544  }
  0x36   : > { %5820 = vsyncadd (%p107_p1), [#allocation7], 4294966752  ;;  %s322_s17 = sand.u32 1, %s5915_s28   ;;  %s324_s18 = sand.u32 1, %s5839_s25  }
  0x37   : > { %s5523_s24 = smul.u32 10000, %s324_s18  ;;  %s323_s10 = scalar_lea.sflag [#allocation10], %s322_s17 }
  0x39   : > { %s6011_s8 = scalar_lea.vmem [#allocation9], %s5523_s24 }
  0x3a   : > { %5822 = dma.done.wait (%p5924_p5), %s323_s10, 160000  }
  0x3b   : > { %5824 = vsyncadd (%p5924_p5), %s323_s10, 4294807296 }
  0x3c   : > { %5826 = dma.done.wait (%p107_p1), [#allocation10], 16  }
  0x3d   : > { %5828 = vsyncadd (%p107_p1), [#allocation10], 4294967280  ;;  %p364_p6 = scmp.lt.s32.totalorder %s5915_s28, 7 }
  0x3e   : > { %372 = sbr.rel (%p4223_p4) target bundleno = 203 (0xcb), region = 72 }
  0x3f   : > { %s365_s9 = scalar_select %p364_p6, %s5915_s28, 7 }
  0x41   : > { %s5520_s11 = sshll.u32 %s365_s9, 6 }
  0x42   : > { %s6026_s16 = scalar_lea.vmem %s7454_s4, %s5520_s11 }
  0x43   : > { %v376_v0 = vld [vmem:[#allocation6 + $0x10] sm:$0xff]  ;;  %v377_v1 = vld [vmem:[#allocation6 + $0x18] sm:$0xff]  ;;  %v374_v2 = vld [vmem:[#allocation6] sm:$0xff]  ;;  %vm384_vm0 = vcmask 130048   ;;  %vm431_vm1 = vcmask 588800  }
  0x44   : > { %402 = vmatpush.msra.mxu0 %v376_v0  ;;  %422 = vmatpush.msra.mxu1 %v377_v1  ;;  %v375_v3 = vld [vmem:[#allocation6 + $0x8] sm:$0xff]  ;;  %v373_v4 = vld [vmem:[#allocation3] sm:$0xff]  ;;  %v378_v5 = vld [vmem:[#allocation8] sm:$0x3] }
  0x45   : > { %v380_v6 = vperm.slane %v378_v5, 0  ;;  %v381_v7 = vperm.slane %v378_v5, 1 }
  0x46   : > { %403 = vmatpush.msra.mxu0 %v374_v2  ;;  %423 = vmatpush.msra.mxu1 %v375_v3 }
  0x47   : > { %4237 = vmatmul.msk.f32.vlgmr.msra.gmra.mxu0 %vm384_vm0, %v373_v4  ;;  %4238 = vmatmul.msk.f32.vlgmr.msra.gmra.mxu1 %vm384_vm0, %v373_v4 }
  0xc4   : > { %v405_v8 = vpop.f32.mrf.mxu0  ;;  %v425_v9 = vpop.f32.mrf.mxu1 }
  0xc5   : > { %v406_v10 = vadd.f32 %v405_v8, %v380_v6  ;;  %v426_v11 = vadd.f32 %v425_v9, %v381_v7 }
  0xc7   : > { %v428_v12 = vmax.f32 %v406_v10, 0.0  ;;  %v429_v13 = vmax.f32 %v426_v11, 0.0 }
  0xc9   : > { %430 = vst [vmem:[#allocation2] sm:$0xff] %v428_v12 }
  0xca   : > { %432 = vst.msk [vmem:[#allocation2 + $0x8] sm:$0xff] %vm431_vm1, %v429_v13 }
  0xcb PF: > { %v466_v14 = vld [vmem:[%s6011_s8 + $0xf8] sm:$0xff]  ;;  %v464_v15 = vld [vmem:[%s6011_s8 + $0xe8] sm:$0xff]  ;;  %v465_v16 = vld [vmem:[%s6011_s8 + $0xf0] sm:$0xff]  ;;  %vm491_vm2 = vcmask 588800   ;;  %p5513_p1 = scmp.ne.s32.totalorder %s5915_s28, 7 }
  0xcc   : > { %535 = vmatpush.msra.mxu2 %v466_v14  ;;  %v462_v17 = vld [vmem:[%s6011_s8 + $0xd8] sm:$0xff]  ;;  %495 = vmatpush.msra.mxu0 %v465_v16  ;;  %v463_v18 = vld [vmem:[%s6011_s8 + $0xe0] sm:$0xff]  ;;  %v461_v19 = vld [vmem:[%s6011_s8 + $0xd0] sm:$0xff] }
  0xcd   : > { %v460_v20 = vld [vmem:[%s6011_s8 + $0xc8] sm:$0xff]  ;;  %v459_v22 = vld [vmem:[%s6011_s8 + $0xc0] sm:$0xff]  ;;  %v482_v23 = vld [vmem:[%s6011_s8 + $0x178] sm:$0xff] }
  0xce   : > { %536 = vmatpush.msra.mxu2 %v464_v15  ;;  %496 = vmatpush.msra.mxu0 %v463_v18  ;;  %v484_v21 = vld [vmem:[%s6011_s8 + $0x188] sm:$0xff]  ;;  %v458_v24 = vld [vmem:[%s6011_s8 + $0xb8] sm:$0xff]  ;;  %v457_v26 = vld [vmem:[%s6011_s8 + $0xb0] sm:$0xff] }
  0xcf   : > { %562 = vmatpush.msra.mxu3 %v484_v21  ;;  %v480_v25 = vld [vmem:[%s6011_s8 + $0x168] sm:$0xff]  ;;  %v478_v28 = vld [vmem:[%s6011_s8 + $0x158] sm:$0xff]  ;;  %v455_v29 = vld [vmem:[%s6011_s8 + $0xa0] sm:$0xff] }
  0xd0   : > { %537 = vmatpush.msra.mxu2 %v462_v17  ;;  %497 = vmatpush.msra.mxu0 %v461_v19  ;;  %v456_v27 = vld [vmem:[%s6011_s8 + $0xa8] sm:$0xff]  ;;  %v483_v30 = vld [vmem:[%s6011_s8 + $0x180] sm:$0xff]  ;;  %v454_v31 = vld [vmem:[%s6011_s8 + $0x98] sm:$0xff] }
  0xd1   : > { %563 = vmatpush.msra.mxu3 %v482_v23  ;;  %v476_v32 = vld [vmem:[%s6011_s8 + $0x148] sm:$0xff]  ;;  %522 = vmatpush.msra.mxu1 %v483_v30  ;;  %v481_v33 = vld [vmem:[%s6011_s8 + $0x170] sm:$0xff]  ;;  %v479_v35 = vld [vmem:[%s6011_s8 + $0x160] sm:$0xff] }
  0xd2   : > { %538 = vmatpush.msra.mxu2 %v460_v20  ;;  %498 = vmatpush.msra.mxu0 %v459_v22  ;;  %v453_v34 = vld [vmem:[%s6011_s8 + $0x90] sm:$0xff]  ;;  %v452_v36 = vld [vmem:[%s6011_s8 + $0x88] sm:$0xff]  ;;  %v474_v37 = vld [vmem:[%s6011_s8 + $0x138] sm:$0xff] }
  0xd3   : > { %564 = vmatpush.msra.mxu3 %v480_v25  ;;  %523 = vmatpush.msra.mxu1 %v481_v33  ;;  %v451_v38 = vld [vmem:[%s6011_s8 + $0x80] sm:$0xff]  ;;  %v477_v39 = vld [vmem:[%s6011_s8 + $0x150] sm:$0xff]  ;;  %v450_v40 = vld [vmem:[%s6011_s8 + $0x78] sm:$0xff] }
  0xd4   : > { %539 = vmatpush.msra.mxu2 %v458_v24  ;;  %499 = vmatpush.msra.mxu0 %v457_v26  ;;  %v472_v41 = vld [vmem:[%s6011_s8 + $0x128] sm:$0xff]  ;;  %v449_v42 = vld [vmem:[%s6011_s8 + $0x70] sm:$0xff]  ;;  %v475_v43 = vld [vmem:[%s6011_s8 + $0x140] sm:$0xff] }
  0xd5   : > { %565 = vmatpush.msra.mxu3 %v478_v28  ;;  %524 = vmatpush.msra.mxu1 %v479_v35  ;;  %v448_v44 = vld [vmem:[%s6011_s8 + $0x68] sm:$0xff]  ;;  %v470_v45 = vld [vmem:[%s6011_s8 + $0x118] sm:$0xff]  ;;  %v447_v46 = vld [vmem:[%s6011_s8 + $0x60] sm:$0xff] }
  0xd6   : > { %540 = vmatpush.msra.mxu2 %v456_v27  ;;  %500 = vmatpush.msra.mxu0 %v455_v29  ;;  %v473_v47 = vld [vmem:[%s6011_s8 + $0x130] sm:$0xff]  ;;  %v446_v48 = vld [vmem:[%s6011_s8 + $0x58] sm:$0xff]  ;;  %v468_v49 = vld [vmem:[%s6011_s8 + $0x108] sm:$0xff] }
  0xd7   : > { %566 = vmatpush.msra.mxu3 %v476_v32  ;;  %525 = vmatpush.msra.mxu1 %v477_v39  ;;  %v445_v50 = vld [vmem:[%s6011_s8 + $0x50] sm:$0xff]  ;;  %v444_v52 = vld [vmem:[%s6011_s8 + $0x48] sm:$0xff]  ;;  %v471_v53 = vld [vmem:[%s6011_s8 + $0x120] sm:$0xff] }
  0xd8   : > { %541 = vmatpush.msra.mxu2 %v454_v31  ;;  %501 = vmatpush.msra.mxu0 %v453_v34  ;;  %v434_v51 = vld [vmem:[#allocation2 + $0x8] sm:$0xff]  ;;  %v433_v5 = vld [vmem:[#allocation2] sm:$0xff] }
  0xd9   : > { %567 = vmatpush.msra.mxu3 %v474_v37  ;;  %526 = vmatpush.msra.mxu1 %v475_v43  ;;  %v443_v54 = vld [vmem:[%s6011_s8 + $0x40] sm:$0xff]  ;;  %v4289_v55 = vld [vmem:[%s6011_s8 + $0x310] sm:$0xff]  ;;  %v442_v56 = vld [vmem:[%s6011_s8 + $0x38] sm:$0xff] }
  0xda   : > { %542 = vmatpush.msra.mxu2 %v452_v36  ;;  %502 = vmatpush.msra.mxu0 %v451_v38  ;;  %v469_v57 = vld [vmem:[%s6011_s8 + $0x110] sm:$0xff]  ;;  %v4287_v59 = vld [vmem:[%s6011_s8 + $0x300] sm:$0xff]  ;;  %v440_v60 = vld [vmem:[%s6011_s8 + $0x28] sm:$0xff] }
  0xdb   : > { %568 = vmatpush.msra.mxu3 %v472_v41  ;;  %527 = vmatpush.msra.mxu1 %v473_v47  ;;  %v441_v58 = vld [vmem:[%s6011_s8 + $0x30] sm:$0xff]  ;;  %v467_v61 = vld [vmem:[%s6011_s8 + $0x100] sm:$0xff]  ;;  %v438_v63 = vld [vmem:[%s6011_s8 + $0x18] sm:$0xff] }
  0xdc   : > { %543 = vmatpush.msra.mxu2 %v450_v40  ;;  %503 = vmatpush.msra.mxu0 %v449_v42  ;;  %v439_v62 = vld [vmem:[%s6011_s8 + $0x20] sm:$0xff]  ;;  %v437_v1 = vld [vmem:[%s6011_s8 + $0x10] sm:$0xff]  ;;  %v436_v3 = vld [vmem:[%s6011_s8 + $0x8] sm:$0xff] }
  0xdd   : > { %569 = vmatpush.msra.mxu3 %v470_v45  ;;  %528 = vmatpush.msra.mxu1 %v471_v53  ;;  %v4271_v0 = vld [vmem:[%s6011_s8 + $0x280] sm:$0xff]  ;;  %v4285_v2 = vld [vmem:[%s6011_s8 + $0x2f0] sm:$0xff]  ;;  %v4272_v8 = vld [vmem:[%s6011_s8 + $0x288] sm:$0xff] }
  0xde   : > { %544 = vmatpush.msra.mxu2 %v448_v44  ;;  %504 = vmatpush.msra.mxu0 %v447_v46  ;;  %v4269_v4 = vld [vmem:[%s6011_s8 + $0x270] sm:$0xff]  ;;  %v435_v6 = vld [vmem:[%s6011_s8] sm:$0xff]  ;;  %v4290_v9 = vld [vmem:[%s6011_s8 + $0x318] sm:$0xff] }
  0xdf   : > { %570 = vmatpush.msra.mxu3 %v468_v49  ;;  %529 = vmatpush.msra.mxu1 %v469_v57  ;;  %v4267_v7 = vld [vmem:[%s6011_s8 + $0x260] sm:$0xff]  ;;  %v4265_v10 = vld [vmem:[%s6011_s8 + $0x250] sm:$0xff]  ;;  %v4270_v12 = vld [vmem:[%s6011_s8 + $0x278] sm:$0xff] }
  0xe0   : > { %545 = vmatpush.msra.mxu2 %v446_v48  ;;  %505 = vmatpush.msra.mxu0 %v445_v50  ;;  %v4283_v11 = vld [vmem:[%s6011_s8 + $0x2e0] sm:$0xff]  ;;  %v4288_v13 = vld [vmem:[%s6011_s8 + $0x308] sm:$0xff]  ;;  %v4281_v15 = vld [vmem:[%s6011_s8 + $0x2d0] sm:$0xff] }
  0xe1   : > { %4240 = vmatmul.msk.f32.vlgmr.msra.gmra.mxu3 %vm491_vm2, %v434_v51  ;;  %530 = vmatpush.msra.mxu1 %v467_v61  ;;  %v4263_v14 = vld [vmem:[%s6011_s8 + $0x240] sm:$0xff]  ;;  %v4268_v16 = vld [vmem:[%s6011_s8 + $0x268] sm:$0xff]  ;;  %v4286_v17 = vld [vmem:[%s6011_s8 + $0x2f8] sm:$0xff] }
  0xe2   : > { %546 = vmatpush.msra.mxu2 %v444_v52  ;;  %506 = vmatpush.msra.mxu0 %v443_v54  ;;  %v4261_v18 = vld [vmem:[%s6011_s8 + $0x230] sm:$0xff]  ;;  %v4266_v19 = vld [vmem:[%s6011_s8 + $0x258] sm:$0xff]  ;;  %v4284_v20 = vld [vmem:[%s6011_s8 + $0x2e8] sm:$0xff] }
  0xe3   : > { %665 = vmatpush.msrb.mxu3 %v4289_v55  ;;  %4239 = vmatmul.msk.f32.vlgmr.msra.gmra.mxu1 %vm491_vm2, %v434_v51  ;;  %v4259_v21 = vld [vmem:[%s6011_s8 + $0x220] sm:$0xff]  ;;  %v4264_v22 = vld [vmem:[%s6011_s8 + $0x248] sm:$0xff]  ;;  %v4282_v23 = vld [vmem:[%s6011_s8 + $0x2d8] sm:$0xff] }
  0xe4   : > { %547 = vmatpush.msra.mxu2 %v442_v56  ;;  %507 = vmatpush.msra.mxu0 %v441_v58  ;;  %v4257_v24 = vld [vmem:[%s6011_s8 + $0x210] sm:$0xff]  ;;  %v4262_v25 = vld [vmem:[%s6011_s8 + $0x238] sm:$0xff]  ;;  %v4255_v26 = vld [vmem:[%s6011_s8 + $0x200] sm:$0xff] }
  0xe5   : > { %666 = vmatpush.msrb.mxu3 %v4287_v59  ;;  %638 = vmatpush.msrb.mxu1 %v4271_v0  ;;  %v4260_v27 = vld [vmem:[%s6011_s8 + $0x228] sm:$0xff]  ;;  %v4253_v28 = vld [vmem:[%s6011_s8 + $0x1f0] sm:$0xff]  ;;  %v4258_v29 = vld [vmem:[%s6011_s8 + $0x218] sm:$0xff] }
  0xe6   : > { %548 = vmatpush.msra.mxu2 %v440_v60  ;;  %508 = vmatpush.msra.mxu0 %v439_v62  ;;  %v4256_v30 = vld [vmem:[%s6011_s8 + $0x208] sm:$0xff]  ;;  %v4254_v31 = vld [vmem:[%s6011_s8 + $0x1f8] sm:$0xff]  ;;  %v4251_v32 = vld [vmem:[%s6011_s8 + $0x1e0] sm:$0xff] }
  0xe7   : > { %667 = vmatpush.msrb.mxu3 %v4285_v2  ;;  %639 = vmatpush.msrb.mxu1 %v4269_v4  ;;  %v4279_v33 = vld [vmem:[%s6011_s8 + $0x2c0] sm:$0xff]  ;;  %v4252_v34 = vld [vmem:[%s6011_s8 + $0x1e8] sm:$0xff]  ;;  %v4249_v36 = vld [vmem:[%s6011_s8 + $0x1d0] sm:$0xff] }
  0xe8   : > { %549 = vmatpush.msra.mxu2 %v438_v63  ;;  %509 = vmatpush.msra.mxu0 %v437_v1  ;;  %v4280_v35 = vld [vmem:[%s6011_s8 + $0x2c8] sm:$0xff]  ;;  %v4277_v37 = vld [vmem:[%s6011_s8 + $0x2b0] sm:$0xff]  ;;  %v4250_v38 = vld [vmem:[%s6011_s8 + $0x1d8] sm:$0xff] }
  0xe9   : > { %640 = vmatpush.msrb.mxu1 %v4267_v7  ;;  %668 = vmatpush.msrb.mxu3 %v4283_v11  ;;  %v4278_v39 = vld [vmem:[%s6011_s8 + $0x2b8] sm:$0xff]  ;;  %v4247_v40 = vld [vmem:[%s6011_s8 + $0x1c0] sm:$0xff]  ;;  %v4248_v42 = vld [vmem:[%s6011_s8 + $0x1c8] sm:$0xff] }
  0xea   : > { %550 = vmatpush.msra.mxu2 %v436_v3  ;;  %510 = vmatpush.msra.mxu0 %v435_v6  ;;  %v4275_v41 = vld [vmem:[%s6011_s8 + $0x2a0] sm:$0xff]  ;;  %v4276_v43 = vld [vmem:[%s6011_s8 + $0x2a8] sm:$0xff]  ;;  %v4245_v44 = vld [vmem:[%s6011_s8 + $0x1b0] sm:$0xff] }
  0xeb   : > { %551 = vmatmul.f32.vlgmr.msra.gmra.mxu2 %v433_v5  ;;  %511 = vmatmul.f32.vlgmr.msra.gmra.mxu0 %v433_v5  ;;  %v4273_v45 = vld [vmem:[%s6011_s8 + $0x290] sm:$0xff]  ;;  %v4246_v46 = vld [vmem:[%s6011_s8 + $0x1b8] sm:$0xff]  ;;  %v4243_v48 = vld [vmem:[%s6011_s8 + $0x1a0] sm:$0xff] }
  0xec   : > { %678 = vmatpush.msrb.mxu0 %v4272_v8  ;;  %705 = vmatpush.msrb.mxu2 %v4290_v9  ;;  %v4274_v47 = vld [vmem:[%s6011_s8 + $0x298] sm:$0xff]  ;;  %v4244_v49 = vld [vmem:[%s6011_s8 + $0x1a8] sm:$0xff]  ;;  %v4241_v50 = vld [vmem:[%s6011_s8 + $0x190] sm:$0xff] }
  0xed   : > { %641 = vmatpush.msrb.mxu1 %v4265_v10  ;;  %669 = vmatpush.msrb.mxu3 %v4281_v15  ;;  %v4242_v51 = vld [vmem:[%s6011_s8 + $0x198] sm:$0xff]  ;;  %v4324_v52 = vld [vmem:[%s6011_s8 + $0x410] sm:$0xff]  ;;  %v4322_v54 = vld [vmem:[%s6011_s8 + $0x400] sm:$0xff] }
  0xee   : > { %679 = vmatpush.msrb.mxu0 %v4270_v12  ;;  %706 = vmatpush.msrb.mxu2 %v4288_v13  ;;  %v4325_v53 = vld [vmem:[%s6011_s8 + $0x418] sm:$0xff]  ;;  %v4323_v55 = vld [vmem:[%s6011_s8 + $0x408] sm:$0xff]  ;;  %v4320_v56 = vld [vmem:[%s6011_s8 + $0x3f0] sm:$0xff] }
  0xef   : > { %642 = vmatpush.msrb.mxu1 %v4263_v14  ;;  %670 = vmatpush.msrb.mxu3 %v4279_v33  ;;  %v4321_v57 = vld [vmem:[%s6011_s8 + $0x3f8] sm:$0xff]  ;;  %v4318_v58 = vld [vmem:[%s6011_s8 + $0x3e0] sm:$0xff]  ;;  %v4319_v59 = vld [vmem:[%s6011_s8 + $0x3e8] sm:$0xff] }
  0xf0   : > { %680 = vmatpush.msrb.mxu0 %v4268_v16  ;;  %707 = vmatpush.msrb.mxu2 %v4286_v17  ;;  %v4342_v60 = vld [vmem:[%s6011_s8 + $0x4a0] sm:$0xff]  ;;  %v4316_v61 = vld [vmem:[%s6011_s8 + $0x3d0] sm:$0xff]  ;;  %v4343_v62 = vld [vmem:[%s6011_s8 + $0x4a8] sm:$0xff] }
  0xf1   : > { %643 = vmatpush.msrb.mxu1 %v4261_v18  ;;  %671 = vmatpush.msrb.mxu3 %v4277_v37  ;;  %v4340_v63 = vld [vmem:[%s6011_s8 + $0x490] sm:$0xff]  ;;  %v4317_v0 = vld [vmem:[%s6011_s8 + $0x3d8] sm:$0xff]  ;;  %v4314_v2 = vld [vmem:[%s6011_s8 + $0x3c0] sm:$0xff] }
  0xf2   : > { %681 = vmatpush.msrb.mxu0 %v4266_v19  ;;  %708 = vmatpush.msrb.mxu2 %v4284_v20  ;;  %v4341_v1 = vld [vmem:[%s6011_s8 + $0x498] sm:$0xff]  ;;  %v4338_v3 = vld [vmem:[%s6011_s8 + $0x480] sm:$0xff]  ;;  %v4339_v4 = vld [vmem:[%s6011_s8 + $0x488] sm:$0xff] }
  0xf3   : > { %644 = vmatpush.msrb.mxu1 %v4259_v21  ;;  %672 = vmatpush.msrb.mxu3 %v4275_v41  ;;  %v4315_v5 = vld [vmem:[%s6011_s8 + $0x3c8] sm:$0xff]  ;;  %v4336_v6 = vld [vmem:[%s6011_s8 + $0x470] sm:$0xff]  ;;  %v4337_v8 = vld [vmem:[%s6011_s8 + $0x478] sm:$0xff] }
  0xf4   : > { %682 = vmatpush.msrb.mxu0 %v4264_v22  ;;  %709 = vmatpush.msrb.mxu2 %v4282_v23  ;;  %v4312_v7 = vld [vmem:[%s6011_s8 + $0x3b0] sm:$0xff]  ;;  %v4313_v9 = vld [vmem:[%s6011_s8 + $0x3b8] sm:$0xff]  ;;  %v4334_v10 = vld [vmem:[%s6011_s8 + $0x460] sm:$0xff] }
  0xf5   : > { %645 = vmatpush.msrb.mxu1 %v4257_v24  ;;  %673 = vmatpush.msrb.mxu3 %v4273_v45  ;;  %v4310_v11 = vld [vmem:[%s6011_s8 + $0x3a0] sm:$0xff]  ;;  %v4335_v12 = vld [vmem:[%s6011_s8 + $0x468] sm:$0xff]  ;;  %v4308_v14 = vld [vmem:[%s6011_s8 + $0x390] sm:$0xff] }
  0xf6   : > { %683 = vmatpush.msrb.mxu0 %v4262_v25  ;;  %710 = vmatpush.msrb.mxu2 %v4280_v35  ;;  %v4311_v13 = vld [vmem:[%s6011_s8 + $0x3a8] sm:$0xff]  ;;  %v4309_v16 = vld [vmem:[%s6011_s8 + $0x398] sm:$0xff]  ;;  %v4306_v18 = vld [vmem:[%s6011_s8 + $0x380] sm:$0xff] }
  0xf7   : > { %646 = vmatpush.msrb.mxu1 %v4255_v26  ;;  %781 = vmatpush.msra.mxu3 %v4324_v52  ;;  %v485_v15 = vld [vmem:[%s6026_s16] ss:$8 sm:$0x3] }
  0xf8   : > { %684 = vmatpush.msrb.mxu0 %v4260_v27  ;;  %711 = vmatpush.msrb.mxu2 %v4278_v39  ;;  %v487_v17 = vperm.slane %v485_v15, 0  ;;  %v4307_v19 = vld [vmem:[%s6011_s8 + $0x388] sm:$0xff]  ;;  %v4304_v20 = vld [vmem:[%s6011_s8 + $0x370] sm:$0xff]  ;;  %v4305_v23 = vld [vmem:[%s6011_s8 + $0x378] sm:$0xff]  ;;  %v488_v26 = vperm.slane %v485_v15, 1 }
  0xf9   : > { %647 = vmatpush.msrb.mxu1 %v4253_v28  ;;  %782 = vmatpush.msra.mxu3 %v4322_v54  ;;  %v4302_v25 = vld [vmem:[%s6011_s8 + $0x360] sm:$0xff]  ;;  %v4303_v27 = vld [vmem:[%s6011_s8 + $0x368] sm:$0xff]  ;;  %v4300_v35 = vld [vmem:[%s6011_s8 + $0x350] sm:$0xff] }
  0xfa   : > { %685 = vmatpush.msrb.mxu0 %v4258_v29  ;;  %712 = vmatpush.msrb.mxu2 %v4276_v43  ;;  %v4301_v37 = vld [vmem:[%s6011_s8 + $0x358] sm:$0xff]  ;;  %v4298_v39 = vld [vmem:[%s6011_s8 + $0x340] sm:$0xff]  ;;  %v4299_v41 = vld [vmem:[%s6011_s8 + $0x348] sm:$0xff] }
  0xfb   : > { %648 = vmatpush.msrb.mxu1 %v4251_v32  ;;  %783 = vmatpush.msra.mxu3 %v4320_v56  ;;  %v4296_v43 = vld [vmem:[%s6011_s8 + $0x330] sm:$0xff]  ;;  %v4297_v45 = vld [vmem:[%s6011_s8 + $0x338] sm:$0xff]  ;;  %v4378_v52 = vld [vmem:[%s6011_s8 + $0x5a8] sm:$0xff] }
  0xfc   : > { %686 = vmatpush.msrb.mxu0 %v4256_v30  ;;  %713 = vmatpush.msrb.mxu2 %v4274_v47  ;;  %v4294_v47 = vld [vmem:[%s6011_s8 + $0x320] sm:$0xff]  ;;  %v4376_v54 = vld [vmem:[%s6011_s8 + $0x598] sm:$0xff]  ;;  %v4374_v56 = vld [vmem:[%s6011_s8 + $0x588] sm:$0xff] }
  0xfd   : > { %649 = vmatpush.msrb.mxu1 %v4249_v36  ;;  %784 = vmatpush.msra.mxu3 %v4318_v58  ;;  %v4332_v36 = vld [vmem:[%s6011_s8 + $0x450] sm:$0xff]  ;;  %v4372_v58 = vld [vmem:[%s6011_s8 + $0x578] sm:$0xff] }
  0xfe   : > { %687 = vmatpush.msrb.mxu0 %v4254_v31  ;;  %821 = vmatpush.msra.mxu2 %v4325_v53  ;;  %v4375_v53 = vld [vmem:[%s6011_s8 + $0x590] sm:$0xff] }
  0xff   : > { %650 = vmatpush.msrb.mxu1 %v4247_v40  ;;  %785 = vmatpush.msra.mxu3 %v4316_v61  ;;  %v4330_v40 = vld [vmem:[%s6011_s8 + $0x440] sm:$0xff] }
 0x100   : > { %688 = vmatpush.msrb.mxu0 %v4252_v34  ;;  %822 = vmatpush.msra.mxu2 %v4323_v55  ;;  %v4373_v55 = vld [vmem:[%s6011_s8 + $0x580] sm:$0xff] }
 0x101   : > { %651 = vmatpush.msrb.mxu1 %v4245_v44  ;;  %786 = vmatpush.msra.mxu3 %v4314_v2  ;;  %v4328_v44 = vld [vmem:[%s6011_s8 + $0x430] sm:$0xff]  ;;  %v4369_v61 = vld [vmem:[%s6011_s8 + $0x560] sm:$0xff]  ;;  %v4368_v2 = vld [vmem:[%s6011_s8 + $0x558] sm:$0xff] }
 0x102   : > { %689 = vmatpush.msrb.mxu0 %v4250_v38  ;;  %823 = vmatpush.msra.mxu2 %v4321_v57  ;;  %v4333_v38 = vld [vmem:[%s6011_s8 + $0x458] sm:$0xff]  ;;  %v4371_v57 = vld [vmem:[%s6011_s8 + $0x570] sm:$0xff] }
 0x103   : > { %652 = vmatpush.msrb.mxu1 %v4243_v48  ;;  %787 = vmatpush.msra.mxu3 %v4312_v7  ;;  %v4326_v48 = vld [vmem:[%s6011_s8 + $0x420] sm:$0xff] }
 0x104   : > { %690 = vmatpush.msrb.mxu0 %v4248_v42  ;;  %824 = vmatpush.msra.mxu2 %v4319_v59  ;;  %v4331_v42 = vld [vmem:[%s6011_s8 + $0x448] sm:$0xff]  ;;  %v4395_v59 = vld [vmem:[%s6011_s8 + $0x630] sm:$0xff]  ;;  %v4361_v7 = vld [vmem:[%s6011_s8 + $0x520] sm:$0xff] }
 0x105   : > { %653 = vmatpush.msrb.mxu1 %v4241_v50  ;;  %788 = vmatpush.msra.mxu3 %v4310_v11  ;;  %v4327_v50 = vld [vmem:[%s6011_s8 + $0x428] sm:$0xff] }
 0x106   : > { %691 = vmatpush.msrb.mxu0 %v4246_v46  ;;  %825 = vmatpush.msra.mxu2 %v4317_v0  ;;  %v4329_v46 = vld [vmem:[%s6011_s8 + $0x438] sm:$0xff]  ;;  %v4394_v0 = vld [vmem:[%s6011_s8 + $0x628] sm:$0xff] }
 0x107   : > { %808 = vmatpush.msra.mxu1 %v4342_v60  ;;  %789 = vmatpush.msra.mxu3 %v4308_v14  ;;  %v4396_v60 = vld [vmem:[%s6011_s8 + $0x638] sm:$0xff] }
 0x108   : > { %692 = vmatpush.msrb.mxu0 %v4244_v49  ;;  %826 = vmatpush.msra.mxu2 %v4315_v5  ;;  %v4295_v49 = vld [vmem:[%s6011_s8 + $0x328] sm:$0xff]  ;;  %v4363_v5 = vld [vmem:[%s6011_s8 + $0x530] sm:$0xff] }
 0x109   : > { %809 = vmatpush.msra.mxu1 %v4340_v63  ;;  %790 = vmatpush.msra.mxu3 %v4306_v18  ;;  %v4393_v63 = vld [vmem:[%s6011_s8 + $0x620] sm:$0xff] }
 0x10a   : > { %693 = vmatpush.msrb.mxu0 %v4242_v51  ;;  %827 = vmatpush.msra.mxu2 %v4313_v9  ;;  %v4377_v51 = vld [vmem:[%s6011_s8 + $0x5a0] sm:$0xff] }
 0x10b   : > { %810 = vmatpush.msra.mxu1 %v4338_v3  ;;  %791 = vmatpush.msra.mxu3 %v4304_v20  ;;  %v4365_v3 = vld [vmem:[%s6011_s8 + $0x540] sm:$0xff] }
 0x10c   : > { %848 = vmatpush.msra.mxu0 %v4343_v62  ;;  %828 = vmatpush.msra.mxu2 %v4311_v13  ;;  %v4370_v62 = vld [vmem:[%s6011_s8 + $0x568] sm:$0xff] }
 0x10d   : > { %811 = vmatpush.msra.mxu1 %v4336_v6  ;;  %792 = vmatpush.msra.mxu3 %v4302_v25  ;;  %v4364_v6 = vld [vmem:[%s6011_s8 + $0x538] sm:$0xff] }
 0x10e   : > { %849 = vmatpush.msra.mxu0 %v4341_v1  ;;  %829 = vmatpush.msra.mxu2 %v4309_v16  ;;  %v4367_v1 = vld [vmem:[%s6011_s8 + $0x550] sm:$0xff]  ;;  %v4392_v25 = vld [vmem:[%s6011_s8 + $0x618] sm:$0xff] }
 0x10f   : > { %812 = vmatpush.msra.mxu1 %v4334_v10  ;;  %793 = vmatpush.msra.mxu3 %v4300_v35  ;;  %v4291_v9 = vld [vmem:[%s6026_s16 + $0x1] ss:$8 sm:$0x3] }
 0x110   : > { %850 = vmatpush.msra.mxu0 %v4339_v4  ;;  %830 = vmatpush.msra.mxu2 %v4307_v19  ;;  %v4366_v4 = vld [vmem:[%s6011_s8 + $0x548] sm:$0xff]  ;;  %v631_v10 = vperm.slane %v4291_v9, 0  ;;  %v632_v11 = vperm.slane %v4291_v9, 1  ;;  %v4385_v35 = vld [vmem:[%s6011_s8 + $0x5e0] sm:$0xff]  ;;  %v4415_v9 = vld [vmem:[%s6011_s8 + $0x6b8] sm:$0xff] }
 0x111   : > { %813 = vmatpush.msra.mxu1 %v4332_v36  ;;  %794 = vmatpush.msra.mxu3 %v4298_v39  ;;  %v4354_v36 = vld [vmem:[%s6011_s8 + $0x4e8] sm:$0xff]  ;;  %v4383_v39 = vld [vmem:[%s6011_s8 + $0x5d0] sm:$0xff] }
 0x112   : > { %851 = vmatpush.msra.mxu0 %v4337_v8  ;;  %831 = vmatpush.msra.mxu2 %v4305_v23  ;;  %v4362_v8 = vld [vmem:[%s6011_s8 + $0x528] sm:$0xff]  ;;  %v4391_v23 = vld [vmem:[%s6011_s8 + $0x610] sm:$0xff] }
 0x113   : > { %814 = vmatpush.msra.mxu1 %v4330_v40  ;;  %795 = vmatpush.msra.mxu3 %v4296_v43  ;;  %v4352_v40 = vld [vmem:[%s6011_s8 + $0x4d8] sm:$0xff]  ;;  %v4381_v43 = vld [vmem:[%s6011_s8 + $0x5c0] sm:$0xff] }
 0x114   : > { %852 = vmatpush.msra.mxu0 %v4335_v12  ;;  %832 = vmatpush.msra.mxu2 %v4303_v27  ;;  %v4389_v27 = vld [vmem:[%s6011_s8 + $0x600] sm:$0xff] }
 0x115   : > { %815 = vmatpush.msra.mxu1 %v4328_v44  ;;  %796 = vmatpush.msra.mxu3 %v4294_v47  ;;  %v4350_v44 = vld [vmem:[%s6011_s8 + $0x4c8] sm:$0xff]  ;;  %v4379_v47 = vld [vmem:[%s6011_s8 + $0x5b0] sm:$0xff] }
 0x116   : > { %833 = vmatpush.msra.mxu2 %v4301_v37  ;;  %853 = vmatpush.msra.mxu0 %v4333_v38  ;;  %v4386_v37 = vld [vmem:[%s6011_s8 + $0x5e8] sm:$0xff]  ;;  %v4351_v38 = vld [vmem:[%s6011_s8 + $0x4d0] sm:$0xff] }
 0x117   : > { %816 = vmatpush.msra.mxu1 %v4326_v48  ;;  %v4348_v48 = vld [vmem:[%s6011_s8 + $0x4b8] sm:$0xff] }
 0x118   : > { %834 = vmatpush.msra.mxu2 %v4299_v41  ;;  %854 = vmatpush.msra.mxu0 %v4331_v42  ;;  %v4384_v41 = vld [vmem:[%s6011_s8 + $0x5d8] sm:$0xff]  ;;  %v4349_v42 = vld [vmem:[%s6011_s8 + $0x4c0] sm:$0xff] }
 0x11a   : > { %835 = vmatpush.msra.mxu2 %v4297_v45  ;;  %855 = vmatpush.msra.mxu0 %v4329_v46  ;;  %v4382_v45 = vld [vmem:[%s6011_s8 + $0x5c8] sm:$0xff]  ;;  %v4347_v46 = vld [vmem:[%s6011_s8 + $0x4b0] sm:$0xff] }
 0x11c   : > { %836 = vmatpush.msra.mxu2 %v4295_v49  ;;  %856 = vmatpush.msra.mxu0 %v4327_v50  ;;  %v4380_v49 = vld [vmem:[%s6011_s8 + $0x5b8] sm:$0xff]  ;;  %v4430_v50 = vld [vmem:[%s6011_s8 + $0x730] sm:$0xff] }
 0x160   : > { %v532_v22 = vpop.f32.mrf.mxu1 }
 0x164   : > { %v572_v30 = vpop.f32.mrf.mxu3 }
 0x168   : > { %v512_v21 = vpop.f32.mrf.mxu0 }
 0x169   : > { %v513_v24 = vadd.f32 %v512_v21, %v487_v17 }
 0x16b   : > { %v533_v28 = vadd.f32 %v532_v22, %v513_v24  ;;  %v4359_v22 = vld [vmem:[%s6011_s8 + $0x510] sm:$0xff]  ;;  %v4360_v24 = vld [vmem:[%s6011_s8 + $0x518] sm:$0xff] }
 0x16d   : > { %v575_v31 = vmax.f32 %v533_v28, 0.0  ;;  %v4358_v28 = vld [vmem:[%s6011_s8 + $0x508] sm:$0xff] }
 0x16e   : > { %v552_v29 = vpop.f32.mrf.mxu2 }
 0x16f   : > { %v553_v32 = vadd.f32 %v552_v29, %v488_v26  ;;  %654 = vmatmul.f32.vlgmr.msrb.gmra.mxu1 %v575_v31  ;;  %694 = vmatmul.f32.vlgmr.msrb.gmra.mxu0 %v575_v31  ;;  %v4357_v26 = vld [vmem:[%s6011_s8 + $0x500] sm:$0xff]  ;;  %v4390_v29 = vld [vmem:[%s6011_s8 + $0x608] sm:$0xff]  ;;  %v4387_v31 = vld [vmem:[%s6011_s8 + $0x5f0] sm:$0xff] }
 0x170   : > { %924 = vmatpush.msrb.mxu1 %v4377_v51  ;;  %964 = vmatpush.msrb.mxu0 %v4378_v52  ;;  %v4431_v51 = vld [vmem:[%s6011_s8 + $0x738] sm:$0xff]  ;;  %v4428_v52 = vld [vmem:[%s6011_s8 + $0x720] sm:$0xff] }
 0x171   : > { %v573_v33 = vadd.f32 %v572_v30, %v553_v32  ;;  %v4355_v30 = vld [vmem:[%s6011_s8 + $0x4f0] sm:$0xff]  ;;  %v4356_v32 = vld [vmem:[%s6011_s8 + $0x4f8] sm:$0xff] }
 0x172   : > { %925 = vmatpush.msrb.mxu1 %v4375_v53  ;;  %965 = vmatpush.msrb.mxu0 %v4376_v54  ;;  %v4429_v53 = vld [vmem:[%s6011_s8 + $0x728] sm:$0xff]  ;;  %v4426_v54 = vld [vmem:[%s6011_s8 + $0x710] sm:$0xff] }
 0x173   : > { %v576_v34 = vmax.f32 %v573_v33, 0.0  ;;  %v4388_v33 = vld [vmem:[%s6011_s8 + $0x5f8] sm:$0xff] }
 0x174   : > { %926 = vmatpush.msrb.mxu1 %v4373_v55  ;;  %966 = vmatpush.msrb.mxu0 %v4374_v56  ;;  %v4427_v55 = vld [vmem:[%s6011_s8 + $0x718] sm:$0xff]  ;;  %v4424_v56 = vld [vmem:[%s6011_s8 + $0x700] sm:$0xff] }
 0x175   : > { %4292 = vmatmul.msk.f32.vlgmr.msrb.gmra.mxu3 %vm491_vm2, %v576_v34  ;;  %4293 = vmatmul.msk.f32.vlgmr.msrb.gmra.mxu2 %vm491_vm2, %v576_v34  ;;  %v4353_v34 = vld [vmem:[%s6011_s8 + $0x4e0] sm:$0xff] }
 0x176   : > { %951 = vmatpush.msrb.mxu3 %v4395_v59  ;;  %991 = vmatpush.msrb.mxu2 %v4396_v60  ;;  %v4449_v59 = vld [vmem:[%s6011_s8 + $0x7c8] sm:$0xff]  ;;  %v4422_v60 = vld [vmem:[%s6011_s8 + $0x6f0] sm:$0xff] }
 0x177   : > { %927 = vmatpush.msrb.mxu1 %v4371_v57  ;;  %967 = vmatpush.msrb.mxu0 %v4372_v58  ;;  %v4425_v57 = vld [vmem:[%s6011_s8 + $0x708] sm:$0xff]  ;;  %v4448_v58 = vld [vmem:[%s6011_s8 + $0x7c0] sm:$0xff] }
 0x178   : > { %952 = vmatpush.msrb.mxu3 %v4393_v63  ;;  %992 = vmatpush.msrb.mxu2 %v4394_v0  ;;  %v4447_v63 = vld [vmem:[%s6011_s8 + $0x7b8] sm:$0xff]  ;;  %v4444_v0 = vld [vmem:[%s6011_s8 + $0x7a0] sm:$0xff] }
 0x179   : > { %928 = vmatpush.msrb.mxu1 %v4369_v61  ;;  %968 = vmatpush.msrb.mxu0 %v4370_v62  ;;  %v4423_v61 = vld [vmem:[%s6011_s8 + $0x6f8] sm:$0xff]  ;;  %v4446_v62 = vld [vmem:[%s6011_s8 + $0x7b0] sm:$0xff] }
 0x17a   : > { %953 = vmatpush.msrb.mxu3 %v4391_v23  ;;  %993 = vmatpush.msrb.mxu2 %v4392_v25  ;;  %v4410_v25 = vld [vmem:[%s6011_s8 + $0x690] sm:$0xff] }
 0x17b   : > { %929 = vmatpush.msrb.mxu1 %v4367_v1  ;;  %969 = vmatpush.msrb.mxu0 %v4368_v2  ;;  %v4420_v1 = vld [vmem:[%s6011_s8 + $0x6e0] sm:$0xff]  ;;  %v4421_v2 = vld [vmem:[%s6011_s8 + $0x6e8] sm:$0xff] }
 0x17c   : > { %954 = vmatpush.msrb.mxu3 %v4389_v27  ;;  %994 = vmatpush.msrb.mxu2 %v4390_v29  ;;  %v4411_v27 = vld [vmem:[%s6011_s8 + $0x698] sm:$0xff]  ;;  %v4408_v29 = vld [vmem:[%s6011_s8 + $0x680] sm:$0xff] }
 0x17d   : > { %930 = vmatpush.msrb.mxu1 %v4365_v3  ;;  %970 = vmatpush.msrb.mxu0 %v4366_v4  ;;  %v4445_v3 = vld [vmem:[%s6011_s8 + $0x7a8] sm:$0xff]  ;;  %v4418_v4 = vld [vmem:[%s6011_s8 + $0x6d0] sm:$0xff] }
 0x17e   : > { %955 = vmatpush.msrb.mxu3 %v4387_v31  ;;  %995 = vmatpush.msrb.mxu2 %v4388_v33  ;;  %v4409_v31 = vld [vmem:[%s6011_s8 + $0x688] sm:$0xff]  ;;  %v4406_v33 = vld [vmem:[%s6011_s8 + $0x670] sm:$0xff] }
 0x17f   : > { %931 = vmatpush.msrb.mxu1 %v4363_v5  ;;  %971 = vmatpush.msrb.mxu0 %v4364_v6  ;;  %v4419_v5 = vld [vmem:[%s6011_s8 + $0x6d8] sm:$0xff]  ;;  %v4416_v6 = vld [vmem:[%s6011_s8 + $0x6c0] sm:$0xff] }
 0x180   : > { %956 = vmatpush.msrb.mxu3 %v4385_v35  ;;  %996 = vmatpush.msrb.mxu2 %v4386_v37  ;;  %v4407_v35 = vld [vmem:[%s6011_s8 + $0x678] sm:$0xff]  ;;  %v4404_v37 = vld [vmem:[%s6011_s8 + $0x660] sm:$0xff] }
 0x181   : > { %932 = vmatpush.msrb.mxu1 %v4361_v7  ;;  %972 = vmatpush.msrb.mxu0 %v4362_v8  ;;  %v4417_v7 = vld [vmem:[%s6011_s8 + $0x6c8] sm:$0xff]  ;;  %v4414_v8 = vld [vmem:[%s6011_s8 + $0x6b0] sm:$0xff] }
 0x182   : > { %957 = vmatpush.msrb.mxu3 %v4383_v39  ;;  %997 = vmatpush.msrb.mxu2 %v4384_v41  ;;  %v4405_v39 = vld [vmem:[%s6011_s8 + $0x668] sm:$0xff]  ;;  %v4402_v41 = vld [vmem:[%s6011_s8 + $0x650] sm:$0xff] }
 0x183   : > { %933 = vmatpush.msrb.mxu1 %v4359_v22  ;;  %973 = vmatpush.msrb.mxu0 %v4360_v24 }
 0x184   : > { %958 = vmatpush.msrb.mxu3 %v4381_v43  ;;  %998 = vmatpush.msrb.mxu2 %v4382_v45  ;;  %v4403_v43 = vld [vmem:[%s6011_s8 + $0x658] sm:$0xff]  ;;  %v4400_v45 = vld [vmem:[%s6011_s8 + $0x640] sm:$0xff] }
 0x185   : > { %934 = vmatpush.msrb.mxu1 %v4357_v26  ;;  %974 = vmatpush.msrb.mxu0 %v4358_v28  ;;  %v4442_v26 = vld [vmem:[%s6011_s8 + $0x790] sm:$0xff]  ;;  %v4443_v28 = vld [vmem:[%s6011_s8 + $0x798] sm:$0xff] }
 0x186   : > { %959 = vmatpush.msrb.mxu3 %v4379_v47  ;;  %999 = vmatpush.msrb.mxu2 %v4380_v49  ;;  %v4401_v47 = vld [vmem:[%s6011_s8 + $0x648] sm:$0xff]  ;;  %v4483_v49 = vld [vmem:[%s6011_s8 + $0x8c0] sm:$0xff] }
 0x187   : > { %935 = vmatpush.msrb.mxu1 %v4355_v30  ;;  %975 = vmatpush.msrb.mxu0 %v4356_v32  ;;  %v4440_v30 = vld [vmem:[%s6011_s8 + $0x780] sm:$0xff]  ;;  %v4441_v32 = vld [vmem:[%s6011_s8 + $0x788] sm:$0xff] }
 0x189   : > { %936 = vmatpush.msrb.mxu1 %v4353_v34  ;;  %976 = vmatpush.msrb.mxu0 %v4354_v36  ;;  %v4438_v34 = vld [vmem:[%s6011_s8 + $0x770] sm:$0xff]  ;;  %v4439_v36 = vld [vmem:[%s6011_s8 + $0x778] sm:$0xff] }
 0x18b   : > { %937 = vmatpush.msrb.mxu1 %v4351_v38  ;;  %977 = vmatpush.msrb.mxu0 %v4352_v40  ;;  %v4436_v38 = vld [vmem:[%s6011_s8 + $0x760] sm:$0xff]  ;;  %v4437_v40 = vld [vmem:[%s6011_s8 + $0x768] sm:$0xff] }
 0x18d   : > { %938 = vmatpush.msrb.mxu1 %v4349_v42  ;;  %978 = vmatpush.msrb.mxu0 %v4350_v44  ;;  %v4434_v42 = vld [vmem:[%s6011_s8 + $0x750] sm:$0xff]  ;;  %v4435_v44 = vld [vmem:[%s6011_s8 + $0x758] sm:$0xff] }
 0x18f   : > { %939 = vmatpush.msrb.mxu1 %v4347_v46  ;;  %979 = vmatpush.msrb.mxu0 %v4348_v48  ;;  %v4432_v46 = vld [vmem:[%s6011_s8 + $0x740] sm:$0xff]  ;;  %v4433_v48 = vld [vmem:[%s6011_s8 + $0x748] sm:$0xff] }
 0x1ec   : > { %v655_v12 = vpop.f32.mrf.mxu1  ;;  %v695_v13 = vpop.f32.mrf.mxu0 }
 0x1ed   : > { %v656_v14 = vadd.f32 %v655_v12, %v631_v10  ;;  %v696_v15 = vadd.f32 %v695_v13, %v632_v11  ;;  %v4412_v10 = vld [vmem:[%s6011_s8 + $0x6a0] sm:$0xff]  ;;  %v4413_v11 = vld [vmem:[%s6011_s8 + $0x6a8] sm:$0xff] }
 0x1ee   : > { %v4344_v12 = vld [vmem:[%s6026_s16 + $0x2] ss:$8 sm:$0x3] }
 0x1ef   : > { %v774_v13 = vperm.slane %v4344_v12, 0 }
 0x1f8   : > { %v675_v16 = vpop.f32.mrf.mxu3  ;;  %v715_v17 = vpop.f32.mrf.mxu2 }
 0x1f9   : > { %v676_v18 = vadd.f32 %v675_v16, %v656_v14  ;;  %v716_v19 = vadd.f32 %v715_v17, %v696_v15  ;;  %v775_v14 = vperm.slane %v4344_v12, 1 }
 0x1fb   : > { %v718_v20 = vmax.f32 %v676_v18, 0.0  ;;  %v719_v21 = vmax.f32 %v716_v19, 0.0 }
 0x1fd   : > { %797 = vmatmul.f32.vlgmr.msra.gmra.mxu3 %v718_v20  ;;  %4345 = vmatmul.msk.f32.vlgmr.msra.gmra.mxu1 %vm491_vm2, %v719_v21 }
 0x1fe   : > { %837 = vmatmul.f32.vlgmr.msra.gmra.mxu2 %v718_v20  ;;  %4346 = vmatmul.msk.f32.vlgmr.msra.gmra.mxu0 %vm491_vm2, %v719_v21 }
 0x1ff   : > { %1067 = vmatpush.msra.mxu3 %v4430_v50  ;;  %1107 = vmatpush.msra.mxu2 %v4431_v51  ;;  %v4484_v50 = vld [vmem:[%s6011_s8 + $0x8c8] sm:$0xff]  ;;  %v4481_v51 = vld [vmem:[%s6011_s8 + $0x8b0] sm:$0xff] }
 0x200   : > { %1094 = vmatpush.msra.mxu1 %v4448_v58  ;;  %1134 = vmatpush.msra.mxu0 %v4449_v59  ;;  %v4502_v58 = vld [vmem:[%s6011_s8 + $0x958] sm:$0xff]  ;;  %v4475_v59 = vld [vmem:[%s6011_s8 + $0x880] sm:$0xff] }
 0x201   : > { %1068 = vmatpush.msra.mxu3 %v4428_v52  ;;  %1108 = vmatpush.msra.mxu2 %v4429_v53  ;;  %v4482_v52 = vld [vmem:[%s6011_s8 + $0x8b8] sm:$0xff]  ;;  %v4479_v53 = vld [vmem:[%s6011_s8 + $0x8a0] sm:$0xff] }
 0x202   : > { %1095 = vmatpush.msra.mxu1 %v4446_v62  ;;  %1135 = vmatpush.msra.mxu0 %v4447_v63  ;;  %v4500_v62 = vld [vmem:[%s6011_s8 + $0x948] sm:$0xff]  ;;  %v4473_v63 = vld [vmem:[%s6011_s8 + $0x870] sm:$0xff] }
 0x203   : > { %1069 = vmatpush.msra.mxu3 %v4426_v54  ;;  %1109 = vmatpush.msra.mxu2 %v4427_v55  ;;  %v4480_v54 = vld [vmem:[%s6011_s8 + $0x8a8] sm:$0xff]  ;;  %v4477_v55 = vld [vmem:[%s6011_s8 + $0x890] sm:$0xff] }
 0x204   : > { %1096 = vmatpush.msra.mxu1 %v4444_v0  ;;  %1136 = vmatpush.msra.mxu0 %v4445_v3  ;;  %v4474_v0 = vld [vmem:[%s6011_s8 + $0x878] sm:$0xff]  ;;  %v4469_v3 = vld [vmem:[%s6011_s8 + $0x850] sm:$0xff] }
 0x205   : > { %1070 = vmatpush.msra.mxu3 %v4424_v56  ;;  %1110 = vmatpush.msra.mxu2 %v4425_v57  ;;  %v4478_v56 = vld [vmem:[%s6011_s8 + $0x898] sm:$0xff]  ;;  %v4501_v57 = vld [vmem:[%s6011_s8 + $0x950] sm:$0xff] }
 0x206   : > { %1097 = vmatpush.msra.mxu1 %v4442_v26  ;;  %1137 = vmatpush.msra.mxu0 %v4443_v28  ;;  %v4464_v26 = vld [vmem:[%s6011_s8 + $0x828] sm:$0xff]  ;;  %v4461_v28 = vld [vmem:[%s6011_s8 + $0x810] sm:$0xff] }
 0x207   : > { %1071 = vmatpush.msra.mxu3 %v4422_v60  ;;  %1111 = vmatpush.msra.mxu2 %v4423_v61  ;;  %v4476_v60 = vld [vmem:[%s6011_s8 + $0x888] sm:$0xff]  ;;  %v4499_v61 = vld [vmem:[%s6011_s8 + $0x940] sm:$0xff] }
 0x208   : > { %1098 = vmatpush.msra.mxu1 %v4440_v30  ;;  %1138 = vmatpush.msra.mxu0 %v4441_v32  ;;  %v4462_v30 = vld [vmem:[%s6011_s8 + $0x818] sm:$0xff]  ;;  %v4459_v32 = vld [vmem:[%s6011_s8 + $0x800] sm:$0xff] }
 0x209   : > { %1072 = vmatpush.msra.mxu3 %v4420_v1  ;;  %1112 = vmatpush.msra.mxu2 %v4421_v2  ;;  %v4471_v1 = vld [vmem:[%s6011_s8 + $0x860] sm:$0xff]  ;;  %v4472_v2 = vld [vmem:[%s6011_s8 + $0x868] sm:$0xff] }
 0x20a   : > { %1099 = vmatpush.msra.mxu1 %v4438_v34  ;;  %1139 = vmatpush.msra.mxu0 %v4439_v36  ;;  %v4460_v34 = vld [vmem:[%s6011_s8 + $0x808] sm:$0xff]  ;;  %v4457_v36 = vld [vmem:[%s6011_s8 + $0x7f0] sm:$0xff] }
 0x20b   : > { %1073 = vmatpush.msra.mxu3 %v4418_v4  ;;  %1113 = vmatpush.msra.mxu2 %v4419_v5  ;;  %v4470_v4 = vld [vmem:[%s6011_s8 + $0x858] sm:$0xff]  ;;  %v4467_v5 = vld [vmem:[%s6011_s8 + $0x840] sm:$0xff] }
 0x20c   : > { %1100 = vmatpush.msra.mxu1 %v4436_v38  ;;  %1140 = vmatpush.msra.mxu0 %v4437_v40  ;;  %v4458_v38 = vld [vmem:[%s6011_s8 + $0x7f8] sm:$0xff]  ;;  %v4455_v40 = vld [vmem:[%s6011_s8 + $0x7e0] sm:$0xff] }
 0x20d   : > { %1074 = vmatpush.msra.mxu3 %v4416_v6  ;;  %1114 = vmatpush.msra.mxu2 %v4417_v7  ;;  %v4468_v6 = vld [vmem:[%s6011_s8 + $0x848] sm:$0xff] }
 0x20e   : > { %1101 = vmatpush.msra.mxu1 %v4434_v42  ;;  %1141 = vmatpush.msra.mxu0 %v4435_v44  ;;  %v4397_v7 = vld [vmem:[%s6026_s16 + $0x3] ss:$8 sm:$0x3] }
 0x20f   : > { %1075 = vmatpush.msra.mxu3 %v4414_v8  ;;  %1115 = vmatpush.msra.mxu2 %v4415_v9  ;;  %v917_v8 = vperm.slane %v4397_v7, 0  ;;  %v918_v9 = vperm.slane %v4397_v7, 1  ;;  %v4456_v42 = vld [vmem:[%s6011_s8 + $0x7e8] sm:$0xff]  ;;  %v4453_v44 = vld [vmem:[%s6011_s8 + $0x7d0] sm:$0xff]  ;;  %v4521_v7 = vld [vmem:[%s6011_s8 + $0x9d8] sm:$0xff] }
 0x210   : > { %1102 = vmatpush.msra.mxu1 %v4432_v46  ;;  %1142 = vmatpush.msra.mxu0 %v4433_v48  ;;  %v4454_v46 = vld [vmem:[%s6011_s8 + $0x7d8] sm:$0xff]  ;;  %v4536_v48 = vld [vmem:[%s6011_s8 + $0xa50] sm:$0xff] }
 0x211   : > { %1076 = vmatpush.msra.mxu3 %v4412_v10  ;;  %1116 = vmatpush.msra.mxu2 %v4413_v11 }
 0x213   : > { %1077 = vmatpush.msra.mxu3 %v4410_v25  ;;  %1117 = vmatpush.msra.mxu2 %v4411_v27  ;;  %v4495_v25 = vld [vmem:[%s6011_s8 + $0x920] sm:$0xff]  ;;  %v4496_v27 = vld [vmem:[%s6011_s8 + $0x928] sm:$0xff] }
 0x215   : > { %1078 = vmatpush.msra.mxu3 %v4408_v29  ;;  %1118 = vmatpush.msra.mxu2 %v4409_v31  ;;  %v4493_v29 = vld [vmem:[%s6011_s8 + $0x910] sm:$0xff]  ;;  %v4494_v31 = vld [vmem:[%s6011_s8 + $0x918] sm:$0xff] }
 0x217   : > { %1079 = vmatpush.msra.mxu3 %v4406_v33  ;;  %1119 = vmatpush.msra.mxu2 %v4407_v35  ;;  %v4491_v33 = vld [vmem:[%s6011_s8 + $0x900] sm:$0xff]  ;;  %v4492_v35 = vld [vmem:[%s6011_s8 + $0x908] sm:$0xff] }
 0x219   : > { %1080 = vmatpush.msra.mxu3 %v4404_v37  ;;  %1120 = vmatpush.msra.mxu2 %v4405_v39  ;;  %v4489_v37 = vld [vmem:[%s6011_s8 + $0x8f0] sm:$0xff]  ;;  %v4490_v39 = vld [vmem:[%s6011_s8 + $0x8f8] sm:$0xff] }
 0x21b   : > { %1081 = vmatpush.msra.mxu3 %v4402_v41  ;;  %1121 = vmatpush.msra.mxu2 %v4403_v43  ;;  %v4487_v41 = vld [vmem:[%s6011_s8 + $0x8e0] sm:$0xff]  ;;  %v4488_v43 = vld [vmem:[%s6011_s8 + $0x8e8] sm:$0xff] }
 0x21d   : > { %1082 = vmatpush.msra.mxu3 %v4400_v45  ;;  %1122 = vmatpush.msra.mxu2 %v4401_v47  ;;  %v4485_v45 = vld [vmem:[%s6011_s8 + $0x8d0] sm:$0xff]  ;;  %v4486_v47 = vld [vmem:[%s6011_s8 + $0x8d8] sm:$0xff] }
 0x27a   : > { %v818_v18 = vpop.f32.mrf.mxu1 }
 0x27b   : > { %v858_v20 = vpop.f32.mrf.mxu0 }
 0x280   : > { %v798_v15 = vpop.f32.mrf.mxu3 }
 0x281   : > { %v799_v16 = vadd.f32 %v798_v15, %v774_v13  ;;  %v838_v17 = vpop.f32.mrf.mxu2 }
 0x282   : > { %v839_v19 = vadd.f32 %v838_v17, %v775_v14 }
 0x283   : > { %v819_v21 = vadd.f32 %v818_v18, %v799_v16 }
 0x284   : > { %v859_v22 = vadd.f32 %v858_v20, %v839_v19  ;;  %v4465_v20 = vld [vmem:[%s6011_s8 + $0x830] sm:$0xff] }
 0x285   : > { %v861_v23 = vmax.f32 %v819_v21, 0.0  ;;  %v4497_v21 = vld [vmem:[%s6011_s8 + $0x930] sm:$0xff] }
 0x286   : > { %v862_v24 = vmax.f32 %v859_v22, 0.0  ;;  %v4466_v22 = vld [vmem:[%s6011_s8 + $0x838] sm:$0xff] }
 0x287   : > { %940 = vmatmul.f32.vlgmr.msrb.gmra.mxu1 %v861_v23  ;;  %980 = vmatmul.f32.vlgmr.msrb.gmra.mxu0 %v861_v23  ;;  %v4498_v23 = vld [vmem:[%s6011_s8 + $0x938] sm:$0xff] }
 0x288   : > { %4398 = vmatmul.msk.f32.vlgmr.msrb.gmra.mxu3 %vm491_vm2, %v862_v24  ;;  %4399 = vmatmul.msk.f32.vlgmr.msrb.gmra.mxu2 %vm491_vm2, %v862_v24  ;;  %v4463_v24 = vld [vmem:[%s6011_s8 + $0x820] sm:$0xff] }
 0x289   : > { %1210 = vmatpush.msrb.mxu1 %v4483_v49  ;;  %1250 = vmatpush.msrb.mxu0 %v4484_v50  ;;  %v4537_v49 = vld [vmem:[%s6011_s8 + $0xa58] sm:$0xff]  ;;  %v4534_v50 = vld [vmem:[%s6011_s8 + $0xa40] sm:$0xff] }
 0x28a   : > { %1237 = vmatpush.msrb.mxu3 %v4501_v57  ;;  %1277 = vmatpush.msrb.mxu2 %v4502_v58  ;;  %v4555_v57 = vld [vmem:[%s6011_s8 + $0xae8] sm:$0xff]  ;;  %v4528_v58 = vld [vmem:[%s6011_s8 + $0xa10] sm:$0xff] }
 0x28b   : > { %1211 = vmatpush.msrb.mxu1 %v4481_v51  ;;  %1251 = vmatpush.msrb.mxu0 %v4482_v52  ;;  %v4535_v51 = vld [vmem:[%s6011_s8 + $0xa48] sm:$0xff]  ;;  %v4532_v52 = vld [vmem:[%s6011_s8 + $0xa30] sm:$0xff] }
 0x28c   : > { %1238 = vmatpush.msrb.mxu3 %v4499_v61  ;;  %1278 = vmatpush.msrb.mxu2 %v4500_v62  ;;  %v4553_v61 = vld [vmem:[%s6011_s8 + $0xad8] sm:$0xff]  ;;  %v4550_v62 = vld [vmem:[%s6011_s8 + $0xac0] sm:$0xff] }
 0x28d   : > { %1212 = vmatpush.msrb.mxu1 %v4479_v53  ;;  %1252 = vmatpush.msrb.mxu0 %v4480_v54  ;;  %v4533_v53 = vld [vmem:[%s6011_s8 + $0xa38] sm:$0xff]  ;;  %v4530_v54 = vld [vmem:[%s6011_s8 + $0xa20] sm:$0xff] }
 0x28e   : > { %1239 = vmatpush.msrb.mxu3 %v4497_v21  ;;  %1279 = vmatpush.msrb.mxu2 %v4498_v23  ;;  %v4516_v23 = vld [vmem:[%s6011_s8 + $0x9b0] sm:$0xff] }
 0x28f   : > { %1213 = vmatpush.msrb.mxu1 %v4477_v55  ;;  %1253 = vmatpush.msrb.mxu0 %v4478_v56  ;;  %v4531_v55 = vld [vmem:[%s6011_s8 + $0xa28] sm:$0xff]  ;;  %v4554_v56 = vld [vmem:[%s6011_s8 + $0xae0] sm:$0xff] }
 0x290   : > { %1240 = vmatpush.msrb.mxu3 %v4495_v25  ;;  %1280 = vmatpush.msrb.mxu2 %v4496_v27  ;;  %v4517_v25 = vld [vmem:[%s6011_s8 + $0x9b8] sm:$0xff]  ;;  %v4514_v27 = vld [vmem:[%s6011_s8 + $0x9a0] sm:$0xff] }
 0x291   : > { %1214 = vmatpush.msrb.mxu1 %v4475_v59  ;;  %1254 = vmatpush.msrb.mxu0 %v4476_v60  ;;  %v4529_v59 = vld [vmem:[%s6011_s8 + $0xa18] sm:$0xff]  ;;  %v4552_v60 = vld [vmem:[%s6011_s8 + $0xad0] sm:$0xff] }
 0x292   : > { %1241 = vmatpush.msrb.mxu3 %v4493_v29  ;;  %1281 = vmatpush.msrb.mxu2 %v4494_v31  ;;  %v4515_v29 = vld [vmem:[%s6011_s8 + $0x9a8] sm:$0xff]  ;;  %v4512_v31 = vld [vmem:[%s6011_s8 + $0x990] sm:$0xff] }
 0x293   : > { %1215 = vmatpush.msrb.mxu1 %v4473_v63  ;;  %1255 = vmatpush.msrb.mxu0 %v4474_v0  ;;  %v4526_v63 = vld [vmem:[%s6011_s8 + $0xa00] sm:$0xff]  ;;  %v4527_v0 = vld [vmem:[%s6011_s8 + $0xa08] sm:$0xff] }
 0x294   : > { %1242 = vmatpush.msrb.mxu3 %v4491_v33  ;;  %1282 = vmatpush.msrb.mxu2 %v4492_v35  ;;  %v4513_v33 = vld [vmem:[%s6011_s8 + $0x998] sm:$0xff]  ;;  %v4510_v35 = vld [vmem:[%s6011_s8 + $0x980] sm:$0xff] }
 0x295   : > { %1216 = vmatpush.msrb.mxu1 %v4471_v1  ;;  %1256 = vmatpush.msrb.mxu0 %v4472_v2  ;;  %v4551_v1 = vld [vmem:[%s6011_s8 + $0xac8] sm:$0xff]  ;;  %v4524_v2 = vld [vmem:[%s6011_s8 + $0x9f0] sm:$0xff] }
 0x296   : > { %1243 = vmatpush.msrb.mxu3 %v4489_v37  ;;  %1283 = vmatpush.msrb.mxu2 %v4490_v39  ;;  %v4511_v37 = vld [vmem:[%s6011_s8 + $0x988] sm:$0xff]  ;;  %v4508_v39 = vld [vmem:[%s6011_s8 + $0x970] sm:$0xff] }
 0x297   : > { %1217 = vmatpush.msrb.mxu1 %v4469_v3  ;;  %1257 = vmatpush.msrb.mxu0 %v4470_v4  ;;  %v4525_v3 = vld [vmem:[%s6011_s8 + $0x9f8] sm:$0xff]  ;;  %v4522_v4 = vld [vmem:[%s6011_s8 + $0x9e0] sm:$0xff] }
 0x298   : > { %1244 = vmatpush.msrb.mxu3 %v4487_v41  ;;  %1284 = vmatpush.msrb.mxu2 %v4488_v43  ;;  %v4509_v41 = vld [vmem:[%s6011_s8 + $0x978] sm:$0xff]  ;;  %v4506_v43 = vld [vmem:[%s6011_s8 + $0x960] sm:$0xff] }
 0x299   : > { %1218 = vmatpush.msrb.mxu1 %v4467_v5  ;;  %1258 = vmatpush.msrb.mxu0 %v4468_v6  ;;  %v4523_v5 = vld [vmem:[%s6011_s8 + $0x9e8] sm:$0xff]  ;;  %v4520_v6 = vld [vmem:[%s6011_s8 + $0x9d0] sm:$0xff] }
 0x29a   : > { %1245 = vmatpush.msrb.mxu3 %v4485_v45  ;;  %1285 = vmatpush.msrb.mxu2 %v4486_v47  ;;  %v4507_v45 = vld [vmem:[%s6011_s8 + $0x968] sm:$0xff]  ;;  %v4589_v47 = vld [vmem:[%s6011_s8 + $0xbe0] sm:$0xff] }
 0x29b   : > { %1219 = vmatpush.msrb.mxu1 %v4465_v20  ;;  %1259 = vmatpush.msrb.mxu0 %v4466_v22 }
 0x29d   : > { %1220 = vmatpush.msrb.mxu1 %v4463_v24  ;;  %1260 = vmatpush.msrb.mxu0 %v4464_v26  ;;  %v4548_v24 = vld [vmem:[%s6011_s8 + $0xab0] sm:$0xff]  ;;  %v4549_v26 = vld [vmem:[%s6011_s8 + $0xab8] sm:$0xff] }
 0x29f   : > { %1221 = vmatpush.msrb.mxu1 %v4461_v28  ;;  %1261 = vmatpush.msrb.mxu0 %v4462_v30  ;;  %v4546_v28 = vld [vmem:[%s6011_s8 + $0xaa0] sm:$0xff]  ;;  %v4547_v30 = vld [vmem:[%s6011_s8 + $0xaa8] sm:$0xff] }
 0x2a1   : > { %1222 = vmatpush.msrb.mxu1 %v4459_v32  ;;  %1262 = vmatpush.msrb.mxu0 %v4460_v34  ;;  %v4544_v32 = vld [vmem:[%s6011_s8 + $0xa90] sm:$0xff]  ;;  %v4545_v34 = vld [vmem:[%s6011_s8 + $0xa98] sm:$0xff] }
 0x2a3   : > { %1223 = vmatpush.msrb.mxu1 %v4457_v36  ;;  %1263 = vmatpush.msrb.mxu0 %v4458_v38  ;;  %v4542_v36 = vld [vmem:[%s6011_s8 + $0xa80] sm:$0xff]  ;;  %v4543_v38 = vld [vmem:[%s6011_s8 + $0xa88] sm:$0xff] }
 0x2a5   : > { %1224 = vmatpush.msrb.mxu1 %v4455_v40  ;;  %1264 = vmatpush.msrb.mxu0 %v4456_v42  ;;  %v4540_v40 = vld [vmem:[%s6011_s8 + $0xa70] sm:$0xff]  ;;  %v4541_v42 = vld [vmem:[%s6011_s8 + $0xa78] sm:$0xff] }
 0x2a7   : > { %1225 = vmatpush.msrb.mxu1 %v4453_v44  ;;  %1265 = vmatpush.msrb.mxu0 %v4454_v46  ;;  %v4538_v44 = vld [vmem:[%s6011_s8 + $0xa60] sm:$0xff]  ;;  %v4539_v46 = vld [vmem:[%s6011_s8 + $0xa68] sm:$0xff] }
 0x304   : > { %v941_v10 = vpop.f32.mrf.mxu1  ;;  %v981_v11 = vpop.f32.mrf.mxu0 }
 0x305   : > { %v942_v12 = vadd.f32 %v941_v10, %v917_v8  ;;  %v982_v13 = vadd.f32 %v981_v11, %v918_v9  ;;  %v4518_v8 = vld [vmem:[%s6011_s8 + $0x9c0] sm:$0xff]  ;;  %v4519_v9 = vld [vmem:[%s6011_s8 + $0x9c8] sm:$0xff] }
 0x306   : > { %v4450_v10 = vld [vmem:[%s6026_s16 + $0x4] ss:$8 sm:$0x3] }
 0x307   : > { %v1060_v11 = vperm.slane %v4450_v10, 0 }
 0x30b   : > { %v961_v14 = vpop.f32.mrf.mxu3  ;;  %v1001_v15 = vpop.f32.mrf.mxu2 }
 0x30c   : > { %v962_v16 = vadd.f32 %v961_v14, %v942_v12  ;;  %v1002_v17 = vadd.f32 %v1001_v15, %v982_v13  ;;  %v1061_v12 = vperm.slane %v4450_v10, 1 }
 0x30e   : > { %v1004_v18 = vmax.f32 %v962_v16, 0.0  ;;  %v1005_v19 = vmax.f32 %v1002_v17, 0.0 }
 0x310   : > { %1083 = vmatmul.f32.vlgmr.msra.gmra.mxu3 %v1004_v18  ;;  %4451 = vmatmul.msk.f32.vlgmr.msra.gmra.mxu1 %vm491_vm2, %v1005_v19 }
 0x311   : > { %1123 = vmatmul.f32.vlgmr.msra.gmra.mxu2 %v1004_v18  ;;  %4452 = vmatmul.msk.f32.vlgmr.msra.gmra.mxu0 %vm491_vm2, %v1005_v19 }
 0x312   : > { %1353 = vmatpush.msra.mxu3 %v4536_v48  ;;  %1393 = vmatpush.msra.mxu2 %v4537_v49  ;;  %v4590_v48 = vld [vmem:[%s6011_s8 + $0xbe8] sm:$0xff]  ;;  %v4587_v49 = vld [vmem:[%s6011_s8 + $0xbd0] sm:$0xff] }
 0x313   : > { %1380 = vmatpush.msra.mxu1 %v4554_v56  ;;  %1420 = vmatpush.msra.mxu0 %v4555_v57  ;;  %v4608_v56 = vld [vmem:[%s6011_s8 + $0xc78] sm:$0xff]  ;;  %v4581_v57 = vld [vmem:[%s6011_s8 + $0xba0] sm:$0xff] }
 0x314   : > { %1354 = vmatpush.msra.mxu3 %v4534_v50  ;;  %1394 = vmatpush.msra.mxu2 %v4535_v51  ;;  %v4588_v50 = vld [vmem:[%s6011_s8 + $0xbd8] sm:$0xff]  ;;  %v4585_v51 = vld [vmem:[%s6011_s8 + $0xbc0] sm:$0xff] }
 0x315   : > { %1381 = vmatpush.msra.mxu1 %v4552_v60  ;;  %1421 = vmatpush.msra.mxu0 %v4553_v61  ;;  %v4606_v60 = vld [vmem:[%s6011_s8 + $0xc68] sm:$0xff]  ;;  %v4579_v61 = vld [vmem:[%s6011_s8 + $0xb90] sm:$0xff] }
 0x316   : > { %1355 = vmatpush.msra.mxu3 %v4532_v52  ;;  %1395 = vmatpush.msra.mxu2 %v4533_v53  ;;  %v4586_v52 = vld [vmem:[%s6011_s8 + $0xbc8] sm:$0xff]  ;;  %v4583_v53 = vld [vmem:[%s6011_s8 + $0xbb0] sm:$0xff] }
 0x317   : > { %1382 = vmatpush.msra.mxu1 %v4550_v62  ;;  %1422 = vmatpush.msra.mxu0 %v4551_v1  ;;  %v4580_v62 = vld [vmem:[%s6011_s8 + $0xb98] sm:$0xff]  ;;  %v4575_v1 = vld [vmem:[%s6011_s8 + $0xb70] sm:$0xff] }
 0x318   : > { %1356 = vmatpush.msra.mxu3 %v4530_v54  ;;  %1396 = vmatpush.msra.mxu2 %v4531_v55  ;;  %v4584_v54 = vld [vmem:[%s6011_s8 + $0xbb8] sm:$0xff]  ;;  %v4607_v55 = vld [vmem:[%s6011_s8 + $0xc70] sm:$0xff] }
 0x319   : > { %1383 = vmatpush.msra.mxu1 %v4548_v24  ;;  %1423 = vmatpush.msra.mxu0 %v4549_v26  ;;  %v4570_v24 = vld [vmem:[%s6011_s8 + $0xb48] sm:$0xff]  ;;  %v4567_v26 = vld [vmem:[%s6011_s8 + $0xb30] sm:$0xff] }
 0x31a   : > { %1357 = vmatpush.msra.mxu3 %v4528_v58  ;;  %1397 = vmatpush.msra.mxu2 %v4529_v59  ;;  %v4582_v58 = vld [vmem:[%s6011_s8 + $0xba8] sm:$0xff]  ;;  %v4605_v59 = vld [vmem:[%s6011_s8 + $0xc60] sm:$0xff] }
 0x31b   : > { %1384 = vmatpush.msra.mxu1 %v4546_v28  ;;  %1424 = vmatpush.msra.mxu0 %v4547_v30  ;;  %v4568_v28 = vld [vmem:[%s6011_s8 + $0xb38] sm:$0xff]  ;;  %v4565_v30 = vld [vmem:[%s6011_s8 + $0xb20] sm:$0xff] }
 0x31c   : > { %1358 = vmatpush.msra.mxu3 %v4526_v63  ;;  %1398 = vmatpush.msra.mxu2 %v4527_v0  ;;  %v4577_v63 = vld [vmem:[%s6011_s8 + $0xb80] sm:$0xff]  ;;  %v4578_v0 = vld [vmem:[%s6011_s8 + $0xb88] sm:$0xff] }
 0x31d   : > { %1385 = vmatpush.msra.mxu1 %v4544_v32  ;;  %1425 = vmatpush.msra.mxu0 %v4545_v34  ;;  %v4566_v32 = vld [vmem:[%s6011_s8 + $0xb28] sm:$0xff]  ;;  %v4563_v34 = vld [vmem:[%s6011_s8 + $0xb10] sm:$0xff] }
 0x31e   : > { %1359 = vmatpush.msra.mxu3 %v4524_v2  ;;  %1399 = vmatpush.msra.mxu2 %v4525_v3  ;;  %v4576_v2 = vld [vmem:[%s6011_s8 + $0xb78] sm:$0xff]  ;;  %v4573_v3 = vld [vmem:[%s6011_s8 + $0xb60] sm:$0xff] }
 0x31f   : > { %1386 = vmatpush.msra.mxu1 %v4542_v36  ;;  %1426 = vmatpush.msra.mxu0 %v4543_v38  ;;  %v4564_v36 = vld [vmem:[%s6011_s8 + $0xb18] sm:$0xff]  ;;  %v4561_v38 = vld [vmem:[%s6011_s8 + $0xb00] sm:$0xff] }
 0x320   : > { %1360 = vmatpush.msra.mxu3 %v4522_v4  ;;  %1400 = vmatpush.msra.mxu2 %v4523_v5  ;;  %v4574_v4 = vld [vmem:[%s6011_s8 + $0xb68] sm:$0xff] }
 0x321   : > { %1387 = vmatpush.msra.mxu1 %v4540_v40  ;;  %1427 = vmatpush.msra.mxu0 %v4541_v42  ;;  %v4503_v5 = vld [vmem:[%s6026_s16 + $0x5] ss:$8 sm:$0x3] }
 0x322   : > { %1361 = vmatpush.msra.mxu3 %v4520_v6  ;;  %1401 = vmatpush.msra.mxu2 %v4521_v7  ;;  %v1203_v6 = vperm.slane %v4503_v5, 0  ;;  %v1204_v7 = vperm.slane %v4503_v5, 1  ;;  %v4562_v40 = vld [vmem:[%s6011_s8 + $0xb08] sm:$0xff]  ;;  %v4559_v42 = vld [vmem:[%s6011_s8 + $0xaf0] sm:$0xff]  ;;  %v4627_v5 = vld [vmem:[%s6011_s8 + $0xcf8] sm:$0xff] }
 0x323   : > { %1388 = vmatpush.msra.mxu1 %v4538_v44  ;;  %1428 = vmatpush.msra.mxu0 %v4539_v46  ;;  %v4560_v44 = vld [vmem:[%s6011_s8 + $0xaf8] sm:$0xff]  ;;  %v4642_v46 = vld [vmem:[%s6011_s8 + $0xd70] sm:$0xff] }
 0x324   : > { %1362 = vmatpush.msra.mxu3 %v4518_v8  ;;  %1402 = vmatpush.msra.mxu2 %v4519_v9 }
 0x326   : > { %1363 = vmatpush.msra.mxu3 %v4516_v23  ;;  %1403 = vmatpush.msra.mxu2 %v4517_v25  ;;  %v4601_v23 = vld [vmem:[%s6011_s8 + $0xc40] sm:$0xff]  ;;  %v4602_v25 = vld [vmem:[%s6011_s8 + $0xc48] sm:$0xff] }
 0x328   : > { %1364 = vmatpush.msra.mxu3 %v4514_v27  ;;  %1404 = vmatpush.msra.mxu2 %v4515_v29  ;;  %v4599_v27 = vld [vmem:[%s6011_s8 + $0xc30] sm:$0xff]  ;;  %v4600_v29 = vld [vmem:[%s6011_s8 + $0xc38] sm:$0xff] }
 0x32a   : > { %1365 = vmatpush.msra.mxu3 %v4512_v31  ;;  %1405 = vmatpush.msra.mxu2 %v4513_v33  ;;  %v4597_v31 = vld [vmem:[%s6011_s8 + $0xc20] sm:$0xff]  ;;  %v4598_v33 = vld [vmem:[%s6011_s8 + $0xc28] sm:$0xff] }
 0x32c   : > { %1366 = vmatpush.msra.mxu3 %v4510_v35  ;;  %1406 = vmatpush.msra.mxu2 %v4511_v37  ;;  %v4595_v35 = vld [vmem:[%s6011_s8 + $0xc10] sm:$0xff]  ;;  %v4596_v37 = vld [vmem:[%s6011_s8 + $0xc18] sm:$0xff] }
 0x32e   : > { %1367 = vmatpush.msra.mxu3 %v4508_v39  ;;  %1407 = vmatpush.msra.mxu2 %v4509_v41  ;;  %v4593_v39 = vld [vmem:[%s6011_s8 + $0xc00] sm:$0xff]  ;;  %v4594_v41 = vld [vmem:[%s6011_s8 + $0xc08] sm:$0xff] }
 0x330   : > { %1368 = vmatpush.msra.mxu3 %v4506_v43  ;;  %1408 = vmatpush.msra.mxu2 %v4507_v45  ;;  %v4591_v43 = vld [vmem:[%s6011_s8 + $0xbf0] sm:$0xff]  ;;  %v4592_v45 = vld [vmem:[%s6011_s8 + $0xbf8] sm:$0xff] }
 0x38d   : > { %v1104_v16 = vpop.f32.mrf.mxu1 }
 0x38e   : > { %v1144_v18 = vpop.f32.mrf.mxu0 }
 0x393   : > { %v1084_v13 = vpop.f32.mrf.mxu3 }
 0x394   : > { %v1085_v14 = vadd.f32 %v1084_v13, %v1060_v11  ;;  %v1124_v15 = vpop.f32.mrf.mxu2 }
 0x395   : > { %v1125_v17 = vadd.f32 %v1124_v15, %v1061_v12 }
 0x396   : > { %v1105_v19 = vadd.f32 %v1104_v16, %v1085_v14 }
 0x397   : > { %v1145_v20 = vadd.f32 %v1144_v18, %v1125_v17  ;;  %v4571_v18 = vld [vmem:[%s6011_s8 + $0xb50] sm:$0xff] }
 0x398   : > { %v1147_v21 = vmax.f32 %v1105_v19, 0.0  ;;  %v4603_v19 = vld [vmem:[%s6011_s8 + $0xc50] sm:$0xff] }
 0x399   : > { %v1148_v22 = vmax.f32 %v1145_v20, 0.0  ;;  %v4572_v20 = vld [vmem:[%s6011_s8 + $0xb58] sm:$0xff] }
 0x39a   : > { %1226 = vmatmul.f32.vlgmr.msrb.gmra.mxu1 %v1147_v21  ;;  %1266 = vmatmul.f32.vlgmr.msrb.gmra.mxu0 %v1147_v21  ;;  %v4604_v21 = vld [vmem:[%s6011_s8 + $0xc58] sm:$0xff] }
 0x39b   : > { %4504 = vmatmul.msk.f32.vlgmr.msrb.gmra.mxu3 %vm491_vm2, %v1148_v22  ;;  %4505 = vmatmul.msk.f32.vlgmr.msrb.gmra.mxu2 %vm491_vm2, %v1148_v22  ;;  %v4569_v22 = vld [vmem:[%s6011_s8 + $0xb40] sm:$0xff] }
 0x39c   : > { %1496 = vmatpush.msrb.mxu1 %v4589_v47  ;;  %1536 = vmatpush.msrb.mxu0 %v4590_v48  ;;  %v4643_v47 = vld [vmem:[%s6011_s8 + $0xd78] sm:$0xff]  ;;  %v4640_v48 = vld [vmem:[%s6011_s8 + $0xd60] sm:$0xff] }
 0x39d   : > { %1523 = vmatpush.msrb.mxu3 %v4607_v55  ;;  %1563 = vmatpush.msrb.mxu2 %v4608_v56  ;;  %v4661_v55 = vld [vmem:[%s6011_s8 + $0xe08] sm:$0xff]  ;;  %v4634_v56 = vld [vmem:[%s6011_s8 + $0xd30] sm:$0xff] }
 0x39e   : > { %1497 = vmatpush.msrb.mxu1 %v4587_v49  ;;  %1537 = vmatpush.msrb.mxu0 %v4588_v50  ;;  %v4641_v49 = vld [vmem:[%s6011_s8 + $0xd68] sm:$0xff]  ;;  %v4638_v50 = vld [vmem:[%s6011_s8 + $0xd50] sm:$0xff] }
 0x39f   : > { %1524 = vmatpush.msrb.mxu3 %v4605_v59  ;;  %1564 = vmatpush.msrb.mxu2 %v4606_v60  ;;  %v4659_v59 = vld [vmem:[%s6011_s8 + $0xdf8] sm:$0xff]  ;;  %v4656_v60 = vld [vmem:[%s6011_s8 + $0xde0] sm:$0xff] }
 0x3a0   : > { %1498 = vmatpush.msrb.mxu1 %v4585_v51  ;;  %1538 = vmatpush.msrb.mxu0 %v4586_v52  ;;  %v4639_v51 = vld [vmem:[%s6011_s8 + $0xd58] sm:$0xff]  ;;  %v4636_v52 = vld [vmem:[%s6011_s8 + $0xd40] sm:$0xff] }
 0x3a1   : > { %1525 = vmatpush.msrb.mxu3 %v4603_v19  ;;  %1565 = vmatpush.msrb.mxu2 %v4604_v21  ;;  %v4622_v21 = vld [vmem:[%s6011_s8 + $0xcd0] sm:$0xff] }
 0x3a2   : > { %1499 = vmatpush.msrb.mxu1 %v4583_v53  ;;  %1539 = vmatpush.msrb.mxu0 %v4584_v54  ;;  %v4637_v53 = vld [vmem:[%s6011_s8 + $0xd48] sm:$0xff]  ;;  %v4660_v54 = vld [vmem:[%s6011_s8 + $0xe00] sm:$0xff] }
 0x3a3   : > { %1526 = vmatpush.msrb.mxu3 %v4601_v23  ;;  %1566 = vmatpush.msrb.mxu2 %v4602_v25  ;;  %v4623_v23 = vld [vmem:[%s6011_s8 + $0xcd8] sm:$0xff]  ;;  %v4620_v25 = vld [vmem:[%s6011_s8 + $0xcc0] sm:$0xff] }
 0x3a4   : > { %1500 = vmatpush.msrb.mxu1 %v4581_v57  ;;  %1540 = vmatpush.msrb.mxu0 %v4582_v58  ;;  %v4635_v57 = vld [vmem:[%s6011_s8 + $0xd38] sm:$0xff]  ;;  %v4658_v58 = vld [vmem:[%s6011_s8 + $0xdf0] sm:$0xff] }
 0x3a5   : > { %1527 = vmatpush.msrb.mxu3 %v4599_v27  ;;  %1567 = vmatpush.msrb.mxu2 %v4600_v29  ;;  %v4621_v27 = vld [vmem:[%s6011_s8 + $0xcc8] sm:$0xff]  ;;  %v4618_v29 = vld [vmem:[%s6011_s8 + $0xcb0] sm:$0xff] }
 0x3a6   : > { %1501 = vmatpush.msrb.mxu1 %v4579_v61  ;;  %1541 = vmatpush.msrb.mxu0 %v4580_v62  ;;  %v4632_v61 = vld [vmem:[%s6011_s8 + $0xd20] sm:$0xff]  ;;  %v4633_v62 = vld [vmem:[%s6011_s8 + $0xd28] sm:$0xff] }
 0x3a7   : > { %1528 = vmatpush.msrb.mxu3 %v4597_v31  ;;  %1568 = vmatpush.msrb.mxu2 %v4598_v33  ;;  %v4619_v31 = vld [vmem:[%s6011_s8 + $0xcb8] sm:$0xff]  ;;  %v4616_v33 = vld [vmem:[%s6011_s8 + $0xca0] sm:$0xff] }
 0x3a8   : > { %1502 = vmatpush.msrb.mxu1 %v4577_v63  ;;  %1542 = vmatpush.msrb.mxu0 %v4578_v0  ;;  %v4657_v63 = vld [vmem:[%s6011_s8 + $0xde8] sm:$0xff]  ;;  %v4630_v0 = vld [vmem:[%s6011_s8 + $0xd10] sm:$0xff] }
 0x3a9   : > { %1529 = vmatpush.msrb.mxu3 %v4595_v35  ;;  %1569 = vmatpush.msrb.mxu2 %v4596_v37  ;;  %v4617_v35 = vld [vmem:[%s6011_s8 + $0xca8] sm:$0xff]  ;;  %v4614_v37 = vld [vmem:[%s6011_s8 + $0xc90] sm:$0xff] }
 0x3aa   : > { %1503 = vmatpush.msrb.mxu1 %v4575_v1  ;;  %1543 = vmatpush.msrb.mxu0 %v4576_v2  ;;  %v4631_v1 = vld [vmem:[%s6011_s8 + $0xd18] sm:$0xff]  ;;  %v4628_v2 = vld [vmem:[%s6011_s8 + $0xd00] sm:$0xff] }
 0x3ab   : > { %1530 = vmatpush.msrb.mxu3 %v4593_v39  ;;  %1570 = vmatpush.msrb.mxu2 %v4594_v41  ;;  %v4615_v39 = vld [vmem:[%s6011_s8 + $0xc98] sm:$0xff]  ;;  %v4612_v41 = vld [vmem:[%s6011_s8 + $0xc80] sm:$0xff] }
 0x3ac   : > { %1504 = vmatpush.msrb.mxu1 %v4573_v3  ;;  %1544 = vmatpush.msrb.mxu0 %v4574_v4  ;;  %v4629_v3 = vld [vmem:[%s6011_s8 + $0xd08] sm:$0xff]  ;;  %v4626_v4 = vld [vmem:[%s6011_s8 + $0xcf0] sm:$0xff] }
 0x3ad   : > { %1531 = vmatpush.msrb.mxu3 %v4591_v43  ;;  %1571 = vmatpush.msrb.mxu2 %v4592_v45  ;;  %v4613_v43 = vld [vmem:[%s6011_s8 + $0xc88] sm:$0xff]  ;;  %v4695_v45 = vld [vmem:[%s6011_s8 + $0xf00] sm:$0xff] }
 0x3ae   : > { %1505 = vmatpush.msrb.mxu1 %v4571_v18  ;;  %1545 = vmatpush.msrb.mxu0 %v4572_v20 }
 0x3b0   : > { %1506 = vmatpush.msrb.mxu1 %v4569_v22  ;;  %1546 = vmatpush.msrb.mxu0 %v4570_v24  ;;  %v4654_v22 = vld [vmem:[%s6011_s8 + $0xdd0] sm:$0xff]  ;;  %v4655_v24 = vld [vmem:[%s6011_s8 + $0xdd8] sm:$0xff] }
 0x3b2   : > { %1507 = vmatpush.msrb.mxu1 %v4567_v26  ;;  %1547 = vmatpush.msrb.mxu0 %v4568_v28  ;;  %v4652_v26 = vld [vmem:[%s6011_s8 + $0xdc0] sm:$0xff]  ;;  %v4653_v28 = vld [vmem:[%s6011_s8 + $0xdc8] sm:$0xff] }
 0x3b4   : > { %1508 = vmatpush.msrb.mxu1 %v4565_v30  ;;  %1548 = vmatpush.msrb.mxu0 %v4566_v32  ;;  %v4650_v30 = vld [vmem:[%s6011_s8 + $0xdb0] sm:$0xff]  ;;  %v4651_v32 = vld [vmem:[%s6011_s8 + $0xdb8] sm:$0xff] }
 0x3b6   : > { %1509 = vmatpush.msrb.mxu1 %v4563_v34  ;;  %1549 = vmatpush.msrb.mxu0 %v4564_v36  ;;  %v4648_v34 = vld [vmem:[%s6011_s8 + $0xda0] sm:$0xff]  ;;  %v4649_v36 = vld [vmem:[%s6011_s8 + $0xda8] sm:$0xff] }
 0x3b8   : > { %1510 = vmatpush.msrb.mxu1 %v4561_v38  ;;  %1550 = vmatpush.msrb.mxu0 %v4562_v40  ;;  %v4646_v38 = vld [vmem:[%s6011_s8 + $0xd90] sm:$0xff]  ;;  %v4647_v40 = vld [vmem:[%s6011_s8 + $0xd98] sm:$0xff] }
 0x3ba   : > { %1511 = vmatpush.msrb.mxu1 %v4559_v42  ;;  %1551 = vmatpush.msrb.mxu0 %v4560_v44  ;;  %v4644_v42 = vld [vmem:[%s6011_s8 + $0xd80] sm:$0xff]  ;;  %v4645_v44 = vld [vmem:[%s6011_s8 + $0xd88] sm:$0xff] }
 0x417   : > { %v1227_v8 = vpop.f32.mrf.mxu1  ;;  %v1267_v9 = vpop.f32.mrf.mxu0 }
 0x418   : > { %v1228_v10 = vadd.f32 %v1227_v8, %v1203_v6  ;;  %v1268_v11 = vadd.f32 %v1267_v9, %v1204_v7  ;;  %v4624_v6 = vld [vmem:[%s6011_s8 + $0xce0] sm:$0xff]  ;;  %v4625_v7 = vld [vmem:[%s6011_s8 + $0xce8] sm:$0xff] }
 0x419   : > { %v4556_v8 = vld [vmem:[%s6026_s16 + $0x6] ss:$8 sm:$0x3] }
 0x41a   : > { %v1346_v9 = vperm.slane %v4556_v8, 0 }
 0x41e   : > { %v1247_v12 = vpop.f32.mrf.mxu3  ;;  %v1287_v13 = vpop.f32.mrf.mxu2 }
 0x41f   : > { %v1248_v14 = vadd.f32 %v1247_v12, %v1228_v10  ;;  %v1288_v15 = vadd.f32 %v1287_v13, %v1268_v11  ;;  %v1347_v10 = vperm.slane %v4556_v8, 1 }
 0x421   : > { %v1290_v16 = vmax.f32 %v1248_v14, 0.0  ;;  %v1291_v17 = vmax.f32 %v1288_v15, 0.0 }
 0x423   : > { %1369 = vmatmul.f32.vlgmr.msra.gmra.mxu3 %v1290_v16  ;;  %4557 = vmatmul.msk.f32.vlgmr.msra.gmra.mxu1 %vm491_vm2, %v1291_v17 }
 0x424   : > { %1409 = vmatmul.f32.vlgmr.msra.gmra.mxu2 %v1290_v16  ;;  %4558 = vmatmul.msk.f32.vlgmr.msra.gmra.mxu0 %vm491_vm2, %v1291_v17 }
 0x425   : > { %1639 = vmatpush.msra.mxu3 %v4642_v46  ;;  %1679 = vmatpush.msra.mxu2 %v4643_v47  ;;  %v4696_v46 = vld [vmem:[%s6011_s8 + $0xf08] sm:$0xff]  ;;  %v4693_v47 = vld [vmem:[%s6011_s8 + $0xef0] sm:$0xff] }
 0x426   : > { %1666 = vmatpush.msra.mxu1 %v4660_v54  ;;  %1706 = vmatpush.msra.mxu0 %v4661_v55  ;;  %v4714_v54 = vld [vmem:[%s6011_s8 + $0xf98] sm:$0xff]  ;;  %v4687_v55 = vld [vmem:[%s6011_s8 + $0xec0] sm:$0xff] }
 0x427   : > { %1640 = vmatpush.msra.mxu3 %v4640_v48  ;;  %1680 = vmatpush.msra.mxu2 %v4641_v49  ;;  %v4694_v48 = vld [vmem:[%s6011_s8 + $0xef8] sm:$0xff]  ;;  %v4691_v49 = vld [vmem:[%s6011_s8 + $0xee0] sm:$0xff] }
 0x428   : > { %1667 = vmatpush.msra.mxu1 %v4658_v58  ;;  %1707 = vmatpush.msra.mxu0 %v4659_v59  ;;  %v4712_v58 = vld [vmem:[%s6011_s8 + $0xf88] sm:$0xff]  ;;  %v4685_v59 = vld [vmem:[%s6011_s8 + $0xeb0] sm:$0xff] }
 0x429   : > { %1641 = vmatpush.msra.mxu3 %v4638_v50  ;;  %1681 = vmatpush.msra.mxu2 %v4639_v51  ;;  %v4692_v50 = vld [vmem:[%s6011_s8 + $0xee8] sm:$0xff]  ;;  %v4689_v51 = vld [vmem:[%s6011_s8 + $0xed0] sm:$0xff] }
 0x42a   : > { %1668 = vmatpush.msra.mxu1 %v4656_v60  ;;  %1708 = vmatpush.msra.mxu0 %v4657_v63  ;;  %v4686_v60 = vld [vmem:[%s6011_s8 + $0xeb8] sm:$0xff]  ;;  %v4681_v63 = vld [vmem:[%s6011_s8 + $0xe90] sm:$0xff] }
 0x42b   : > { %1642 = vmatpush.msra.mxu3 %v4636_v52  ;;  %1682 = vmatpush.msra.mxu2 %v4637_v53  ;;  %v4690_v52 = vld [vmem:[%s6011_s8 + $0xed8] sm:$0xff]  ;;  %v4713_v53 = vld [vmem:[%s6011_s8 + $0xf90] sm:$0xff] }
 0x42c   : > { %1669 = vmatpush.msra.mxu1 %v4654_v22  ;;  %1709 = vmatpush.msra.mxu0 %v4655_v24  ;;  %v4676_v22 = vld [vmem:[%s6011_s8 + $0xe68] sm:$0xff]  ;;  %v4673_v24 = vld [vmem:[%s6011_s8 + $0xe50] sm:$0xff] }
 0x42d   : > { %1643 = vmatpush.msra.mxu3 %v4634_v56  ;;  %1683 = vmatpush.msra.mxu2 %v4635_v57  ;;  %v4688_v56 = vld [vmem:[%s6011_s8 + $0xec8] sm:$0xff]  ;;  %v4711_v57 = vld [vmem:[%s6011_s8 + $0xf80] sm:$0xff] }
 0x42e   : > { %1670 = vmatpush.msra.mxu1 %v4652_v26  ;;  %1710 = vmatpush.msra.mxu0 %v4653_v28  ;;  %v4674_v26 = vld [vmem:[%s6011_s8 + $0xe58] sm:$0xff]  ;;  %v4671_v28 = vld [vmem:[%s6011_s8 + $0xe40] sm:$0xff] }
 0x42f   : > { %1644 = vmatpush.msra.mxu3 %v4632_v61  ;;  %1684 = vmatpush.msra.mxu2 %v4633_v62  ;;  %v4683_v61 = vld [vmem:[%s6011_s8 + $0xea0] sm:$0xff]  ;;  %v4684_v62 = vld [vmem:[%s6011_s8 + $0xea8] sm:$0xff] }
 0x430   : > { %1671 = vmatpush.msra.mxu1 %v4650_v30  ;;  %1711 = vmatpush.msra.mxu0 %v4651_v32  ;;  %v4672_v30 = vld [vmem:[%s6011_s8 + $0xe48] sm:$0xff]  ;;  %v4669_v32 = vld [vmem:[%s6011_s8 + $0xe30] sm:$0xff] }
 0x431   : > { %1645 = vmatpush.msra.mxu3 %v4630_v0  ;;  %1685 = vmatpush.msra.mxu2 %v4631_v1  ;;  %v4682_v0 = vld [vmem:[%s6011_s8 + $0xe98] sm:$0xff]  ;;  %v4679_v1 = vld [vmem:[%s6011_s8 + $0xe80] sm:$0xff] }
 0x432   : > { %1672 = vmatpush.msra.mxu1 %v4648_v34  ;;  %1712 = vmatpush.msra.mxu0 %v4649_v36  ;;  %v4670_v34 = vld [vmem:[%s6011_s8 + $0xe38] sm:$0xff]  ;;  %v4667_v36 = vld [vmem:[%s6011_s8 + $0xe20] sm:$0xff] }
 0x433   : > { %1646 = vmatpush.msra.mxu3 %v4628_v2  ;;  %1686 = vmatpush.msra.mxu2 %v4629_v3  ;;  %v4680_v2 = vld [vmem:[%s6011_s8 + $0xe88] sm:$0xff] }
 0x434   : > { %1673 = vmatpush.msra.mxu1 %v4646_v38  ;;  %1713 = vmatpush.msra.mxu0 %v4647_v40  ;;  %v4609_v3 = vld [vmem:[%s6026_s16 + $0x7] ss:$8 sm:$0x3] }
 0x435   : > { %1647 = vmatpush.msra.mxu3 %v4626_v4  ;;  %1687 = vmatpush.msra.mxu2 %v4627_v5  ;;  %v1489_v4 = vperm.slane %v4609_v3, 0  ;;  %v1490_v5 = vperm.slane %v4609_v3, 1  ;;  %v4668_v38 = vld [vmem:[%s6011_s8 + $0xe28] sm:$0xff]  ;;  %v4665_v40 = vld [vmem:[%s6011_s8 + $0xe10] sm:$0xff]  ;;  %v4733_v3 = vld [vmem:[%s6011_s8 + $0x1018] sm:$0xff] }
 0x436   : > { %1674 = vmatpush.msra.mxu1 %v4644_v42  ;;  %1714 = vmatpush.msra.mxu0 %v4645_v44  ;;  %v4666_v42 = vld [vmem:[%s6011_s8 + $0xe18] sm:$0xff]  ;;  %v4748_v44 = vld [vmem:[%s6011_s8 + $0x1090] sm:$0xff] }
 0x437   : > { %1648 = vmatpush.msra.mxu3 %v4624_v6  ;;  %1688 = vmatpush.msra.mxu2 %v4625_v7 }
 0x439   : > { %1649 = vmatpush.msra.mxu3 %v4622_v21  ;;  %1689 = vmatpush.msra.mxu2 %v4623_v23  ;;  %v4707_v21 = vld [vmem:[%s6011_s8 + $0xf60] sm:$0xff]  ;;  %v4708_v23 = vld [vmem:[%s6011_s8 + $0xf68] sm:$0xff] }
 0x43b   : > { %1650 = vmatpush.msra.mxu3 %v4620_v25  ;;  %1690 = vmatpush.msra.mxu2 %v4621_v27  ;;  %v4705_v25 = vld [vmem:[%s6011_s8 + $0xf50] sm:$0xff]  ;;  %v4706_v27 = vld [vmem:[%s6011_s8 + $0xf58] sm:$0xff] }
 0x43d   : > { %1651 = vmatpush.msra.mxu3 %v4618_v29  ;;  %1691 = vmatpush.msra.mxu2 %v4619_v31  ;;  %v4703_v29 = vld [vmem:[%s6011_s8 + $0xf40] sm:$0xff]  ;;  %v4704_v31 = vld [vmem:[%s6011_s8 + $0xf48] sm:$0xff] }
 0x43f   : > { %1652 = vmatpush.msra.mxu3 %v4616_v33  ;;  %1692 = vmatpush.msra.mxu2 %v4617_v35  ;;  %v4701_v33 = vld [vmem:[%s6011_s8 + $0xf30] sm:$0xff]  ;;  %v4702_v35 = vld [vmem:[%s6011_s8 + $0xf38] sm:$0xff] }
 0x441   : > { %1653 = vmatpush.msra.mxu3 %v4614_v37  ;;  %1693 = vmatpush.msra.mxu2 %v4615_v39  ;;  %v4699_v37 = vld [vmem:[%s6011_s8 + $0xf20] sm:$0xff]  ;;  %v4700_v39 = vld [vmem:[%s6011_s8 + $0xf28] sm:$0xff] }
 0x443   : > { %1654 = vmatpush.msra.mxu3 %v4612_v41  ;;  %1694 = vmatpush.msra.mxu2 %v4613_v43  ;;  %v4697_v41 = vld [vmem:[%s6011_s8 + $0xf10] sm:$0xff]  ;;  %v4698_v43 = vld [vmem:[%s6011_s8 + $0xf18] sm:$0xff] }
 0x4a0   : > { %v1390_v14 = vpop.f32.mrf.mxu1 }
 0x4a1   : > { %v1430_v16 = vpop.f32.mrf.mxu0 }
 0x4a6   : > { %v1370_v11 = vpop.f32.mrf.mxu3 }
 0x4a7   : > { %v1371_v12 = vadd.f32 %v1370_v11, %v1346_v9  ;;  %v1410_v13 = vpop.f32.mrf.mxu2 }
 0x4a8   : > { %v1411_v15 = vadd.f32 %v1410_v13, %v1347_v10 }
 0x4a9   : > { %v1391_v17 = vadd.f32 %v1390_v14, %v1371_v12 }
 0x4aa   : > { %v1431_v18 = vadd.f32 %v1430_v16, %v1411_v15  ;;  %v4677_v16 = vld [vmem:[%s6011_s8 + $0xe70] sm:$0xff] }
 0x4ab   : > { %v1433_v19 = vmax.f32 %v1391_v17, 0.0  ;;  %v4709_v17 = vld [vmem:[%s6011_s8 + $0xf70] sm:$0xff] }
 0x4ac   : > { %v1434_v20 = vmax.f32 %v1431_v18, 0.0  ;;  %v4678_v18 = vld [vmem:[%s6011_s8 + $0xe78] sm:$0xff] }
 0x4ad   : > { %1512 = vmatmul.f32.vlgmr.msrb.gmra.mxu1 %v1433_v19  ;;  %1552 = vmatmul.f32.vlgmr.msrb.gmra.mxu0 %v1433_v19  ;;  %v4710_v19 = vld [vmem:[%s6011_s8 + $0xf78] sm:$0xff] }
 0x4ae   : > { %4610 = vmatmul.msk.f32.vlgmr.msrb.gmra.mxu3 %vm491_vm2, %v1434_v20  ;;  %4611 = vmatmul.msk.f32.vlgmr.msrb.gmra.mxu2 %vm491_vm2, %v1434_v20  ;;  %v4675_v20 = vld [vmem:[%s6011_s8 + $0xe60] sm:$0xff] }
 0x4af   : > { %1782 = vmatpush.msrb.mxu1 %v4695_v45  ;;  %1822 = vmatpush.msrb.mxu0 %v4696_v46  ;;  %v4749_v45 = vld [vmem:[%s6011_s8 + $0x1098] sm:$0xff]  ;;  %v4746_v46 = vld [vmem:[%s6011_s8 + $0x1080] sm:$0xff] }
 0x4b0   : > { %1809 = vmatpush.msrb.mxu3 %v4713_v53  ;;  %1849 = vmatpush.msrb.mxu2 %v4714_v54  ;;  %v4767_v53 = vld [vmem:[%s6011_s8 + $0x1128] sm:$0xff]  ;;  %v4740_v54 = vld [vmem:[%s6011_s8 + $0x1050] sm:$0xff] }
 0x4b1   : > { %1783 = vmatpush.msrb.mxu1 %v4693_v47  ;;  %1823 = vmatpush.msrb.mxu0 %v4694_v48  ;;  %v4747_v47 = vld [vmem:[%s6011_s8 + $0x1088] sm:$0xff]  ;;  %v4744_v48 = vld [vmem:[%s6011_s8 + $0x1070] sm:$0xff] }
 0x4b2   : > { %1810 = vmatpush.msrb.mxu3 %v4711_v57  ;;  %1850 = vmatpush.msrb.mxu2 %v4712_v58  ;;  %v4765_v57 = vld [vmem:[%s6011_s8 + $0x1118] sm:$0xff]  ;;  %v4762_v58 = vld [vmem:[%s6011_s8 + $0x1100] sm:$0xff] }
 0x4b3   : > { %1784 = vmatpush.msrb.mxu1 %v4691_v49  ;;  %1824 = vmatpush.msrb.mxu0 %v4692_v50  ;;  %v4745_v49 = vld [vmem:[%s6011_s8 + $0x1078] sm:$0xff]  ;;  %v4742_v50 = vld [vmem:[%s6011_s8 + $0x1060] sm:$0xff] }
 0x4b4   : > { %1811 = vmatpush.msrb.mxu3 %v4709_v17  ;;  %1851 = vmatpush.msrb.mxu2 %v4710_v19  ;;  %v4728_v19 = vld [vmem:[%s6011_s8 + $0xff0] sm:$0xff] }
 0x4b5   : > { %1785 = vmatpush.msrb.mxu1 %v4689_v51  ;;  %1825 = vmatpush.msrb.mxu0 %v4690_v52  ;;  %v4743_v51 = vld [vmem:[%s6011_s8 + $0x1068] sm:$0xff]  ;;  %v4766_v52 = vld [vmem:[%s6011_s8 + $0x1120] sm:$0xff] }
 0x4b6   : > { %1812 = vmatpush.msrb.mxu3 %v4707_v21  ;;  %1852 = vmatpush.msrb.mxu2 %v4708_v23  ;;  %v4729_v21 = vld [vmem:[%s6011_s8 + $0xff8] sm:$0xff]  ;;  %v4726_v23 = vld [vmem:[%s6011_s8 + $0xfe0] sm:$0xff] }
 0x4b7   : > { %1786 = vmatpush.msrb.mxu1 %v4687_v55  ;;  %1826 = vmatpush.msrb.mxu0 %v4688_v56  ;;  %v4741_v55 = vld [vmem:[%s6011_s8 + $0x1058] sm:$0xff]  ;;  %v4764_v56 = vld [vmem:[%s6011_s8 + $0x1110] sm:$0xff] }
 0x4b8   : > { %1813 = vmatpush.msrb.mxu3 %v4705_v25  ;;  %1853 = vmatpush.msrb.mxu2 %v4706_v27  ;;  %v4727_v25 = vld [vmem:[%s6011_s8 + $0xfe8] sm:$0xff]  ;;  %v4724_v27 = vld [vmem:[%s6011_s8 + $0xfd0] sm:$0xff] }
 0x4b9   : > { %1787 = vmatpush.msrb.mxu1 %v4685_v59  ;;  %1827 = vmatpush.msrb.mxu0 %v4686_v60  ;;  %v4738_v59 = vld [vmem:[%s6011_s8 + $0x1040] sm:$0xff]  ;;  %v4739_v60 = vld [vmem:[%s6011_s8 + $0x1048] sm:$0xff] }
 0x4ba   : > { %1814 = vmatpush.msrb.mxu3 %v4703_v29  ;;  %1854 = vmatpush.msrb.mxu2 %v4704_v31  ;;  %v4725_v29 = vld [vmem:[%s6011_s8 + $0xfd8] sm:$0xff]  ;;  %v4722_v31 = vld [vmem:[%s6011_s8 + $0xfc0] sm:$0xff] }
 0x4bb   : > { %1788 = vmatpush.msrb.mxu1 %v4683_v61  ;;  %1828 = vmatpush.msrb.mxu0 %v4684_v62  ;;  %v4763_v61 = vld [vmem:[%s6011_s8 + $0x1108] sm:$0xff]  ;;  %v4736_v62 = vld [vmem:[%s6011_s8 + $0x1030] sm:$0xff] }
 0x4bc   : > { %1815 = vmatpush.msrb.mxu3 %v4701_v33  ;;  %1855 = vmatpush.msrb.mxu2 %v4702_v35  ;;  %v4723_v33 = vld [vmem:[%s6011_s8 + $0xfc8] sm:$0xff]  ;;  %v4720_v35 = vld [vmem:[%s6011_s8 + $0xfb0] sm:$0xff] }
 0x4bd   : > { %1789 = vmatpush.msrb.mxu1 %v4681_v63  ;;  %1829 = vmatpush.msrb.mxu0 %v4682_v0  ;;  %v4737_v63 = vld [vmem:[%s6011_s8 + $0x1038] sm:$0xff]  ;;  %v4734_v0 = vld [vmem:[%s6011_s8 + $0x1020] sm:$0xff] }
 0x4be   : > { %1816 = vmatpush.msrb.mxu3 %v4699_v37  ;;  %1856 = vmatpush.msrb.mxu2 %v4700_v39  ;;  %v4721_v37 = vld [vmem:[%s6011_s8 + $0xfb8] sm:$0xff]  ;;  %v4718_v39 = vld [vmem:[%s6011_s8 + $0xfa0] sm:$0xff] }
 0x4bf   : > { %1790 = vmatpush.msrb.mxu1 %v4679_v1  ;;  %1830 = vmatpush.msrb.mxu0 %v4680_v2  ;;  %v4735_v1 = vld [vmem:[%s6011_s8 + $0x1028] sm:$0xff]  ;;  %v4732_v2 = vld [vmem:[%s6011_s8 + $0x1010] sm:$0xff] }
 0x4c0   : > { %1817 = vmatpush.msrb.mxu3 %v4697_v41  ;;  %1857 = vmatpush.msrb.mxu2 %v4698_v43  ;;  %v4719_v41 = vld [vmem:[%s6011_s8 + $0xfa8] sm:$0xff]  ;;  %v4801_v43 = vld [vmem:[%s6011_s8 + $0x1220] sm:$0xff] }
 0x4c1   : > { %1791 = vmatpush.msrb.mxu1 %v4677_v16  ;;  %1831 = vmatpush.msrb.mxu0 %v4678_v18 }
 0x4c3   : > { %1792 = vmatpush.msrb.mxu1 %v4675_v20  ;;  %1832 = vmatpush.msrb.mxu0 %v4676_v22  ;;  %v4760_v20 = vld [vmem:[%s6011_s8 + $0x10f0] sm:$0xff]  ;;  %v4761_v22 = vld [vmem:[%s6011_s8 + $0x10f8] sm:$0xff] }
 0x4c5   : > { %1793 = vmatpush.msrb.mxu1 %v4673_v24  ;;  %1833 = vmatpush.msrb.mxu0 %v4674_v26  ;;  %v4758_v24 = vld [vmem:[%s6011_s8 + $0x10e0] sm:$0xff]  ;;  %v4759_v26 = vld [vmem:[%s6011_s8 + $0x10e8] sm:$0xff] }
 0x4c7   : > { %1794 = vmatpush.msrb.mxu1 %v4671_v28  ;;  %1834 = vmatpush.msrb.mxu0 %v4672_v30  ;;  %v4756_v28 = vld [vmem:[%s6011_s8 + $0x10d0] sm:$0xff]  ;;  %v4757_v30 = vld [vmem:[%s6011_s8 + $0x10d8] sm:$0xff] }
 0x4c9   : > { %1795 = vmatpush.msrb.mxu1 %v4669_v32  ;;  %1835 = vmatpush.msrb.mxu0 %v4670_v34  ;;  %v4754_v32 = vld [vmem:[%s6011_s8 + $0x10c0] sm:$0xff]  ;;  %v4755_v34 = vld [vmem:[%s6011_s8 + $0x10c8] sm:$0xff] }
 0x4cb   : > { %1796 = vmatpush.msrb.mxu1 %v4667_v36  ;;  %1836 = vmatpush.msrb.mxu0 %v4668_v38  ;;  %v4752_v36 = vld [vmem:[%s6011_s8 + $0x10b0] sm:$0xff]  ;;  %v4753_v38 = vld [vmem:[%s6011_s8 + $0x10b8] sm:$0xff] }
 0x4cd   : > { %1797 = vmatpush.msrb.mxu1 %v4665_v40  ;;  %1837 = vmatpush.msrb.mxu0 %v4666_v42  ;;  %v4750_v40 = vld [vmem:[%s6011_s8 + $0x10a0] sm:$0xff]  ;;  %v4751_v42 = vld [vmem:[%s6011_s8 + $0x10a8] sm:$0xff] }
 0x52a   : > { %v1513_v6 = vpop.f32.mrf.mxu1  ;;  %v1553_v7 = vpop.f32.mrf.mxu0 }
 0x52b   : > { %v1514_v8 = vadd.f32 %v1513_v6, %v1489_v4  ;;  %v1554_v9 = vadd.f32 %v1553_v7, %v1490_v5  ;;  %v4730_v4 = vld [vmem:[%s6011_s8 + $0x1000] sm:$0xff]  ;;  %v4731_v5 = vld [vmem:[%s6011_s8 + $0x1008] sm:$0xff] }
 0x52c   : > { %v4662_v6 = vld [vmem:[%s6026_s16 + $0x10] ss:$8 sm:$0x3] }
 0x52d   : > { %v1632_v7 = vperm.slane %v4662_v6, 0 }
 0x531   : > { %v1533_v10 = vpop.f32.mrf.mxu3  ;;  %v1573_v11 = vpop.f32.mrf.mxu2 }
 0x532   : > { %v1534_v12 = vadd.f32 %v1533_v10, %v1514_v8  ;;  %v1574_v13 = vadd.f32 %v1573_v11, %v1554_v9  ;;  %v1633_v8 = vperm.slane %v4662_v6, 1 }
 0x534   : > { %v1576_v14 = vmax.f32 %v1534_v12, 0.0  ;;  %v1577_v15 = vmax.f32 %v1574_v13, 0.0 }
 0x536   : > { %1655 = vmatmul.f32.vlgmr.msra.gmra.mxu3 %v1576_v14  ;;  %4663 = vmatmul.msk.f32.vlgmr.msra.gmra.mxu1 %vm491_vm2, %v1577_v15 }
 0x537   : > { %1695 = vmatmul.f32.vlgmr.msra.gmra.mxu2 %v1576_v14  ;;  %4664 = vmatmul.msk.f32.vlgmr.msra.gmra.mxu0 %vm491_vm2, %v1577_v15 }
 0x538   : > { %1925 = vmatpush.msra.mxu3 %v4748_v44  ;;  %1965 = vmatpush.msra.mxu2 %v4749_v45  ;;  %v4802_v44 = vld [vmem:[%s6011_s8 + $0x1228] sm:$0xff]  ;;  %v4799_v45 = vld [vmem:[%s6011_s8 + $0x1210] sm:$0xff] }
 0x539   : > { %1952 = vmatpush.msra.mxu1 %v4766_v52  ;;  %1992 = vmatpush.msra.mxu0 %v4767_v53  ;;  %v4820_v52 = vld [vmem:[%s6011_s8 + $0x12b8] sm:$0xff]  ;;  %v4793_v53 = vld [vmem:[%s6011_s8 + $0x11e0] sm:$0xff] }
 0x53a   : > { %1926 = vmatpush.msra.mxu3 %v4746_v46  ;;  %1966 = vmatpush.msra.mxu2 %v4747_v47  ;;  %v4800_v46 = vld [vmem:[%s6011_s8 + $0x1218] sm:$0xff]  ;;  %v4797_v47 = vld [vmem:[%s6011_s8 + $0x1200] sm:$0xff] }
 0x53b   : > { %1953 = vmatpush.msra.mxu1 %v4764_v56  ;;  %1993 = vmatpush.msra.mxu0 %v4765_v57  ;;  %v4818_v56 = vld [vmem:[%s6011_s8 + $0x12a8] sm:$0xff]  ;;  %v4791_v57 = vld [vmem:[%s6011_s8 + $0x11d0] sm:$0xff] }
 0x53c   : > { %1927 = vmatpush.msra.mxu3 %v4744_v48  ;;  %1967 = vmatpush.msra.mxu2 %v4745_v49  ;;  %v4798_v48 = vld [vmem:[%s6011_s8 + $0x1208] sm:$0xff]  ;;  %v4795_v49 = vld [vmem:[%s6011_s8 + $0x11f0] sm:$0xff] }
 0x53d   : > { %1954 = vmatpush.msra.mxu1 %v4762_v58  ;;  %1994 = vmatpush.msra.mxu0 %v4763_v61  ;;  %v4792_v58 = vld [vmem:[%s6011_s8 + $0x11d8] sm:$0xff]  ;;  %v4787_v61 = vld [vmem:[%s6011_s8 + $0x11b0] sm:$0xff] }
 0x53e   : > { %1928 = vmatpush.msra.mxu3 %v4742_v50  ;;  %1968 = vmatpush.msra.mxu2 %v4743_v51  ;;  %v4796_v50 = vld [vmem:[%s6011_s8 + $0x11f8] sm:$0xff]  ;;  %v4819_v51 = vld [vmem:[%s6011_s8 + $0x12b0] sm:$0xff] }
 0x53f   : > { %1955 = vmatpush.msra.mxu1 %v4760_v20  ;;  %1995 = vmatpush.msra.mxu0 %v4761_v22  ;;  %v4782_v20 = vld [vmem:[%s6011_s8 + $0x1188] sm:$0xff]  ;;  %v4779_v22 = vld [vmem:[%s6011_s8 + $0x1170] sm:$0xff] }
 0x540   : > { %1929 = vmatpush.msra.mxu3 %v4740_v54  ;;  %1969 = vmatpush.msra.mxu2 %v4741_v55  ;;  %v4794_v54 = vld [vmem:[%s6011_s8 + $0x11e8] sm:$0xff]  ;;  %v4817_v55 = vld [vmem:[%s6011_s8 + $0x12a0] sm:$0xff] }
 0x541   : > { %1956 = vmatpush.msra.mxu1 %v4758_v24  ;;  %1996 = vmatpush.msra.mxu0 %v4759_v26  ;;  %v4780_v24 = vld [vmem:[%s6011_s8 + $0x1178] sm:$0xff]  ;;  %v4777_v26 = vld [vmem:[%s6011_s8 + $0x1160] sm:$0xff] }
 0x542   : > { %1930 = vmatpush.msra.mxu3 %v4738_v59  ;;  %1970 = vmatpush.msra.mxu2 %v4739_v60  ;;  %v4789_v59 = vld [vmem:[%s6011_s8 + $0x11c0] sm:$0xff]  ;;  %v4790_v60 = vld [vmem:[%s6011_s8 + $0x11c8] sm:$0xff] }
 0x543   : > { %1957 = vmatpush.msra.mxu1 %v4756_v28  ;;  %1997 = vmatpush.msra.mxu0 %v4757_v30  ;;  %v4778_v28 = vld [vmem:[%s6011_s8 + $0x1168] sm:$0xff]  ;;  %v4775_v30 = vld [vmem:[%s6011_s8 + $0x1150] sm:$0xff] }
 0x544   : > { %1931 = vmatpush.msra.mxu3 %v4736_v62  ;;  %1971 = vmatpush.msra.mxu2 %v4737_v63  ;;  %v4788_v62 = vld [vmem:[%s6011_s8 + $0x11b8] sm:$0xff]  ;;  %v4785_v63 = vld [vmem:[%s6011_s8 + $0x11a0] sm:$0xff] }
 0x545   : > { %1958 = vmatpush.msra.mxu1 %v4754_v32  ;;  %1998 = vmatpush.msra.mxu0 %v4755_v34  ;;  %v4776_v32 = vld [vmem:[%s6011_s8 + $0x1158] sm:$0xff]  ;;  %v4773_v34 = vld [vmem:[%s6011_s8 + $0x1140] sm:$0xff] }
 0x546   : > { %1932 = vmatpush.msra.mxu3 %v4734_v0  ;;  %1972 = vmatpush.msra.mxu2 %v4735_v1  ;;  %v4786_v0 = vld [vmem:[%s6011_s8 + $0x11a8] sm:$0xff] }
 0x547   : > { %1959 = vmatpush.msra.mxu1 %v4752_v36  ;;  %1999 = vmatpush.msra.mxu0 %v4753_v38  ;;  %v4715_v1 = vld [vmem:[%s6026_s16 + $0x11] ss:$8 sm:$0x3] }
 0x548   : > { %1933 = vmatpush.msra.mxu3 %v4732_v2  ;;  %1973 = vmatpush.msra.mxu2 %v4733_v3  ;;  %v1775_v2 = vperm.slane %v4715_v1, 0  ;;  %v1776_v3 = vperm.slane %v4715_v1, 1  ;;  %v4774_v36 = vld [vmem:[%s6011_s8 + $0x1148] sm:$0xff]  ;;  %v4771_v38 = vld [vmem:[%s6011_s8 + $0x1130] sm:$0xff]  ;;  %v4839_v1 = vld [vmem:[%s6011_s8 + $0x1338] sm:$0xff] }
 0x549   : > { %1960 = vmatpush.msra.mxu1 %v4750_v40  ;;  %2000 = vmatpush.msra.mxu0 %v4751_v42  ;;  %v4772_v40 = vld [vmem:[%s6011_s8 + $0x1138] sm:$0xff]  ;;  %v4854_v42 = vld [vmem:[%s6011_s8 + $0x13b0] sm:$0xff] }
 0x54a   : > { %1934 = vmatpush.msra.mxu3 %v4730_v4  ;;  %1974 = vmatpush.msra.mxu2 %v4731_v5 }
 0x54c   : > { %1935 = vmatpush.msra.mxu3 %v4728_v19  ;;  %1975 = vmatpush.msra.mxu2 %v4729_v21  ;;  %v4813_v19 = vld [vmem:[%s6011_s8 + $0x1280] sm:$0xff]  ;;  %v4814_v21 = vld [vmem:[%s6011_s8 + $0x1288] sm:$0xff] }
 0x54e   : > { %1936 = vmatpush.msra.mxu3 %v4726_v23  ;;  %1976 = vmatpush.msra.mxu2 %v4727_v25  ;;  %v4811_v23 = vld [vmem:[%s6011_s8 + $0x1270] sm:$0xff]  ;;  %v4812_v25 = vld [vmem:[%s6011_s8 + $0x1278] sm:$0xff] }
 0x550   : > { %1937 = vmatpush.msra.mxu3 %v4724_v27  ;;  %1977 = vmatpush.msra.mxu2 %v4725_v29  ;;  %v4809_v27 = vld [vmem:[%s6011_s8 + $0x1260] sm:$0xff]  ;;  %v4810_v29 = vld [vmem:[%s6011_s8 + $0x1268] sm:$0xff] }
 0x552   : > { %1938 = vmatpush.msra.mxu3 %v4722_v31  ;;  %1978 = vmatpush.msra.mxu2 %v4723_v33  ;;  %v4807_v31 = vld [vmem:[%s6011_s8 + $0x1250] sm:$0xff]  ;;  %v4808_v33 = vld [vmem:[%s6011_s8 + $0x1258] sm:$0xff] }
 0x554   : > { %1939 = vmatpush.msra.mxu3 %v4720_v35  ;;  %1979 = vmatpush.msra.mxu2 %v4721_v37  ;;  %v4805_v35 = vld [vmem:[%s6011_s8 + $0x1240] sm:$0xff]  ;;  %v4806_v37 = vld [vmem:[%s6011_s8 + $0x1248] sm:$0xff] }
 0x556   : > { %1940 = vmatpush.msra.mxu3 %v4718_v39  ;;  %1980 = vmatpush.msra.mxu2 %v4719_v41  ;;  %v4803_v39 = vld [vmem:[%s6011_s8 + $0x1230] sm:$0xff]  ;;  %v4804_v41 = vld [vmem:[%s6011_s8 + $0x1238] sm:$0xff] }
 0x5b3   : > { %v1676_v12 = vpop.f32.mrf.mxu1 }
 0x5b4   : > { %v1716_v14 = vpop.f32.mrf.mxu0 }
 0x5b9   : > { %v1656_v9 = vpop.f32.mrf.mxu3 }
 0x5ba   : > { %v1657_v10 = vadd.f32 %v1656_v9, %v1632_v7  ;;  %v1696_v11 = vpop.f32.mrf.mxu2 }
 0x5bb   : > { %v1697_v13 = vadd.f32 %v1696_v11, %v1633_v8 }
 0x5bc   : > { %v1677_v15 = vadd.f32 %v1676_v12, %v1657_v10 }
 0x5bd   : > { %v1717_v16 = vadd.f32 %v1716_v14, %v1697_v13  ;;  %v4783_v14 = vld [vmem:[%s6011_s8 + $0x1190] sm:$0xff] }
 0x5be   : > { %v1719_v17 = vmax.f32 %v1677_v15, 0.0  ;;  %v4815_v15 = vld [vmem:[%s6011_s8 + $0x1290] sm:$0xff] }
 0x5bf   : > { %v1720_v18 = vmax.f32 %v1717_v16, 0.0  ;;  %v4784_v16 = vld [vmem:[%s6011_s8 + $0x1198] sm:$0xff] }
 0x5c0   : > { %1798 = vmatmul.f32.vlgmr.msrb.gmra.mxu1 %v1719_v17  ;;  %1838 = vmatmul.f32.vlgmr.msrb.gmra.mxu0 %v1719_v17  ;;  %v4816_v17 = vld [vmem:[%s6011_s8 + $0x1298] sm:$0xff] }
 0x5c1   : > { %4716 = vmatmul.msk.f32.vlgmr.msrb.gmra.mxu3 %vm491_vm2, %v1720_v18  ;;  %4717 = vmatmul.msk.f32.vlgmr.msrb.gmra.mxu2 %vm491_vm2, %v1720_v18  ;;  %v4781_v18 = vld [vmem:[%s6011_s8 + $0x1180] sm:$0xff] }
 0x5c2   : > { %2068 = vmatpush.msrb.mxu1 %v4801_v43  ;;  %2108 = vmatpush.msrb.mxu0 %v4802_v44  ;;  %v4855_v43 = vld [vmem:[%s6011_s8 + $0x13b8] sm:$0xff]  ;;  %v4852_v44 = vld [vmem:[%s6011_s8 + $0x13a0] sm:$0xff] }
 0x5c3   : > { %2095 = vmatpush.msrb.mxu3 %v4819_v51  ;;  %2135 = vmatpush.msrb.mxu2 %v4820_v52  ;;  %v4873_v51 = vld [vmem:[%s6011_s8 + $0x1448] sm:$0xff]  ;;  %v4846_v52 = vld [vmem:[%s6011_s8 + $0x1370] sm:$0xff] }
 0x5c4   : > { %2069 = vmatpush.msrb.mxu1 %v4799_v45  ;;  %2109 = vmatpush.msrb.mxu0 %v4800_v46  ;;  %v4853_v45 = vld [vmem:[%s6011_s8 + $0x13a8] sm:$0xff]  ;;  %v4850_v46 = vld [vmem:[%s6011_s8 + $0x1390] sm:$0xff] }
 0x5c5   : > { %2096 = vmatpush.msrb.mxu3 %v4817_v55  ;;  %2136 = vmatpush.msrb.mxu2 %v4818_v56  ;;  %v4871_v55 = vld [vmem:[%s6011_s8 + $0x1438] sm:$0xff]  ;;  %v4868_v56 = vld [vmem:[%s6011_s8 + $0x1420] sm:$0xff] }
 0x5c6   : > { %2070 = vmatpush.msrb.mxu1 %v4797_v47  ;;  %2110 = vmatpush.msrb.mxu0 %v4798_v48  ;;  %v4851_v47 = vld [vmem:[%s6011_s8 + $0x1398] sm:$0xff]  ;;  %v4848_v48 = vld [vmem:[%s6011_s8 + $0x1380] sm:$0xff] }
 0x5c7   : > { %2097 = vmatpush.msrb.mxu3 %v4815_v15  ;;  %2137 = vmatpush.msrb.mxu2 %v4816_v17  ;;  %v4834_v17 = vld [vmem:[%s6011_s8 + $0x1310] sm:$0xff] }
 0x5c8   : > { %2071 = vmatpush.msrb.mxu1 %v4795_v49  ;;  %2111 = vmatpush.msrb.mxu0 %v4796_v50  ;;  %v4849_v49 = vld [vmem:[%s6011_s8 + $0x1388] sm:$0xff]  ;;  %v4872_v50 = vld [vmem:[%s6011_s8 + $0x1440] sm:$0xff] }
 0x5c9   : > { %2098 = vmatpush.msrb.mxu3 %v4813_v19  ;;  %2138 = vmatpush.msrb.mxu2 %v4814_v21  ;;  %v4835_v19 = vld [vmem:[%s6011_s8 + $0x1318] sm:$0xff]  ;;  %v4832_v21 = vld [vmem:[%s6011_s8 + $0x1300] sm:$0xff] }
 0x5ca   : > { %2072 = vmatpush.msrb.mxu1 %v4793_v53  ;;  %2112 = vmatpush.msrb.mxu0 %v4794_v54  ;;  %v4847_v53 = vld [vmem:[%s6011_s8 + $0x1378] sm:$0xff]  ;;  %v4870_v54 = vld [vmem:[%s6011_s8 + $0x1430] sm:$0xff] }
 0x5cb   : > { %2099 = vmatpush.msrb.mxu3 %v4811_v23  ;;  %2139 = vmatpush.msrb.mxu2 %v4812_v25  ;;  %v4833_v23 = vld [vmem:[%s6011_s8 + $0x1308] sm:$0xff]  ;;  %v4830_v25 = vld [vmem:[%s6011_s8 + $0x12f0] sm:$0xff] }
 0x5cc   : > { %2073 = vmatpush.msrb.mxu1 %v4791_v57  ;;  %2113 = vmatpush.msrb.mxu0 %v4792_v58  ;;  %v4844_v57 = vld [vmem:[%s6011_s8 + $0x1360] sm:$0xff]  ;;  %v4845_v58 = vld [vmem:[%s6011_s8 + $0x1368] sm:$0xff] }
 0x5cd   : > { %2100 = vmatpush.msrb.mxu3 %v4809_v27  ;;  %2140 = vmatpush.msrb.mxu2 %v4810_v29  ;;  %v4831_v27 = vld [vmem:[%s6011_s8 + $0x12f8] sm:$0xff]  ;;  %v4828_v29 = vld [vmem:[%s6011_s8 + $0x12e0] sm:$0xff] }
 0x5ce   : > { %2074 = vmatpush.msrb.mxu1 %v4789_v59  ;;  %2114 = vmatpush.msrb.mxu0 %v4790_v60  ;;  %v4869_v59 = vld [vmem:[%s6011_s8 + $0x1428] sm:$0xff]  ;;  %v4842_v60 = vld [vmem:[%s6011_s8 + $0x1350] sm:$0xff] }
 0x5cf   : > { %2101 = vmatpush.msrb.mxu3 %v4807_v31  ;;  %2141 = vmatpush.msrb.mxu2 %v4808_v33  ;;  %v4829_v31 = vld [vmem:[%s6011_s8 + $0x12e8] sm:$0xff]  ;;  %v4826_v33 = vld [vmem:[%s6011_s8 + $0x12d0] sm:$0xff] }
 0x5d0   : > { %2075 = vmatpush.msrb.mxu1 %v4787_v61  ;;  %2115 = vmatpush.msrb.mxu0 %v4788_v62  ;;  %v4843_v61 = vld [vmem:[%s6011_s8 + $0x1358] sm:$0xff]  ;;  %v4840_v62 = vld [vmem:[%s6011_s8 + $0x1340] sm:$0xff] }
 0x5d1   : > { %2102 = vmatpush.msrb.mxu3 %v4805_v35  ;;  %2142 = vmatpush.msrb.mxu2 %v4806_v37  ;;  %v4827_v35 = vld [vmem:[%s6011_s8 + $0x12d8] sm:$0xff]  ;;  %v4824_v37 = vld [vmem:[%s6011_s8 + $0x12c0] sm:$0xff] }
 0x5d2   : > { %2076 = vmatpush.msrb.mxu1 %v4785_v63  ;;  %2116 = vmatpush.msrb.mxu0 %v4786_v0  ;;  %v4841_v63 = vld [vmem:[%s6011_s8 + $0x1348] sm:$0xff]  ;;  %v4838_v0 = vld [vmem:[%s6011_s8 + $0x1330] sm:$0xff] }
 0x5d3   : > { %2103 = vmatpush.msrb.mxu3 %v4803_v39  ;;  %2143 = vmatpush.msrb.mxu2 %v4804_v41  ;;  %v4825_v39 = vld [vmem:[%s6011_s8 + $0x12c8] sm:$0xff]  ;;  %v4907_v41 = vld [vmem:[%s6011_s8 + $0x1540] sm:$0xff] }
 0x5d4   : > { %2077 = vmatpush.msrb.mxu1 %v4783_v14  ;;  %2117 = vmatpush.msrb.mxu0 %v4784_v16 }
 0x5d6   : > { %2078 = vmatpush.msrb.mxu1 %v4781_v18  ;;  %2118 = vmatpush.msrb.mxu0 %v4782_v20  ;;  %v4866_v18 = vld [vmem:[%s6011_s8 + $0x1410] sm:$0xff]  ;;  %v4867_v20 = vld [vmem:[%s6011_s8 + $0x1418] sm:$0xff] }
 0x5d8   : > { %2079 = vmatpush.msrb.mxu1 %v4779_v22  ;;  %2119 = vmatpush.msrb.mxu0 %v4780_v24  ;;  %v4864_v22 = vld [vmem:[%s6011_s8 + $0x1400] sm:$0xff]  ;;  %v4865_v24 = vld [vmem:[%s6011_s8 + $0x1408] sm:$0xff] }
 0x5da   : > { %2080 = vmatpush.msrb.mxu1 %v4777_v26  ;;  %2120 = vmatpush.msrb.mxu0 %v4778_v28  ;;  %v4862_v26 = vld [vmem:[%s6011_s8 + $0x13f0] sm:$0xff]  ;;  %v4863_v28 = vld [vmem:[%s6011_s8 + $0x13f8] sm:$0xff] }
 0x5dc   : > { %2081 = vmatpush.msrb.mxu1 %v4775_v30  ;;  %2121 = vmatpush.msrb.mxu0 %v4776_v32  ;;  %v4860_v30 = vld [vmem:[%s6011_s8 + $0x13e0] sm:$0xff]  ;;  %v4861_v32 = vld [vmem:[%s6011_s8 + $0x13e8] sm:$0xff] }
 0x5de   : > { %2082 = vmatpush.msrb.mxu1 %v4773_v34  ;;  %2122 = vmatpush.msrb.mxu0 %v4774_v36  ;;  %v4858_v34 = vld [vmem:[%s6011_s8 + $0x13d0] sm:$0xff]  ;;  %v4859_v36 = vld [vmem:[%s6011_s8 + $0x13d8] sm:$0xff] }
 0x5e0   : > { %2083 = vmatpush.msrb.mxu1 %v4771_v38  ;;  %2123 = vmatpush.msrb.mxu0 %v4772_v40  ;;  %v4856_v38 = vld [vmem:[%s6011_s8 + $0x13c0] sm:$0xff]  ;;  %v4857_v40 = vld [vmem:[%s6011_s8 + $0x13c8] sm:$0xff] }
 0x63d   : > { %v1799_v4 = vpop.f32.mrf.mxu1  ;;  %v1839_v5 = vpop.f32.mrf.mxu0 }
 0x63e   : > { %v1800_v6 = vadd.f32 %v1799_v4, %v1775_v2  ;;  %v1840_v7 = vadd.f32 %v1839_v5, %v1776_v3  ;;  %v4836_v2 = vld [vmem:[%s6011_s8 + $0x1320] sm:$0xff]  ;;  %v4837_v3 = vld [vmem:[%s6011_s8 + $0x1328] sm:$0xff] }
 0x63f   : > { %v4768_v4 = vld [vmem:[%s6026_s16 + $0x12] ss:$8 sm:$0x3] }
 0x640   : > { %v1918_v5 = vperm.slane %v4768_v4, 0 }
 0x644   : > { %v1819_v8 = vpop.f32.mrf.mxu3  ;;  %v1859_v9 = vpop.f32.mrf.mxu2 }
 0x645   : > { %v1820_v10 = vadd.f32 %v1819_v8, %v1800_v6  ;;  %v1860_v11 = vadd.f32 %v1859_v9, %v1840_v7  ;;  %v1919_v6 = vperm.slane %v4768_v4, 1 }
 0x647   : > { %v1862_v12 = vmax.f32 %v1820_v10, 0.0  ;;  %v1863_v13 = vmax.f32 %v1860_v11, 0.0 }
 0x649   : > { %1941 = vmatmul.f32.vlgmr.msra.gmra.mxu3 %v1862_v12  ;;  %4769 = vmatmul.msk.f32.vlgmr.msra.gmra.mxu1 %vm491_vm2, %v1863_v13 }
 0x64a   : > { %1981 = vmatmul.f32.vlgmr.msra.gmra.mxu2 %v1862_v12  ;;  %4770 = vmatmul.msk.f32.vlgmr.msra.gmra.mxu0 %vm491_vm2, %v1863_v13 }
 0x64b   : > { %2211 = vmatpush.msra.mxu3 %v4854_v42  ;;  %2251 = vmatpush.msra.mxu2 %v4855_v43  ;;  %v4908_v42 = vld [vmem:[%s6011_s8 + $0x1548] sm:$0xff]  ;;  %v4905_v43 = vld [vmem:[%s6011_s8 + $0x1530] sm:$0xff] }
 0x64c   : > { %2238 = vmatpush.msra.mxu1 %v4872_v50  ;;  %2278 = vmatpush.msra.mxu0 %v4873_v51  ;;  %v4926_v50 = vld [vmem:[%s6011_s8 + $0x15d8] sm:$0xff]  ;;  %v4899_v51 = vld [vmem:[%s6011_s8 + $0x1500] sm:$0xff] }
 0x64d   : > { %2212 = vmatpush.msra.mxu3 %v4852_v44  ;;  %2252 = vmatpush.msra.mxu2 %v4853_v45  ;;  %v4906_v44 = vld [vmem:[%s6011_s8 + $0x1538] sm:$0xff]  ;;  %v4903_v45 = vld [vmem:[%s6011_s8 + $0x1520] sm:$0xff] }
 0x64e   : > { %2239 = vmatpush.msra.mxu1 %v4870_v54  ;;  %2279 = vmatpush.msra.mxu0 %v4871_v55  ;;  %v4924_v54 = vld [vmem:[%s6011_s8 + $0x15c8] sm:$0xff]  ;;  %v4897_v55 = vld [vmem:[%s6011_s8 + $0x14f0] sm:$0xff] }
 0x64f   : > { %2213 = vmatpush.msra.mxu3 %v4850_v46  ;;  %2253 = vmatpush.msra.mxu2 %v4851_v47  ;;  %v4904_v46 = vld [vmem:[%s6011_s8 + $0x1528] sm:$0xff]  ;;  %v4901_v47 = vld [vmem:[%s6011_s8 + $0x1510] sm:$0xff] }
 0x650   : > { %2240 = vmatpush.msra.mxu1 %v4868_v56  ;;  %2280 = vmatpush.msra.mxu0 %v4869_v59  ;;  %v4898_v56 = vld [vmem:[%s6011_s8 + $0x14f8] sm:$0xff]  ;;  %v4893_v59 = vld [vmem:[%s6011_s8 + $0x14d0] sm:$0xff] }
 0x651   : > { %2214 = vmatpush.msra.mxu3 %v4848_v48  ;;  %2254 = vmatpush.msra.mxu2 %v4849_v49  ;;  %v4902_v48 = vld [vmem:[%s6011_s8 + $0x1518] sm:$0xff]  ;;  %v4925_v49 = vld [vmem:[%s6011_s8 + $0x15d0] sm:$0xff] }
 0x652   : > { %2241 = vmatpush.msra.mxu1 %v4866_v18  ;;  %2281 = vmatpush.msra.mxu0 %v4867_v20  ;;  %v4888_v18 = vld [vmem:[%s6011_s8 + $0x14a8] sm:$0xff]  ;;  %v4885_v20 = vld [vmem:[%s6011_s8 + $0x1490] sm:$0xff] }
 0x653   : > { %2215 = vmatpush.msra.mxu3 %v4846_v52  ;;  %2255 = vmatpush.msra.mxu2 %v4847_v53  ;;  %v4900_v52 = vld [vmem:[%s6011_s8 + $0x1508] sm:$0xff]  ;;  %v4923_v53 = vld [vmem:[%s6011_s8 + $0x15c0] sm:$0xff] }
 0x654   : > { %2242 = vmatpush.msra.mxu1 %v4864_v22  ;;  %2282 = vmatpush.msra.mxu0 %v4865_v24  ;;  %v4886_v22 = vld [vmem:[%s6011_s8 + $0x1498] sm:$0xff]  ;;  %v4883_v24 = vld [vmem:[%s6011_s8 + $0x1480] sm:$0xff] }
 0x655   : > { %2216 = vmatpush.msra.mxu3 %v4844_v57  ;;  %2256 = vmatpush.msra.mxu2 %v4845_v58  ;;  %v4895_v57 = vld [vmem:[%s6011_s8 + $0x14e0] sm:$0xff]  ;;  %v4896_v58 = vld [vmem:[%s6011_s8 + $0x14e8] sm:$0xff] }
 0x656   : > { %2243 = vmatpush.msra.mxu1 %v4862_v26  ;;  %2283 = vmatpush.msra.mxu0 %v4863_v28  ;;  %v4884_v26 = vld [vmem:[%s6011_s8 + $0x1488] sm:$0xff]  ;;  %v4881_v28 = vld [vmem:[%s6011_s8 + $0x1470] sm:$0xff] }
 0x657   : > { %2217 = vmatpush.msra.mxu3 %v4842_v60  ;;  %2257 = vmatpush.msra.mxu2 %v4843_v61  ;;  %v4894_v60 = vld [vmem:[%s6011_s8 + $0x14d8] sm:$0xff]  ;;  %v4891_v61 = vld [vmem:[%s6011_s8 + $0x14c0] sm:$0xff] }
 0x658   : > { %2244 = vmatpush.msra.mxu1 %v4860_v30  ;;  %2284 = vmatpush.msra.mxu0 %v4861_v32  ;;  %v4882_v30 = vld [vmem:[%s6011_s8 + $0x1478] sm:$0xff]  ;;  %v4879_v32 = vld [vmem:[%s6011_s8 + $0x1460] sm:$0xff] }
 0x659   : > { %2218 = vmatpush.msra.mxu3 %v4840_v62  ;;  %2258 = vmatpush.msra.mxu2 %v4841_v63  ;;  %v4892_v62 = vld [vmem:[%s6011_s8 + $0x14c8] sm:$0xff] }
 0x65a   : > { %2245 = vmatpush.msra.mxu1 %v4858_v34  ;;  %2285 = vmatpush.msra.mxu0 %v4859_v36  ;;  %v4821_v63 = vld [vmem:[%s6026_s16 + $0x13] ss:$8 sm:$0x3] }
 0x65b   : > { %2219 = vmatpush.msra.mxu3 %v4838_v0  ;;  %2259 = vmatpush.msra.mxu2 %v4839_v1  ;;  %v2061_v0 = vperm.slane %v4821_v63, 0  ;;  %v2062_v1 = vperm.slane %v4821_v63, 1  ;;  %v4880_v34 = vld [vmem:[%s6011_s8 + $0x1468] sm:$0xff]  ;;  %v4877_v36 = vld [vmem:[%s6011_s8 + $0x1450] sm:$0xff]  ;;  %v4945_v63 = vld [vmem:[%s6011_s8 + $0x1658] sm:$0xff] }
 0x65c   : > { %2246 = vmatpush.msra.mxu1 %v4856_v38  ;;  %2286 = vmatpush.msra.mxu0 %v4857_v40  ;;  %v4878_v38 = vld [vmem:[%s6011_s8 + $0x1458] sm:$0xff]  ;;  %v4960_v40 = vld [vmem:[%s6011_s8 + $0x16d0] sm:$0xff] }
 0x65d   : > { %2220 = vmatpush.msra.mxu3 %v4836_v2  ;;  %2260 = vmatpush.msra.mxu2 %v4837_v3 }
 0x65f   : > { %2221 = vmatpush.msra.mxu3 %v4834_v17  ;;  %2261 = vmatpush.msra.mxu2 %v4835_v19  ;;  %v4919_v17 = vld [vmem:[%s6011_s8 + $0x15a0] sm:$0xff]  ;;  %v4920_v19 = vld [vmem:[%s6011_s8 + $0x15a8] sm:$0xff] }
 0x661   : > { %2222 = vmatpush.msra.mxu3 %v4832_v21  ;;  %2262 = vmatpush.msra.mxu2 %v4833_v23  ;;  %v4917_v21 = vld [vmem:[%s6011_s8 + $0x1590] sm:$0xff]  ;;  %v4918_v23 = vld [vmem:[%s6011_s8 + $0x1598] sm:$0xff] }
 0x663   : > { %2223 = vmatpush.msra.mxu3 %v4830_v25  ;;  %2263 = vmatpush.msra.mxu2 %v4831_v27  ;;  %v4915_v25 = vld [vmem:[%s6011_s8 + $0x1580] sm:$0xff]  ;;  %v4916_v27 = vld [vmem:[%s6011_s8 + $0x1588] sm:$0xff] }
 0x665   : > { %2224 = vmatpush.msra.mxu3 %v4828_v29  ;;  %2264 = vmatpush.msra.mxu2 %v4829_v31  ;;  %v4913_v29 = vld [vmem:[%s6011_s8 + $0x1570] sm:$0xff]  ;;  %v4914_v31 = vld [vmem:[%s6011_s8 + $0x1578] sm:$0xff] }
 0x667   : > { %2225 = vmatpush.msra.mxu3 %v4826_v33  ;;  %2265 = vmatpush.msra.mxu2 %v4827_v35  ;;  %v4911_v33 = vld [vmem:[%s6011_s8 + $0x1560] sm:$0xff]  ;;  %v4912_v35 = vld [vmem:[%s6011_s8 + $0x1568] sm:$0xff] }
 0x669   : > { %2226 = vmatpush.msra.mxu3 %v4824_v37  ;;  %2266 = vmatpush.msra.mxu2 %v4825_v39  ;;  %v4909_v37 = vld [vmem:[%s6011_s8 + $0x1550] sm:$0xff]  ;;  %v4910_v39 = vld [vmem:[%s6011_s8 + $0x1558] sm:$0xff] }
 0x6c6   : > { %v1962_v10 = vpop.f32.mrf.mxu1 }
 0x6c7   : > { %v2002_v12 = vpop.f32.mrf.mxu0 }
 0x6cc   : > { %v1942_v7 = vpop.f32.mrf.mxu3 }
 0x6cd   : > { %v1943_v8 = vadd.f32 %v1942_v7, %v1918_v5  ;;  %v1982_v9 = vpop.f32.mrf.mxu2 }
 0x6ce   : > { %v1983_v11 = vadd.f32 %v1982_v9, %v1919_v6 }
 0x6cf   : > { %v1963_v13 = vadd.f32 %v1962_v10, %v1943_v8 }
 0x6d0   : > { %v2003_v14 = vadd.f32 %v2002_v12, %v1983_v11  ;;  %v4889_v12 = vld [vmem:[%s6011_s8 + $0x14b0] sm:$0xff] }
 0x6d1   : > { %v2005_v15 = vmax.f32 %v1963_v13, 0.0  ;;  %v4921_v13 = vld [vmem:[%s6011_s8 + $0x15b0] sm:$0xff] }
 0x6d2   : > { %v2006_v16 = vmax.f32 %v2003_v14, 0.0  ;;  %v4890_v14 = vld [vmem:[%s6011_s8 + $0x14b8] sm:$0xff] }
 0x6d3   : > { %2084 = vmatmul.f32.vlgmr.msrb.gmra.mxu1 %v2005_v15  ;;  %2124 = vmatmul.f32.vlgmr.msrb.gmra.mxu0 %v2005_v15  ;;  %v4922_v15 = vld [vmem:[%s6011_s8 + $0x15b8] sm:$0xff] }
 0x6d4   : > { %4822 = vmatmul.msk.f32.vlgmr.msrb.gmra.mxu3 %vm491_vm2, %v2006_v16  ;;  %4823 = vmatmul.msk.f32.vlgmr.msrb.gmra.mxu2 %vm491_vm2, %v2006_v16  ;;  %v4887_v16 = vld [vmem:[%s6011_s8 + $0x14a0] sm:$0xff] }
 0x6d5   : > { %2354 = vmatpush.msrb.mxu1 %v4907_v41  ;;  %2394 = vmatpush.msrb.mxu0 %v4908_v42  ;;  %v4961_v41 = vld [vmem:[%s6011_s8 + $0x16d8] sm:$0xff]  ;;  %v4958_v42 = vld [vmem:[%s6011_s8 + $0x16c0] sm:$0xff] }
 0x6d6   : > { %2381 = vmatpush.msrb.mxu3 %v4925_v49  ;;  %2421 = vmatpush.msrb.mxu2 %v4926_v50  ;;  %v4979_v49 = vld [vmem:[%s6011_s8 + $0x1768] sm:$0xff]  ;;  %v4952_v50 = vld [vmem:[%s6011_s8 + $0x1690] sm:$0xff] }
 0x6d7   : > { %2355 = vmatpush.msrb.mxu1 %v4905_v43  ;;  %2395 = vmatpush.msrb.mxu0 %v4906_v44  ;;  %v4959_v43 = vld [vmem:[%s6011_s8 + $0x16c8] sm:$0xff]  ;;  %v4956_v44 = vld [vmem:[%s6011_s8 + $0x16b0] sm:$0xff] }
 0x6d8   : > { %2382 = vmatpush.msrb.mxu3 %v4923_v53  ;;  %2422 = vmatpush.msrb.mxu2 %v4924_v54  ;;  %v4977_v53 = vld [vmem:[%s6011_s8 + $0x1758] sm:$0xff]  ;;  %v4974_v54 = vld [vmem:[%s6011_s8 + $0x1740] sm:$0xff] }
 0x6d9   : > { %2356 = vmatpush.msrb.mxu1 %v4903_v45  ;;  %2396 = vmatpush.msrb.mxu0 %v4904_v46  ;;  %v4957_v45 = vld [vmem:[%s6011_s8 + $0x16b8] sm:$0xff]  ;;  %v4954_v46 = vld [vmem:[%s6011_s8 + $0x16a0] sm:$0xff] }
 0x6da   : > { %2383 = vmatpush.msrb.mxu3 %v4921_v13  ;;  %2423 = vmatpush.msrb.mxu2 %v4922_v15  ;;  %v4940_v15 = vld [vmem:[%s6011_s8 + $0x1630] sm:$0xff] }
 0x6db   : > { %2357 = vmatpush.msrb.mxu1 %v4901_v47  ;;  %2397 = vmatpush.msrb.mxu0 %v4902_v48  ;;  %v4955_v47 = vld [vmem:[%s6011_s8 + $0x16a8] sm:$0xff]  ;;  %v4978_v48 = vld [vmem:[%s6011_s8 + $0x1760] sm:$0xff] }
 0x6dc   : > { %2384 = vmatpush.msrb.mxu3 %v4919_v17  ;;  %2424 = vmatpush.msrb.mxu2 %v4920_v19  ;;  %v4941_v17 = vld [vmem:[%s6011_s8 + $0x1638] sm:$0xff]  ;;  %v4938_v19 = vld [vmem:[%s6011_s8 + $0x1620] sm:$0xff] }
 0x6dd   : > { %2358 = vmatpush.msrb.mxu1 %v4899_v51  ;;  %2398 = vmatpush.msrb.mxu0 %v4900_v52  ;;  %v4953_v51 = vld [vmem:[%s6011_s8 + $0x1698] sm:$0xff]  ;;  %v4976_v52 = vld [vmem:[%s6011_s8 + $0x1750] sm:$0xff] }
 0x6de   : > { %2385 = vmatpush.msrb.mxu3 %v4917_v21  ;;  %2425 = vmatpush.msrb.mxu2 %v4918_v23  ;;  %v4939_v21 = vld [vmem:[%s6011_s8 + $0x1628] sm:$0xff]  ;;  %v4936_v23 = vld [vmem:[%s6011_s8 + $0x1610] sm:$0xff] }
 0x6df   : > { %2359 = vmatpush.msrb.mxu1 %v4897_v55  ;;  %2399 = vmatpush.msrb.mxu0 %v4898_v56  ;;  %v4950_v55 = vld [vmem:[%s6011_s8 + $0x1680] sm:$0xff]  ;;  %v4951_v56 = vld [vmem:[%s6011_s8 + $0x1688] sm:$0xff] }
 0x6e0   : > { %2386 = vmatpush.msrb.mxu3 %v4915_v25  ;;  %2426 = vmatpush.msrb.mxu2 %v4916_v27  ;;  %v4937_v25 = vld [vmem:[%s6011_s8 + $0x1618] sm:$0xff]  ;;  %v4934_v27 = vld [vmem:[%s6011_s8 + $0x1600] sm:$0xff] }
 0x6e1   : > { %2360 = vmatpush.msrb.mxu1 %v4895_v57  ;;  %2400 = vmatpush.msrb.mxu0 %v4896_v58  ;;  %v4975_v57 = vld [vmem:[%s6011_s8 + $0x1748] sm:$0xff]  ;;  %v4948_v58 = vld [vmem:[%s6011_s8 + $0x1670] sm:$0xff] }
 0x6e2   : > { %2387 = vmatpush.msrb.mxu3 %v4913_v29  ;;  %2427 = vmatpush.msrb.mxu2 %v4914_v31  ;;  %v4935_v29 = vld [vmem:[%s6011_s8 + $0x1608] sm:$0xff]  ;;  %v4932_v31 = vld [vmem:[%s6011_s8 + $0x15f0] sm:$0xff] }
 0x6e3   : > { %2361 = vmatpush.msrb.mxu1 %v4893_v59  ;;  %2401 = vmatpush.msrb.mxu0 %v4894_v60  ;;  %v4949_v59 = vld [vmem:[%s6011_s8 + $0x1678] sm:$0xff]  ;;  %v4946_v60 = vld [vmem:[%s6011_s8 + $0x1660] sm:$0xff] }
 0x6e4   : > { %2388 = vmatpush.msrb.mxu3 %v4911_v33  ;;  %2428 = vmatpush.msrb.mxu2 %v4912_v35  ;;  %v4933_v33 = vld [vmem:[%s6011_s8 + $0x15f8] sm:$0xff]  ;;  %v4930_v35 = vld [vmem:[%s6011_s8 + $0x15e0] sm:$0xff] }
 0x6e5   : > { %2362 = vmatpush.msrb.mxu1 %v4891_v61  ;;  %2402 = vmatpush.msrb.mxu0 %v4892_v62  ;;  %v4947_v61 = vld [vmem:[%s6011_s8 + $0x1668] sm:$0xff]  ;;  %v4944_v62 = vld [vmem:[%s6011_s8 + $0x1650] sm:$0xff] }
 0x6e6   : > { %2389 = vmatpush.msrb.mxu3 %v4909_v37  ;;  %2429 = vmatpush.msrb.mxu2 %v4910_v39  ;;  %v4931_v37 = vld [vmem:[%s6011_s8 + $0x15e8] sm:$0xff]  ;;  %v5013_v39 = vld [vmem:[%s6011_s8 + $0x1860] sm:$0xff] }
 0x6e7   : > { %2363 = vmatpush.msrb.mxu1 %v4889_v12  ;;  %2403 = vmatpush.msrb.mxu0 %v4890_v14 }
 0x6e9   : > { %2364 = vmatpush.msrb.mxu1 %v4887_v16  ;;  %2404 = vmatpush.msrb.mxu0 %v4888_v18  ;;  %v4972_v16 = vld [vmem:[%s6011_s8 + $0x1730] sm:$0xff]  ;;  %v4973_v18 = vld [vmem:[%s6011_s8 + $0x1738] sm:$0xff] }
 0x6eb   : > { %2365 = vmatpush.msrb.mxu1 %v4885_v20  ;;  %2405 = vmatpush.msrb.mxu0 %v4886_v22  ;;  %v4970_v20 = vld [vmem:[%s6011_s8 + $0x1720] sm:$0xff]  ;;  %v4971_v22 = vld [vmem:[%s6011_s8 + $0x1728] sm:$0xff] }
 0x6ed   : > { %2366 = vmatpush.msrb.mxu1 %v4883_v24  ;;  %2406 = vmatpush.msrb.mxu0 %v4884_v26  ;;  %v4968_v24 = vld [vmem:[%s6011_s8 + $0x1710] sm:$0xff]  ;;  %v4969_v26 = vld [vmem:[%s6011_s8 + $0x1718] sm:$0xff] }
 0x6ef   : > { %2367 = vmatpush.msrb.mxu1 %v4881_v28  ;;  %2407 = vmatpush.msrb.mxu0 %v4882_v30  ;;  %v4966_v28 = vld [vmem:[%s6011_s8 + $0x1700] sm:$0xff]  ;;  %v4967_v30 = vld [vmem:[%s6011_s8 + $0x1708] sm:$0xff] }
 0x6f1   : > { %2368 = vmatpush.msrb.mxu1 %v4879_v32  ;;  %2408 = vmatpush.msrb.mxu0 %v4880_v34  ;;  %v4964_v32 = vld [vmem:[%s6011_s8 + $0x16f0] sm:$0xff]  ;;  %v4965_v34 = vld [vmem:[%s6011_s8 + $0x16f8] sm:$0xff] }
 0x6f3   : > { %2369 = vmatpush.msrb.mxu1 %v4877_v36  ;;  %2409 = vmatpush.msrb.mxu0 %v4878_v38  ;;  %v4962_v36 = vld [vmem:[%s6011_s8 + $0x16e0] sm:$0xff]  ;;  %v4963_v38 = vld [vmem:[%s6011_s8 + $0x16e8] sm:$0xff] }
 0x750   : > { %v2085_v2 = vpop.f32.mrf.mxu1  ;;  %v2125_v3 = vpop.f32.mrf.mxu0 }
 0x751   : > { %v2086_v4 = vadd.f32 %v2085_v2, %v2061_v0  ;;  %v2126_v5 = vadd.f32 %v2125_v3, %v2062_v1  ;;  %v4942_v0 = vld [vmem:[%s6011_s8 + $0x1640] sm:$0xff]  ;;  %v4943_v1 = vld [vmem:[%s6011_s8 + $0x1648] sm:$0xff] }
 0x752   : > { %v4874_v2 = vld [vmem:[%s6026_s16 + $0x14] ss:$8 sm:$0x3] }
 0x753   : > { %v2204_v3 = vperm.slane %v4874_v2, 0 }
 0x757   : > { %v2105_v6 = vpop.f32.mrf.mxu3  ;;  %v2145_v7 = vpop.f32.mrf.mxu2 }
 0x758   : > { %v2106_v8 = vadd.f32 %v2105_v6, %v2086_v4  ;;  %v2146_v9 = vadd.f32 %v2145_v7, %v2126_v5  ;;  %v2205_v4 = vperm.slane %v4874_v2, 1 }
 0x75a   : > { %v2148_v10 = vmax.f32 %v2106_v8, 0.0  ;;  %v2149_v11 = vmax.f32 %v2146_v9, 0.0 }
 0x75c   : > { %2227 = vmatmul.f32.vlgmr.msra.gmra.mxu3 %v2148_v10  ;;  %4875 = vmatmul.msk.f32.vlgmr.msra.gmra.mxu1 %vm491_vm2, %v2149_v11 }
 0x75d   : > { %2267 = vmatmul.f32.vlgmr.msra.gmra.mxu2 %v2148_v10  ;;  %4876 = vmatmul.msk.f32.vlgmr.msra.gmra.mxu0 %vm491_vm2, %v2149_v11 }
 0x75e   : > { %2497 = vmatpush.msra.mxu3 %v4960_v40  ;;  %2537 = vmatpush.msra.mxu2 %v4961_v41  ;;  %v5014_v40 = vld [vmem:[%s6011_s8 + $0x1868] sm:$0xff]  ;;  %v5011_v41 = vld [vmem:[%s6011_s8 + $0x1850] sm:$0xff] }
 0x75f   : > { %2524 = vmatpush.msra.mxu1 %v4978_v48  ;;  %2564 = vmatpush.msra.mxu0 %v4979_v49  ;;  %v5032_v48 = vld [vmem:[%s6011_s8 + $0x18f8] sm:$0xff]  ;;  %v5005_v49 = vld [vmem:[%s6011_s8 + $0x1820] sm:$0xff] }
 0x760   : > { %2498 = vmatpush.msra.mxu3 %v4958_v42  ;;  %2538 = vmatpush.msra.mxu2 %v4959_v43  ;;  %v5012_v42 = vld [vmem:[%s6011_s8 + $0x1858] sm:$0xff]  ;;  %v5009_v43 = vld [vmem:[%s6011_s8 + $0x1840] sm:$0xff] }
 0x761   : > { %2525 = vmatpush.msra.mxu1 %v4976_v52  ;;  %2565 = vmatpush.msra.mxu0 %v4977_v53  ;;  %v5030_v52 = vld [vmem:[%s6011_s8 + $0x18e8] sm:$0xff]  ;;  %v5003_v53 = vld [vmem:[%s6011_s8 + $0x1810] sm:$0xff] }
 0x762   : > { %2499 = vmatpush.msra.mxu3 %v4956_v44  ;;  %2539 = vmatpush.msra.mxu2 %v4957_v45  ;;  %v5010_v44 = vld [vmem:[%s6011_s8 + $0x1848] sm:$0xff]  ;;  %v5007_v45 = vld [vmem:[%s6011_s8 + $0x1830] sm:$0xff] }
 0x763   : > { %2526 = vmatpush.msra.mxu1 %v4974_v54  ;;  %2566 = vmatpush.msra.mxu0 %v4975_v57  ;;  %v5004_v54 = vld [vmem:[%s6011_s8 + $0x1818] sm:$0xff]  ;;  %v4999_v57 = vld [vmem:[%s6011_s8 + $0x17f0] sm:$0xff] }
 0x764   : > { %2500 = vmatpush.msra.mxu3 %v4954_v46  ;;  %2540 = vmatpush.msra.mxu2 %v4955_v47  ;;  %v5008_v46 = vld [vmem:[%s6011_s8 + $0x1838] sm:$0xff]  ;;  %v5031_v47 = vld [vmem:[%s6011_s8 + $0x18f0] sm:$0xff] }
 0x765   : > { %2527 = vmatpush.msra.mxu1 %v4972_v16  ;;  %2567 = vmatpush.msra.mxu0 %v4973_v18  ;;  %v4994_v16 = vld [vmem:[%s6011_s8 + $0x17c8] sm:$0xff]  ;;  %v4991_v18 = vld [vmem:[%s6011_s8 + $0x17b0] sm:$0xff] }
 0x766   : > { %2501 = vmatpush.msra.mxu3 %v4952_v50  ;;  %2541 = vmatpush.msra.mxu2 %v4953_v51  ;;  %v5006_v50 = vld [vmem:[%s6011_s8 + $0x1828] sm:$0xff]  ;;  %v5029_v51 = vld [vmem:[%s6011_s8 + $0x18e0] sm:$0xff] }
 0x767   : > { %2528 = vmatpush.msra.mxu1 %v4970_v20  ;;  %2568 = vmatpush.msra.mxu0 %v4971_v22  ;;  %v4992_v20 = vld [vmem:[%s6011_s8 + $0x17b8] sm:$0xff]  ;;  %v4989_v22 = vld [vmem:[%s6011_s8 + $0x17a0] sm:$0xff] }
 0x768   : > { %2502 = vmatpush.msra.mxu3 %v4950_v55  ;;  %2542 = vmatpush.msra.mxu2 %v4951_v56  ;;  %v5001_v55 = vld [vmem:[%s6011_s8 + $0x1800] sm:$0xff]  ;;  %v5002_v56 = vld [vmem:[%s6011_s8 + $0x1808] sm:$0xff] }
 0x769   : > { %2529 = vmatpush.msra.mxu1 %v4968_v24  ;;  %2569 = vmatpush.msra.mxu0 %v4969_v26  ;;  %v4990_v24 = vld [vmem:[%s6011_s8 + $0x17a8] sm:$0xff]  ;;  %v4987_v26 = vld [vmem:[%s6011_s8 + $0x1790] sm:$0xff] }
 0x76a   : > { %2503 = vmatpush.msra.mxu3 %v4948_v58  ;;  %2543 = vmatpush.msra.mxu2 %v4949_v59  ;;  %v5000_v58 = vld [vmem:[%s6011_s8 + $0x17f8] sm:$0xff]  ;;  %v4997_v59 = vld [vmem:[%s6011_s8 + $0x17e0] sm:$0xff] }
 0x76b   : > { %2530 = vmatpush.msra.mxu1 %v4966_v28  ;;  %2570 = vmatpush.msra.mxu0 %v4967_v30  ;;  %v4988_v28 = vld [vmem:[%s6011_s8 + $0x1798] sm:$0xff]  ;;  %v4985_v30 = vld [vmem:[%s6011_s8 + $0x1780] sm:$0xff] }
 0x76c   : > { %2504 = vmatpush.msra.mxu3 %v4946_v60  ;;  %2544 = vmatpush.msra.mxu2 %v4947_v61  ;;  %v4998_v60 = vld [vmem:[%s6011_s8 + $0x17e8] sm:$0xff] }
 0x76d   : > { %2531 = vmatpush.msra.mxu1 %v4964_v32  ;;  %2571 = vmatpush.msra.mxu0 %v4965_v34  ;;  %v4927_v61 = vld [vmem:[%s6026_s16 + $0x15] ss:$8 sm:$0x3] }
 0x76e   : > { %2505 = vmatpush.msra.mxu3 %v4944_v62  ;;  %2545 = vmatpush.msra.mxu2 %v4945_v63  ;;  %v2347_v62 = vperm.slane %v4927_v61, 0  ;;  %v2348_v63 = vperm.slane %v4927_v61, 1  ;;  %v4986_v32 = vld [vmem:[%s6011_s8 + $0x1788] sm:$0xff]  ;;  %v4983_v34 = vld [vmem:[%s6011_s8 + $0x1770] sm:$0xff]  ;;  %v5051_v61 = vld [vmem:[%s6011_s8 + $0x1978] sm:$0xff] }
 0x76f   : > { %2532 = vmatpush.msra.mxu1 %v4962_v36  ;;  %2572 = vmatpush.msra.mxu0 %v4963_v38  ;;  %v4984_v36 = vld [vmem:[%s6011_s8 + $0x1778] sm:$0xff]  ;;  %v5066_v38 = vld [vmem:[%s6011_s8 + $0x19f0] sm:$0xff] }
 0x770   : > { %2506 = vmatpush.msra.mxu3 %v4942_v0  ;;  %2546 = vmatpush.msra.mxu2 %v4943_v1 }
 0x772   : > { %2507 = vmatpush.msra.mxu3 %v4940_v15  ;;  %2547 = vmatpush.msra.mxu2 %v4941_v17  ;;  %v5025_v15 = vld [vmem:[%s6011_s8 + $0x18c0] sm:$0xff]  ;;  %v5026_v17 = vld [vmem:[%s6011_s8 + $0x18c8] sm:$0xff] }
 0x774   : > { %2508 = vmatpush.msra.mxu3 %v4938_v19  ;;  %2548 = vmatpush.msra.mxu2 %v4939_v21  ;;  %v5023_v19 = vld [vmem:[%s6011_s8 + $0x18b0] sm:$0xff]  ;;  %v5024_v21 = vld [vmem:[%s6011_s8 + $0x18b8] sm:$0xff] }
 0x776   : > { %2509 = vmatpush.msra.mxu3 %v4936_v23  ;;  %2549 = vmatpush.msra.mxu2 %v4937_v25  ;;  %v5021_v23 = vld [vmem:[%s6011_s8 + $0x18a0] sm:$0xff]  ;;  %v5022_v25 = vld [vmem:[%s6011_s8 + $0x18a8] sm:$0xff] }
 0x778   : > { %2510 = vmatpush.msra.mxu3 %v4934_v27  ;;  %2550 = vmatpush.msra.mxu2 %v4935_v29  ;;  %v5019_v27 = vld [vmem:[%s6011_s8 + $0x1890] sm:$0xff]  ;;  %v5020_v29 = vld [vmem:[%s6011_s8 + $0x1898] sm:$0xff] }
 0x77a   : > { %2511 = vmatpush.msra.mxu3 %v4932_v31  ;;  %2551 = vmatpush.msra.mxu2 %v4933_v33  ;;  %v5017_v31 = vld [vmem:[%s6011_s8 + $0x1880] sm:$0xff]  ;;  %v5018_v33 = vld [vmem:[%s6011_s8 + $0x1888] sm:$0xff] }
 0x77c   : > { %2512 = vmatpush.msra.mxu3 %v4930_v35  ;;  %2552 = vmatpush.msra.mxu2 %v4931_v37  ;;  %v5015_v35 = vld [vmem:[%s6011_s8 + $0x1870] sm:$0xff]  ;;  %v5016_v37 = vld [vmem:[%s6011_s8 + $0x1878] sm:$0xff] }
 0x7d9   : > { %v2248_v8 = vpop.f32.mrf.mxu1 }
 0x7da   : > { %v2288_v10 = vpop.f32.mrf.mxu0 }
 0x7df   : > { %v2228_v5 = vpop.f32.mrf.mxu3 }
 0x7e0   : > { %v2229_v6 = vadd.f32 %v2228_v5, %v2204_v3  ;;  %v2268_v7 = vpop.f32.mrf.mxu2 }
 0x7e1   : > { %v2269_v9 = vadd.f32 %v2268_v7, %v2205_v4 }
 0x7e2   : > { %v2249_v11 = vadd.f32 %v2248_v8, %v2229_v6 }
 0x7e3   : > { %v2289_v12 = vadd.f32 %v2288_v10, %v2269_v9  ;;  %v4995_v10 = vld [vmem:[%s6011_s8 + $0x17d0] sm:$0xff] }
 0x7e4   : > { %v2291_v13 = vmax.f32 %v2249_v11, 0.0  ;;  %v5027_v11 = vld [vmem:[%s6011_s8 + $0x18d0] sm:$0xff] }
 0x7e5   : > { %v2292_v14 = vmax.f32 %v2289_v12, 0.0  ;;  %v4996_v12 = vld [vmem:[%s6011_s8 + $0x17d8] sm:$0xff] }
 0x7e6   : > { %2370 = vmatmul.f32.vlgmr.msrb.gmra.mxu1 %v2291_v13  ;;  %2410 = vmatmul.f32.vlgmr.msrb.gmra.mxu0 %v2291_v13  ;;  %v5028_v13 = vld [vmem:[%s6011_s8 + $0x18d8] sm:$0xff] }
 0x7e7   : > { %4928 = vmatmul.msk.f32.vlgmr.msrb.gmra.mxu3 %vm491_vm2, %v2292_v14  ;;  %4929 = vmatmul.msk.f32.vlgmr.msrb.gmra.mxu2 %vm491_vm2, %v2292_v14  ;;  %v4993_v14 = vld [vmem:[%s6011_s8 + $0x17c0] sm:$0xff] }
 0x7e8   : > { %2640 = vmatpush.msrb.mxu1 %v5013_v39  ;;  %2680 = vmatpush.msrb.mxu0 %v5014_v40  ;;  %v5067_v39 = vld [vmem:[%s6011_s8 + $0x19f8] sm:$0xff]  ;;  %v5064_v40 = vld [vmem:[%s6011_s8 + $0x19e0] sm:$0xff] }
 0x7e9   : > { %2667 = vmatpush.msrb.mxu3 %v5031_v47  ;;  %2707 = vmatpush.msrb.mxu2 %v5032_v48  ;;  %v5085_v47 = vld [vmem:[%s6011_s8 + $0x1a88] sm:$0xff]  ;;  %v5058_v48 = vld [vmem:[%s6011_s8 + $0x19b0] sm:$0xff] }
 0x7ea   : > { %2641 = vmatpush.msrb.mxu1 %v5011_v41  ;;  %2681 = vmatpush.msrb.mxu0 %v5012_v42  ;;  %v5065_v41 = vld [vmem:[%s6011_s8 + $0x19e8] sm:$0xff]  ;;  %v5062_v42 = vld [vmem:[%s6011_s8 + $0x19d0] sm:$0xff] }
 0x7eb   : > { %2668 = vmatpush.msrb.mxu3 %v5029_v51  ;;  %2708 = vmatpush.msrb.mxu2 %v5030_v52  ;;  %v5083_v51 = vld [vmem:[%s6011_s8 + $0x1a78] sm:$0xff]  ;;  %v5080_v52 = vld [vmem:[%s6011_s8 + $0x1a60] sm:$0xff] }
 0x7ec   : > { %2642 = vmatpush.msrb.mxu1 %v5009_v43  ;;  %2682 = vmatpush.msrb.mxu0 %v5010_v44  ;;  %v5063_v43 = vld [vmem:[%s6011_s8 + $0x19d8] sm:$0xff]  ;;  %v5060_v44 = vld [vmem:[%s6011_s8 + $0x19c0] sm:$0xff] }
 0x7ed   : > { %2669 = vmatpush.msrb.mxu3 %v5027_v11  ;;  %2709 = vmatpush.msrb.mxu2 %v5028_v13  ;;  %v5046_v13 = vld [vmem:[%s6011_s8 + $0x1950] sm:$0xff] }
 0x7ee   : > { %2643 = vmatpush.msrb.mxu1 %v5007_v45  ;;  %2683 = vmatpush.msrb.mxu0 %v5008_v46  ;;  %v5061_v45 = vld [vmem:[%s6011_s8 + $0x19c8] sm:$0xff]  ;;  %v5084_v46 = vld [vmem:[%s6011_s8 + $0x1a80] sm:$0xff] }
 0x7ef   : > { %2670 = vmatpush.msrb.mxu3 %v5025_v15  ;;  %2710 = vmatpush.msrb.mxu2 %v5026_v17  ;;  %v5047_v15 = vld [vmem:[%s6011_s8 + $0x1958] sm:$0xff]  ;;  %v5044_v17 = vld [vmem:[%s6011_s8 + $0x1940] sm:$0xff] }
 0x7f0   : > { %2644 = vmatpush.msrb.mxu1 %v5005_v49  ;;  %2684 = vmatpush.msrb.mxu0 %v5006_v50  ;;  %v5059_v49 = vld [vmem:[%s6011_s8 + $0x19b8] sm:$0xff]  ;;  %v5082_v50 = vld [vmem:[%s6011_s8 + $0x1a70] sm:$0xff] }
 0x7f1   : > { %2671 = vmatpush.msrb.mxu3 %v5023_v19  ;;  %2711 = vmatpush.msrb.mxu2 %v5024_v21  ;;  %v5045_v19 = vld [vmem:[%s6011_s8 + $0x1948] sm:$0xff]  ;;  %v5042_v21 = vld [vmem:[%s6011_s8 + $0x1930] sm:$0xff] }
 0x7f2   : > { %2645 = vmatpush.msrb.mxu1 %v5003_v53  ;;  %2685 = vmatpush.msrb.mxu0 %v5004_v54  ;;  %v5056_v53 = vld [vmem:[%s6011_s8 + $0x19a0] sm:$0xff]  ;;  %v5057_v54 = vld [vmem:[%s6011_s8 + $0x19a8] sm:$0xff] }
 0x7f3   : > { %2672 = vmatpush.msrb.mxu3 %v5021_v23  ;;  %2712 = vmatpush.msrb.mxu2 %v5022_v25  ;;  %v5043_v23 = vld [vmem:[%s6011_s8 + $0x1938] sm:$0xff]  ;;  %v5040_v25 = vld [vmem:[%s6011_s8 + $0x1920] sm:$0xff] }
 0x7f4   : > { %2646 = vmatpush.msrb.mxu1 %v5001_v55  ;;  %2686 = vmatpush.msrb.mxu0 %v5002_v56  ;;  %v5081_v55 = vld [vmem:[%s6011_s8 + $0x1a68] sm:$0xff]  ;;  %v5054_v56 = vld [vmem:[%s6011_s8 + $0x1990] sm:$0xff] }
 0x7f5   : > { %2673 = vmatpush.msrb.mxu3 %v5019_v27  ;;  %2713 = vmatpush.msrb.mxu2 %v5020_v29  ;;  %v5041_v27 = vld [vmem:[%s6011_s8 + $0x1928] sm:$0xff]  ;;  %v5038_v29 = vld [vmem:[%s6011_s8 + $0x1910] sm:$0xff] }
 0x7f6   : > { %2647 = vmatpush.msrb.mxu1 %v4999_v57  ;;  %2687 = vmatpush.msrb.mxu0 %v5000_v58  ;;  %v5055_v57 = vld [vmem:[%s6011_s8 + $0x1998] sm:$0xff]  ;;  %v5052_v58 = vld [vmem:[%s6011_s8 + $0x1980] sm:$0xff] }
 0x7f7   : > { %2674 = vmatpush.msrb.mxu3 %v5017_v31  ;;  %2714 = vmatpush.msrb.mxu2 %v5018_v33  ;;  %v5039_v31 = vld [vmem:[%s6011_s8 + $0x1918] sm:$0xff]  ;;  %v5036_v33 = vld [vmem:[%s6011_s8 + $0x1900] sm:$0xff] }
 0x7f8   : > { %2648 = vmatpush.msrb.mxu1 %v4997_v59  ;;  %2688 = vmatpush.msrb.mxu0 %v4998_v60  ;;  %v5053_v59 = vld [vmem:[%s6011_s8 + $0x1988] sm:$0xff]  ;;  %v5050_v60 = vld [vmem:[%s6011_s8 + $0x1970] sm:$0xff] }
 0x7f9   : > { %2675 = vmatpush.msrb.mxu3 %v5015_v35  ;;  %2715 = vmatpush.msrb.mxu2 %v5016_v37  ;;  %v5037_v35 = vld [vmem:[%s6011_s8 + $0x1908] sm:$0xff]  ;;  %v5119_v37 = vld [vmem:[%s6011_s8 + $0x1b80] sm:$0xff] }
 0x7fa   : > { %2649 = vmatpush.msrb.mxu1 %v4995_v10  ;;  %2689 = vmatpush.msrb.mxu0 %v4996_v12 }
 0x7fc   : > { %2650 = vmatpush.msrb.mxu1 %v4993_v14  ;;  %2690 = vmatpush.msrb.mxu0 %v4994_v16  ;;  %v5078_v14 = vld [vmem:[%s6011_s8 + $0x1a50] sm:$0xff]  ;;  %v5079_v16 = vld [vmem:[%s6011_s8 + $0x1a58] sm:$0xff] }
 0x7fe   : > { %2651 = vmatpush.msrb.mxu1 %v4991_v18  ;;  %2691 = vmatpush.msrb.mxu0 %v4992_v20  ;;  %v5076_v18 = vld [vmem:[%s6011_s8 + $0x1a40] sm:$0xff]  ;;  %v5077_v20 = vld [vmem:[%s6011_s8 + $0x1a48] sm:$0xff] }
 0x800   : > { %2652 = vmatpush.msrb.mxu1 %v4989_v22  ;;  %2692 = vmatpush.msrb.mxu0 %v4990_v24  ;;  %v5074_v22 = vld [vmem:[%s6011_s8 + $0x1a30] sm:$0xff]  ;;  %v5075_v24 = vld [vmem:[%s6011_s8 + $0x1a38] sm:$0xff] }
 0x802   : > { %2653 = vmatpush.msrb.mxu1 %v4987_v26  ;;  %2693 = vmatpush.msrb.mxu0 %v4988_v28  ;;  %v5072_v26 = vld [vmem:[%s6011_s8 + $0x1a20] sm:$0xff]  ;;  %v5073_v28 = vld [vmem:[%s6011_s8 + $0x1a28] sm:$0xff] }
 0x804   : > { %2654 = vmatpush.msrb.mxu1 %v4985_v30  ;;  %2694 = vmatpush.msrb.mxu0 %v4986_v32  ;;  %v5070_v30 = vld [vmem:[%s6011_s8 + $0x1a10] sm:$0xff]  ;;  %v5071_v32 = vld [vmem:[%s6011_s8 + $0x1a18] sm:$0xff] }
 0x806   : > { %2655 = vmatpush.msrb.mxu1 %v4983_v34  ;;  %2695 = vmatpush.msrb.mxu0 %v4984_v36  ;;  %v5068_v34 = vld [vmem:[%s6011_s8 + $0x1a00] sm:$0xff]  ;;  %v5069_v36 = vld [vmem:[%s6011_s8 + $0x1a08] sm:$0xff] }
 0x863   : > { %v2371_v0 = vpop.f32.mrf.mxu1  ;;  %v2411_v1 = vpop.f32.mrf.mxu0 }
 0x864   : > { %v2372_v2 = vadd.f32 %v2371_v0, %v2347_v62  ;;  %v2412_v3 = vadd.f32 %v2411_v1, %v2348_v63  ;;  %v5048_v62 = vld [vmem:[%s6011_s8 + $0x1960] sm:$0xff]  ;;  %v5049_v63 = vld [vmem:[%s6011_s8 + $0x1968] sm:$0xff] }
 0x865   : > { %v4980_v0 = vld [vmem:[%s6026_s16 + $0x16] ss:$8 sm:$0x3] }
 0x866   : > { %v2490_v1 = vperm.slane %v4980_v0, 0 }
 0x86a   : > { %v2391_v4 = vpop.f32.mrf.mxu3  ;;  %v2431_v5 = vpop.f32.mrf.mxu2 }
 0x86b   : > { %v2392_v6 = vadd.f32 %v2391_v4, %v2372_v2  ;;  %v2432_v7 = vadd.f32 %v2431_v5, %v2412_v3  ;;  %v2491_v2 = vperm.slane %v4980_v0, 1 }
 0x86d   : > { %v2434_v8 = vmax.f32 %v2392_v6, 0.0  ;;  %v2435_v9 = vmax.f32 %v2432_v7, 0.0 }
 0x86f   : > { %2513 = vmatmul.f32.vlgmr.msra.gmra.mxu3 %v2434_v8  ;;  %4981 = vmatmul.msk.f32.vlgmr.msra.gmra.mxu1 %vm491_vm2, %v2435_v9 }
 0x870   : > { %2553 = vmatmul.f32.vlgmr.msra.gmra.mxu2 %v2434_v8  ;;  %4982 = vmatmul.msk.f32.vlgmr.msra.gmra.mxu0 %vm491_vm2, %v2435_v9 }
 0x871   : > { %2783 = vmatpush.msra.mxu3 %v5066_v38  ;;  %2823 = vmatpush.msra.mxu2 %v5067_v39  ;;  %v5120_v38 = vld [vmem:[%s6011_s8 + $0x1b88] sm:$0xff]  ;;  %v5117_v39 = vld [vmem:[%s6011_s8 + $0x1b70] sm:$0xff] }
 0x872   : > { %2810 = vmatpush.msra.mxu1 %v5084_v46  ;;  %2850 = vmatpush.msra.mxu0 %v5085_v47  ;;  %v5138_v46 = vld [vmem:[%s6011_s8 + $0x1c18] sm:$0xff]  ;;  %v5111_v47 = vld [vmem:[%s6011_s8 + $0x1b40] sm:$0xff] }
 0x873   : > { %2784 = vmatpush.msra.mxu3 %v5064_v40  ;;  %2824 = vmatpush.msra.mxu2 %v5065_v41  ;;  %v5118_v40 = vld [vmem:[%s6011_s8 + $0x1b78] sm:$0xff]  ;;  %v5115_v41 = vld [vmem:[%s6011_s8 + $0x1b60] sm:$0xff] }
 0x874   : > { %2811 = vmatpush.msra.mxu1 %v5082_v50  ;;  %2851 = vmatpush.msra.mxu0 %v5083_v51  ;;  %v5136_v50 = vld [vmem:[%s6011_s8 + $0x1c08] sm:$0xff]  ;;  %v5109_v51 = vld [vmem:[%s6011_s8 + $0x1b30] sm:$0xff] }
 0x875   : > { %2785 = vmatpush.msra.mxu3 %v5062_v42  ;;  %2825 = vmatpush.msra.mxu2 %v5063_v43  ;;  %v5116_v42 = vld [vmem:[%s6011_s8 + $0x1b68] sm:$0xff]  ;;  %v5113_v43 = vld [vmem:[%s6011_s8 + $0x1b50] sm:$0xff] }
 0x876   : > { %2812 = vmatpush.msra.mxu1 %v5080_v52  ;;  %2852 = vmatpush.msra.mxu0 %v5081_v55  ;;  %v5110_v52 = vld [vmem:[%s6011_s8 + $0x1b38] sm:$0xff]  ;;  %v5105_v55 = vld [vmem:[%s6011_s8 + $0x1b10] sm:$0xff] }
 0x877   : > { %2786 = vmatpush.msra.mxu3 %v5060_v44  ;;  %2826 = vmatpush.msra.mxu2 %v5061_v45  ;;  %v5114_v44 = vld [vmem:[%s6011_s8 + $0x1b58] sm:$0xff]  ;;  %v5137_v45 = vld [vmem:[%s6011_s8 + $0x1c10] sm:$0xff] }
 0x878   : > { %2813 = vmatpush.msra.mxu1 %v5078_v14  ;;  %2853 = vmatpush.msra.mxu0 %v5079_v16  ;;  %v5100_v14 = vld [vmem:[%s6011_s8 + $0x1ae8] sm:$0xff]  ;;  %v5097_v16 = vld [vmem:[%s6011_s8 + $0x1ad0] sm:$0xff] }
 0x879   : > { %2787 = vmatpush.msra.mxu3 %v5058_v48  ;;  %2827 = vmatpush.msra.mxu2 %v5059_v49  ;;  %v5112_v48 = vld [vmem:[%s6011_s8 + $0x1b48] sm:$0xff]  ;;  %v5135_v49 = vld [vmem:[%s6011_s8 + $0x1c00] sm:$0xff] }
 0x87a   : > { %2814 = vmatpush.msra.mxu1 %v5076_v18  ;;  %2854 = vmatpush.msra.mxu0 %v5077_v20  ;;  %v5098_v18 = vld [vmem:[%s6011_s8 + $0x1ad8] sm:$0xff]  ;;  %v5095_v20 = vld [vmem:[%s6011_s8 + $0x1ac0] sm:$0xff] }
 0x87b   : > { %2788 = vmatpush.msra.mxu3 %v5056_v53  ;;  %2828 = vmatpush.msra.mxu2 %v5057_v54  ;;  %v5107_v53 = vld [vmem:[%s6011_s8 + $0x1b20] sm:$0xff]  ;;  %v5108_v54 = vld [vmem:[%s6011_s8 + $0x1b28] sm:$0xff] }
 0x87c   : > { %2815 = vmatpush.msra.mxu1 %v5074_v22  ;;  %2855 = vmatpush.msra.mxu0 %v5075_v24  ;;  %v5096_v22 = vld [vmem:[%s6011_s8 + $0x1ac8] sm:$0xff]  ;;  %v5093_v24 = vld [vmem:[%s6011_s8 + $0x1ab0] sm:$0xff] }
 0x87d   : > { %2789 = vmatpush.msra.mxu3 %v5054_v56  ;;  %2829 = vmatpush.msra.mxu2 %v5055_v57  ;;  %v5106_v56 = vld [vmem:[%s6011_s8 + $0x1b18] sm:$0xff]  ;;  %v5103_v57 = vld [vmem:[%s6011_s8 + $0x1b00] sm:$0xff] }
 0x87e   : > { %2816 = vmatpush.msra.mxu1 %v5072_v26  ;;  %2856 = vmatpush.msra.mxu0 %v5073_v28  ;;  %v5094_v26 = vld [vmem:[%s6011_s8 + $0x1ab8] sm:$0xff]  ;;  %v5091_v28 = vld [vmem:[%s6011_s8 + $0x1aa0] sm:$0xff] }
 0x87f   : > { %2790 = vmatpush.msra.mxu3 %v5052_v58  ;;  %2830 = vmatpush.msra.mxu2 %v5053_v59  ;;  %v5104_v58 = vld [vmem:[%s6011_s8 + $0x1b08] sm:$0xff] }
 0x880   : > { %2817 = vmatpush.msra.mxu1 %v5070_v30  ;;  %2857 = vmatpush.msra.mxu0 %v5071_v32  ;;  %v5033_v59 = vld [vmem:[%s6026_s16 + $0x17] ss:$8 sm:$0x3] }
 0x881   : > { %2791 = vmatpush.msra.mxu3 %v5050_v60  ;;  %2831 = vmatpush.msra.mxu2 %v5051_v61  ;;  %v2633_v60 = vperm.slane %v5033_v59, 0  ;;  %v2634_v61 = vperm.slane %v5033_v59, 1  ;;  %v5092_v30 = vld [vmem:[%s6011_s8 + $0x1aa8] sm:$0xff]  ;;  %v5089_v32 = vld [vmem:[%s6011_s8 + $0x1a90] sm:$0xff]  ;;  %v5157_v59 = vld [vmem:[%s6011_s8 + $0x1c98] sm:$0xff] }
 0x882   : > { %2818 = vmatpush.msra.mxu1 %v5068_v34  ;;  %2858 = vmatpush.msra.mxu0 %v5069_v36  ;;  %v5090_v34 = vld [vmem:[%s6011_s8 + $0x1a98] sm:$0xff]  ;;  %v5172_v36 = vld [vmem:[%s6011_s8 + $0x1d10] sm:$0xff] }
 0x883   : > { %2792 = vmatpush.msra.mxu3 %v5048_v62  ;;  %2832 = vmatpush.msra.mxu2 %v5049_v63 }
 0x885   : > { %2793 = vmatpush.msra.mxu3 %v5046_v13  ;;  %2833 = vmatpush.msra.mxu2 %v5047_v15  ;;  %v5131_v13 = vld [vmem:[%s6011_s8 + $0x1be0] sm:$0xff]  ;;  %v5132_v15 = vld [vmem:[%s6011_s8 + $0x1be8] sm:$0xff] }
 0x887   : > { %2794 = vmatpush.msra.mxu3 %v5044_v17  ;;  %2834 = vmatpush.msra.mxu2 %v5045_v19  ;;  %v5129_v17 = vld [vmem:[%s6011_s8 + $0x1bd0] sm:$0xff]  ;;  %v5130_v19 = vld [vmem:[%s6011_s8 + $0x1bd8] sm:$0xff] }
 0x889   : > { %2795 = vmatpush.msra.mxu3 %v5042_v21  ;;  %2835 = vmatpush.msra.mxu2 %v5043_v23  ;;  %v5127_v21 = vld [vmem:[%s6011_s8 + $0x1bc0] sm:$0xff]  ;;  %v5128_v23 = vld [vmem:[%s6011_s8 + $0x1bc8] sm:$0xff] }
 0x88b   : > { %2796 = vmatpush.msra.mxu3 %v5040_v25  ;;  %2836 = vmatpush.msra.mxu2 %v5041_v27  ;;  %v5125_v25 = vld [vmem:[%s6011_s8 + $0x1bb0] sm:$0xff]  ;;  %v5126_v27 = vld [vmem:[%s6011_s8 + $0x1bb8] sm:$0xff] }
 0x88d   : > { %2797 = vmatpush.msra.mxu3 %v5038_v29  ;;  %2837 = vmatpush.msra.mxu2 %v5039_v31  ;;  %v5123_v29 = vld [vmem:[%s6011_s8 + $0x1ba0] sm:$0xff]  ;;  %v5124_v31 = vld [vmem:[%s6011_s8 + $0x1ba8] sm:$0xff] }
 0x88f   : > { %2798 = vmatpush.msra.mxu3 %v5036_v33  ;;  %2838 = vmatpush.msra.mxu2 %v5037_v35  ;;  %v5121_v33 = vld [vmem:[%s6011_s8 + $0x1b90] sm:$0xff]  ;;  %v5122_v35 = vld [vmem:[%s6011_s8 + $0x1b98] sm:$0xff] }
 0x8ec   : > { %v2534_v6 = vpop.f32.mrf.mxu1 }
 0x8ed   : > { %v2574_v8 = vpop.f32.mrf.mxu0 }
 0x8f2   : > { %v2514_v3 = vpop.f32.mrf.mxu3 }
 0x8f3   : > { %v2515_v4 = vadd.f32 %v2514_v3, %v2490_v1  ;;  %v2554_v5 = vpop.f32.mrf.mxu2 }
 0x8f4   : > { %v2555_v7 = vadd.f32 %v2554_v5, %v2491_v2 }
 0x8f5   : > { %v2535_v9 = vadd.f32 %v2534_v6, %v2515_v4 }
 0x8f6   : > { %v2575_v10 = vadd.f32 %v2574_v8, %v2555_v7  ;;  %v5101_v8 = vld [vmem:[%s6011_s8 + $0x1af0] sm:$0xff] }
 0x8f7   : > { %v2577_v11 = vmax.f32 %v2535_v9, 0.0  ;;  %v5133_v9 = vld [vmem:[%s6011_s8 + $0x1bf0] sm:$0xff] }
 0x8f8   : > { %v2578_v12 = vmax.f32 %v2575_v10, 0.0  ;;  %v5102_v10 = vld [vmem:[%s6011_s8 + $0x1af8] sm:$0xff] }
 0x8f9   : > { %2656 = vmatmul.f32.vlgmr.msrb.gmra.mxu1 %v2577_v11  ;;  %2696 = vmatmul.f32.vlgmr.msrb.gmra.mxu0 %v2577_v11  ;;  %v5134_v11 = vld [vmem:[%s6011_s8 + $0x1bf8] sm:$0xff] }
 0x8fa   : > { %5034 = vmatmul.msk.f32.vlgmr.msrb.gmra.mxu3 %vm491_vm2, %v2578_v12  ;;  %5035 = vmatmul.msk.f32.vlgmr.msrb.gmra.mxu2 %vm491_vm2, %v2578_v12  ;;  %v5099_v12 = vld [vmem:[%s6011_s8 + $0x1ae0] sm:$0xff] }
 0x8fb   : > { %2926 = vmatpush.msrb.mxu1 %v5119_v37  ;;  %2966 = vmatpush.msrb.mxu0 %v5120_v38  ;;  %v5173_v37 = vld [vmem:[%s6011_s8 + $0x1d18] sm:$0xff]  ;;  %v5170_v38 = vld [vmem:[%s6011_s8 + $0x1d00] sm:$0xff] }
 0x8fc   : > { %2953 = vmatpush.msrb.mxu3 %v5137_v45  ;;  %2993 = vmatpush.msrb.mxu2 %v5138_v46  ;;  %v5191_v45 = vld [vmem:[%s6011_s8 + $0x1da8] sm:$0xff]  ;;  %v5164_v46 = vld [vmem:[%s6011_s8 + $0x1cd0] sm:$0xff] }
 0x8fd   : > { %2927 = vmatpush.msrb.mxu1 %v5117_v39  ;;  %2967 = vmatpush.msrb.mxu0 %v5118_v40  ;;  %v5171_v39 = vld [vmem:[%s6011_s8 + $0x1d08] sm:$0xff]  ;;  %v5168_v40 = vld [vmem:[%s6011_s8 + $0x1cf0] sm:$0xff] }
 0x8fe   : > { %2954 = vmatpush.msrb.mxu3 %v5135_v49  ;;  %2994 = vmatpush.msrb.mxu2 %v5136_v50  ;;  %v5189_v49 = vld [vmem:[%s6011_s8 + $0x1d98] sm:$0xff]  ;;  %v5186_v50 = vld [vmem:[%s6011_s8 + $0x1d80] sm:$0xff] }
 0x8ff   : > { %2928 = vmatpush.msrb.mxu1 %v5115_v41  ;;  %2968 = vmatpush.msrb.mxu0 %v5116_v42  ;;  %v5169_v41 = vld [vmem:[%s6011_s8 + $0x1cf8] sm:$0xff]  ;;  %v5166_v42 = vld [vmem:[%s6011_s8 + $0x1ce0] sm:$0xff] }
 0x900   : > { %2955 = vmatpush.msrb.mxu3 %v5133_v9  ;;  %2995 = vmatpush.msrb.mxu2 %v5134_v11  ;;  %v5152_v11 = vld [vmem:[%s6011_s8 + $0x1c70] sm:$0xff] }
 0x901   : > { %2929 = vmatpush.msrb.mxu1 %v5113_v43  ;;  %2969 = vmatpush.msrb.mxu0 %v5114_v44  ;;  %v5167_v43 = vld [vmem:[%s6011_s8 + $0x1ce8] sm:$0xff]  ;;  %v5190_v44 = vld [vmem:[%s6011_s8 + $0x1da0] sm:$0xff] }
 0x902   : > { %2956 = vmatpush.msrb.mxu3 %v5131_v13  ;;  %2996 = vmatpush.msrb.mxu2 %v5132_v15  ;;  %v5153_v13 = vld [vmem:[%s6011_s8 + $0x1c78] sm:$0xff]  ;;  %v5150_v15 = vld [vmem:[%s6011_s8 + $0x1c60] sm:$0xff] }
 0x903   : > { %2930 = vmatpush.msrb.mxu1 %v5111_v47  ;;  %2970 = vmatpush.msrb.mxu0 %v5112_v48  ;;  %v5165_v47 = vld [vmem:[%s6011_s8 + $0x1cd8] sm:$0xff]  ;;  %v5188_v48 = vld [vmem:[%s6011_s8 + $0x1d90] sm:$0xff] }
 0x904   : > { %2957 = vmatpush.msrb.mxu3 %v5129_v17  ;;  %2997 = vmatpush.msrb.mxu2 %v5130_v19  ;;  %v5151_v17 = vld [vmem:[%s6011_s8 + $0x1c68] sm:$0xff]  ;;  %v5148_v19 = vld [vmem:[%s6011_s8 + $0x1c50] sm:$0xff] }
 0x905   : > { %2931 = vmatpush.msrb.mxu1 %v5109_v51  ;;  %2971 = vmatpush.msrb.mxu0 %v5110_v52  ;;  %v5162_v51 = vld [vmem:[%s6011_s8 + $0x1cc0] sm:$0xff]  ;;  %v5163_v52 = vld [vmem:[%s6011_s8 + $0x1cc8] sm:$0xff] }
 0x906   : > { %2958 = vmatpush.msrb.mxu3 %v5127_v21  ;;  %2998 = vmatpush.msrb.mxu2 %v5128_v23  ;;  %v5149_v21 = vld [vmem:[%s6011_s8 + $0x1c58] sm:$0xff]  ;;  %v5146_v23 = vld [vmem:[%s6011_s8 + $0x1c40] sm:$0xff] }
 0x907   : > { %2932 = vmatpush.msrb.mxu1 %v5107_v53  ;;  %2972 = vmatpush.msrb.mxu0 %v5108_v54  ;;  %v5187_v53 = vld [vmem:[%s6011_s8 + $0x1d88] sm:$0xff]  ;;  %v5160_v54 = vld [vmem:[%s6011_s8 + $0x1cb0] sm:$0xff] }
 0x908   : > { %2959 = vmatpush.msrb.mxu3 %v5125_v25  ;;  %2999 = vmatpush.msrb.mxu2 %v5126_v27  ;;  %v5147_v25 = vld [vmem:[%s6011_s8 + $0x1c48] sm:$0xff]  ;;  %v5144_v27 = vld [vmem:[%s6011_s8 + $0x1c30] sm:$0xff] }
 0x909   : > { %2933 = vmatpush.msrb.mxu1 %v5105_v55  ;;  %2973 = vmatpush.msrb.mxu0 %v5106_v56  ;;  %v5161_v55 = vld [vmem:[%s6011_s8 + $0x1cb8] sm:$0xff]  ;;  %v5158_v56 = vld [vmem:[%s6011_s8 + $0x1ca0] sm:$0xff] }
 0x90a   : > { %2960 = vmatpush.msrb.mxu3 %v5123_v29  ;;  %3000 = vmatpush.msrb.mxu2 %v5124_v31  ;;  %v5145_v29 = vld [vmem:[%s6011_s8 + $0x1c38] sm:$0xff]  ;;  %v5142_v31 = vld [vmem:[%s6011_s8 + $0x1c20] sm:$0xff] }
 0x90b   : > { %2934 = vmatpush.msrb.mxu1 %v5103_v57  ;;  %2974 = vmatpush.msrb.mxu0 %v5104_v58  ;;  %v5159_v57 = vld [vmem:[%s6011_s8 + $0x1ca8] sm:$0xff]  ;;  %v5156_v58 = vld [vmem:[%s6011_s8 + $0x1c90] sm:$0xff] }
 0x90c   : > { %2961 = vmatpush.msrb.mxu3 %v5121_v33  ;;  %3001 = vmatpush.msrb.mxu2 %v5122_v35  ;;  %v5143_v33 = vld [vmem:[%s6011_s8 + $0x1c28] sm:$0xff]  ;;  %v5225_v35 = vld [vmem:[%s6011_s8 + $0x1ea0] sm:$0xff] }
 0x90d   : > { %2935 = vmatpush.msrb.mxu1 %v5101_v8  ;;  %2975 = vmatpush.msrb.mxu0 %v5102_v10 }
 0x90f   : > { %2936 = vmatpush.msrb.mxu1 %v5099_v12  ;;  %2976 = vmatpush.msrb.mxu0 %v5100_v14  ;;  %v5184_v12 = vld [vmem:[%s6011_s8 + $0x1d70] sm:$0xff]  ;;  %v5185_v14 = vld [vmem:[%s6011_s8 + $0x1d78] sm:$0xff] }
 0x911   : > { %2937 = vmatpush.msrb.mxu1 %v5097_v16  ;;  %2977 = vmatpush.msrb.mxu0 %v5098_v18  ;;  %v5182_v16 = vld [vmem:[%s6011_s8 + $0x1d60] sm:$0xff]  ;;  %v5183_v18 = vld [vmem:[%s6011_s8 + $0x1d68] sm:$0xff] }
 0x913   : > { %2938 = vmatpush.msrb.mxu1 %v5095_v20  ;;  %2978 = vmatpush.msrb.mxu0 %v5096_v22  ;;  %v5180_v20 = vld [vmem:[%s6011_s8 + $0x1d50] sm:$0xff]  ;;  %v5181_v22 = vld [vmem:[%s6011_s8 + $0x1d58] sm:$0xff] }
 0x915   : > { %2939 = vmatpush.msrb.mxu1 %v5093_v24  ;;  %2979 = vmatpush.msrb.mxu0 %v5094_v26  ;;  %v5178_v24 = vld [vmem:[%s6011_s8 + $0x1d40] sm:$0xff]  ;;  %v5179_v26 = vld [vmem:[%s6011_s8 + $0x1d48] sm:$0xff] }
 0x917   : > { %2940 = vmatpush.msrb.mxu1 %v5091_v28  ;;  %2980 = vmatpush.msrb.mxu0 %v5092_v30  ;;  %v5176_v28 = vld [vmem:[%s6011_s8 + $0x1d30] sm:$0xff]  ;;  %v5177_v30 = vld [vmem:[%s6011_s8 + $0x1d38] sm:$0xff] }
 0x919   : > { %2941 = vmatpush.msrb.mxu1 %v5089_v32  ;;  %2981 = vmatpush.msrb.mxu0 %v5090_v34  ;;  %v5174_v32 = vld [vmem:[%s6011_s8 + $0x1d20] sm:$0xff]  ;;  %v5175_v34 = vld [vmem:[%s6011_s8 + $0x1d28] sm:$0xff] }
 0x976   : > { %v2657_v62 = vpop.f32.mrf.mxu1  ;;  %v2697_v63 = vpop.f32.mrf.mxu0 }
 0x977   : > { %v2658_v0 = vadd.f32 %v2657_v62, %v2633_v60  ;;  %v2698_v1 = vadd.f32 %v2697_v63, %v2634_v61  ;;  %v5154_v60 = vld [vmem:[%s6011_s8 + $0x1c80] sm:$0xff]  ;;  %v5155_v61 = vld [vmem:[%s6011_s8 + $0x1c88] sm:$0xff] }
 0x978   : > { %v5086_v62 = vld [vmem:[%s6026_s16 + $0x20] ss:$8 sm:$0x3] }
 0x979   : > { %v2776_v63 = vperm.slane %v5086_v62, 0 }
 0x97d   : > { %v2677_v2 = vpop.f32.mrf.mxu3  ;;  %v2717_v3 = vpop.f32.mrf.mxu2 }
 0x97e   : > { %v2678_v4 = vadd.f32 %v2677_v2, %v2658_v0  ;;  %v2718_v5 = vadd.f32 %v2717_v3, %v2698_v1  ;;  %v2777_v0 = vperm.slane %v5086_v62, 1 }
 0x980   : > { %v2720_v6 = vmax.f32 %v2678_v4, 0.0  ;;  %v2721_v7 = vmax.f32 %v2718_v5, 0.0 }
 0x982   : > { %2799 = vmatmul.f32.vlgmr.msra.gmra.mxu3 %v2720_v6  ;;  %5087 = vmatmul.msk.f32.vlgmr.msra.gmra.mxu1 %vm491_vm2, %v2721_v7 }
 0x983   : > { %2839 = vmatmul.f32.vlgmr.msra.gmra.mxu2 %v2720_v6  ;;  %5088 = vmatmul.msk.f32.vlgmr.msra.gmra.mxu0 %vm491_vm2, %v2721_v7 }
 0x984   : > { %3069 = vmatpush.msra.mxu3 %v5172_v36  ;;  %3109 = vmatpush.msra.mxu2 %v5173_v37  ;;  %v5226_v36 = vld [vmem:[%s6011_s8 + $0x1ea8] sm:$0xff]  ;;  %v5223_v37 = vld [vmem:[%s6011_s8 + $0x1e90] sm:$0xff] }
 0x985   : > { %3096 = vmatpush.msra.mxu1 %v5190_v44  ;;  %3136 = vmatpush.msra.mxu0 %v5191_v45  ;;  %v5244_v44 = vld [vmem:[%s6011_s8 + $0x1f38] sm:$0xff]  ;;  %v5217_v45 = vld [vmem:[%s6011_s8 + $0x1e60] sm:$0xff] }
 0x986   : > { %3070 = vmatpush.msra.mxu3 %v5170_v38  ;;  %3110 = vmatpush.msra.mxu2 %v5171_v39  ;;  %v5224_v38 = vld [vmem:[%s6011_s8 + $0x1e98] sm:$0xff]  ;;  %v5221_v39 = vld [vmem:[%s6011_s8 + $0x1e80] sm:$0xff] }
 0x987   : > { %3097 = vmatpush.msra.mxu1 %v5188_v48  ;;  %3137 = vmatpush.msra.mxu0 %v5189_v49  ;;  %v5242_v48 = vld [vmem:[%s6011_s8 + $0x1f28] sm:$0xff]  ;;  %v5215_v49 = vld [vmem:[%s6011_s8 + $0x1e50] sm:$0xff] }
 0x988   : > { %3071 = vmatpush.msra.mxu3 %v5168_v40  ;;  %3111 = vmatpush.msra.mxu2 %v5169_v41  ;;  %v5222_v40 = vld [vmem:[%s6011_s8 + $0x1e88] sm:$0xff]  ;;  %v5219_v41 = vld [vmem:[%s6011_s8 + $0x1e70] sm:$0xff] }
 0x989   : > { %3098 = vmatpush.msra.mxu1 %v5186_v50  ;;  %3138 = vmatpush.msra.mxu0 %v5187_v53  ;;  %v5216_v50 = vld [vmem:[%s6011_s8 + $0x1e58] sm:$0xff]  ;;  %v5211_v53 = vld [vmem:[%s6011_s8 + $0x1e30] sm:$0xff] }
 0x98a   : > { %3072 = vmatpush.msra.mxu3 %v5166_v42  ;;  %3112 = vmatpush.msra.mxu2 %v5167_v43  ;;  %v5220_v42 = vld [vmem:[%s6011_s8 + $0x1e78] sm:$0xff]  ;;  %v5243_v43 = vld [vmem:[%s6011_s8 + $0x1f30] sm:$0xff] }
 0x98b   : > { %3099 = vmatpush.msra.mxu1 %v5184_v12  ;;  %3139 = vmatpush.msra.mxu0 %v5185_v14  ;;  %v5206_v12 = vld [vmem:[%s6011_s8 + $0x1e08] sm:$0xff]  ;;  %v5203_v14 = vld [vmem:[%s6011_s8 + $0x1df0] sm:$0xff] }
 0x98c   : > { %3073 = vmatpush.msra.mxu3 %v5164_v46  ;;  %3113 = vmatpush.msra.mxu2 %v5165_v47  ;;  %v5218_v46 = vld [vmem:[%s6011_s8 + $0x1e68] sm:$0xff]  ;;  %v5241_v47 = vld [vmem:[%s6011_s8 + $0x1f20] sm:$0xff] }
 0x98d   : > { %3100 = vmatpush.msra.mxu1 %v5182_v16  ;;  %3140 = vmatpush.msra.mxu0 %v5183_v18  ;;  %v5204_v16 = vld [vmem:[%s6011_s8 + $0x1df8] sm:$0xff]  ;;  %v5201_v18 = vld [vmem:[%s6011_s8 + $0x1de0] sm:$0xff] }
 0x98e   : > { %3074 = vmatpush.msra.mxu3 %v5162_v51  ;;  %3114 = vmatpush.msra.mxu2 %v5163_v52  ;;  %v5213_v51 = vld [vmem:[%s6011_s8 + $0x1e40] sm:$0xff]  ;;  %v5214_v52 = vld [vmem:[%s6011_s8 + $0x1e48] sm:$0xff] }
 0x98f   : > { %3101 = vmatpush.msra.mxu1 %v5180_v20  ;;  %3141 = vmatpush.msra.mxu0 %v5181_v22  ;;  %v5202_v20 = vld [vmem:[%s6011_s8 + $0x1de8] sm:$0xff]  ;;  %v5199_v22 = vld [vmem:[%s6011_s8 + $0x1dd0] sm:$0xff] }
 0x990   : > { %3075 = vmatpush.msra.mxu3 %v5160_v54  ;;  %3115 = vmatpush.msra.mxu2 %v5161_v55  ;;  %v5212_v54 = vld [vmem:[%s6011_s8 + $0x1e38] sm:$0xff]  ;;  %v5209_v55 = vld [vmem:[%s6011_s8 + $0x1e20] sm:$0xff] }
 0x991   : > { %3102 = vmatpush.msra.mxu1 %v5178_v24  ;;  %3142 = vmatpush.msra.mxu0 %v5179_v26  ;;  %v5200_v24 = vld [vmem:[%s6011_s8 + $0x1dd8] sm:$0xff]  ;;  %v5197_v26 = vld [vmem:[%s6011_s8 + $0x1dc0] sm:$0xff] }
 0x992   : > { %3076 = vmatpush.msra.mxu3 %v5158_v56  ;;  %3116 = vmatpush.msra.mxu2 %v5159_v57  ;;  %v5210_v56 = vld [vmem:[%s6011_s8 + $0x1e28] sm:$0xff] }
 0x993   : > { %3103 = vmatpush.msra.mxu1 %v5176_v28  ;;  %3143 = vmatpush.msra.mxu0 %v5177_v30  ;;  %v5139_v57 = vld [vmem:[%s6026_s16 + $0x21] ss:$8 sm:$0x3] }
 0x994   : > { %3077 = vmatpush.msra.mxu3 %v5156_v58  ;;  %3117 = vmatpush.msra.mxu2 %v5157_v59  ;;  %v2919_v58 = vperm.slane %v5139_v57, 0  ;;  %v2920_v59 = vperm.slane %v5139_v57, 1  ;;  %v5198_v28 = vld [vmem:[%s6011_s8 + $0x1dc8] sm:$0xff]  ;;  %v5195_v30 = vld [vmem:[%s6011_s8 + $0x1db0] sm:$0xff]  ;;  %v5263_v57 = vld [vmem:[%s6011_s8 + $0x1fb8] sm:$0xff] }
 0x995   : > { %3104 = vmatpush.msra.mxu1 %v5174_v32  ;;  %3144 = vmatpush.msra.mxu0 %v5175_v34  ;;  %v5196_v32 = vld [vmem:[%s6011_s8 + $0x1db8] sm:$0xff]  ;;  %v5278_v34 = vld [vmem:[%s6011_s8 + $0x2030] sm:$0xff] }
 0x996   : > { %3078 = vmatpush.msra.mxu3 %v5154_v60  ;;  %3118 = vmatpush.msra.mxu2 %v5155_v61 }
 0x998   : > { %3079 = vmatpush.msra.mxu3 %v5152_v11  ;;  %3119 = vmatpush.msra.mxu2 %v5153_v13  ;;  %v5237_v11 = vld [vmem:[%s6011_s8 + $0x1f00] sm:$0xff]  ;;  %v5238_v13 = vld [vmem:[%s6011_s8 + $0x1f08] sm:$0xff] }
 0x99a   : > { %3080 = vmatpush.msra.mxu3 %v5150_v15  ;;  %3120 = vmatpush.msra.mxu2 %v5151_v17  ;;  %v5235_v15 = vld [vmem:[%s6011_s8 + $0x1ef0] sm:$0xff]  ;;  %v5236_v17 = vld [vmem:[%s6011_s8 + $0x1ef8] sm:$0xff] }
 0x99c   : > { %3081 = vmatpush.msra.mxu3 %v5148_v19  ;;  %3121 = vmatpush.msra.mxu2 %v5149_v21  ;;  %v5233_v19 = vld [vmem:[%s6011_s8 + $0x1ee0] sm:$0xff]  ;;  %v5234_v21 = vld [vmem:[%s6011_s8 + $0x1ee8] sm:$0xff] }
 0x99e   : > { %3082 = vmatpush.msra.mxu3 %v5146_v23  ;;  %3122 = vmatpush.msra.mxu2 %v5147_v25  ;;  %v5231_v23 = vld [vmem:[%s6011_s8 + $0x1ed0] sm:$0xff]  ;;  %v5232_v25 = vld [vmem:[%s6011_s8 + $0x1ed8] sm:$0xff] }
 0x9a0   : > { %3083 = vmatpush.msra.mxu3 %v5144_v27  ;;  %3123 = vmatpush.msra.mxu2 %v5145_v29  ;;  %v5229_v27 = vld [vmem:[%s6011_s8 + $0x1ec0] sm:$0xff]  ;;  %v5230_v29 = vld [vmem:[%s6011_s8 + $0x1ec8] sm:$0xff] }
 0x9a2   : > { %3084 = vmatpush.msra.mxu3 %v5142_v31  ;;  %3124 = vmatpush.msra.mxu2 %v5143_v33  ;;  %v5227_v31 = vld [vmem:[%s6011_s8 + $0x1eb0] sm:$0xff]  ;;  %v5228_v33 = vld [vmem:[%s6011_s8 + $0x1eb8] sm:$0xff] }
 0x9ff   : > { %v2820_v4 = vpop.f32.mrf.mxu1 }
 0xa00   : > { %v2860_v6 = vpop.f32.mrf.mxu0 }
 0xa05   : > { %v2800_v1 = vpop.f32.mrf.mxu3 }
 0xa06   : > { %v2801_v2 = vadd.f32 %v2800_v1, %v2776_v63  ;;  %v2840_v3 = vpop.f32.mrf.mxu2 }
 0xa07   : > { %v2841_v5 = vadd.f32 %v2840_v3, %v2777_v0 }
 0xa08   : > { %v2821_v7 = vadd.f32 %v2820_v4, %v2801_v2 }
 0xa09   : > { %v2861_v8 = vadd.f32 %v2860_v6, %v2841_v5  ;;  %v5207_v6 = vld [vmem:[%s6011_s8 + $0x1e10] sm:$0xff] }
 0xa0a   : > { %v2863_v9 = vmax.f32 %v2821_v7, 0.0  ;;  %v5239_v7 = vld [vmem:[%s6011_s8 + $0x1f10] sm:$0xff] }
 0xa0b   : > { %v2864_v10 = vmax.f32 %v2861_v8, 0.0  ;;  %v5208_v8 = vld [vmem:[%s6011_s8 + $0x1e18] sm:$0xff] }
 0xa0c   : > { %2942 = vmatmul.f32.vlgmr.msrb.gmra.mxu1 %v2863_v9  ;;  %2982 = vmatmul.f32.vlgmr.msrb.gmra.mxu0 %v2863_v9  ;;  %v5240_v9 = vld [vmem:[%s6011_s8 + $0x1f18] sm:$0xff] }
 0xa0d   : > { %5140 = vmatmul.msk.f32.vlgmr.msrb.gmra.mxu3 %vm491_vm2, %v2864_v10  ;;  %5141 = vmatmul.msk.f32.vlgmr.msrb.gmra.mxu2 %vm491_vm2, %v2864_v10  ;;  %v5205_v10 = vld [vmem:[%s6011_s8 + $0x1e00] sm:$0xff] }
 0xa0e   : > { %3212 = vmatpush.msrb.mxu1 %v5225_v35  ;;  %3252 = vmatpush.msrb.mxu0 %v5226_v36  ;;  %v5279_v35 = vld [vmem:[%s6011_s8 + $0x2038] sm:$0xff]  ;;  %v5276_v36 = vld [vmem:[%s6011_s8 + $0x2020] sm:$0xff] }
 0xa0f   : > { %3239 = vmatpush.msrb.mxu3 %v5243_v43  ;;  %3279 = vmatpush.msrb.mxu2 %v5244_v44  ;;  %v5297_v43 = vld [vmem:[%s6011_s8 + $0x20c8] sm:$0xff]  ;;  %v5270_v44 = vld [vmem:[%s6011_s8 + $0x1ff0] sm:$0xff] }
 0xa10   : > { %3213 = vmatpush.msrb.mxu1 %v5223_v37  ;;  %3253 = vmatpush.msrb.mxu0 %v5224_v38  ;;  %v5277_v37 = vld [vmem:[%s6011_s8 + $0x2028] sm:$0xff]  ;;  %v5274_v38 = vld [vmem:[%s6011_s8 + $0x2010] sm:$0xff] }
 0xa11   : > { %3240 = vmatpush.msrb.mxu3 %v5241_v47  ;;  %3280 = vmatpush.msrb.mxu2 %v5242_v48  ;;  %v5295_v47 = vld [vmem:[%s6011_s8 + $0x20b8] sm:$0xff]  ;;  %v5292_v48 = vld [vmem:[%s6011_s8 + $0x20a0] sm:$0xff] }
 0xa12   : > { %3214 = vmatpush.msrb.mxu1 %v5221_v39  ;;  %3254 = vmatpush.msrb.mxu0 %v5222_v40  ;;  %v5275_v39 = vld [vmem:[%s6011_s8 + $0x2018] sm:$0xff]  ;;  %v5272_v40 = vld [vmem:[%s6011_s8 + $0x2000] sm:$0xff] }
 0xa13   : > { %3241 = vmatpush.msrb.mxu3 %v5239_v7  ;;  %3281 = vmatpush.msrb.mxu2 %v5240_v9  ;;  %v5258_v9 = vld [vmem:[%s6011_s8 + $0x1f90] sm:$0xff] }
 0xa14   : > { %3215 = vmatpush.msrb.mxu1 %v5219_v41  ;;  %3255 = vmatpush.msrb.mxu0 %v5220_v42  ;;  %v5273_v41 = vld [vmem:[%s6011_s8 + $0x2008] sm:$0xff]  ;;  %v5296_v42 = vld [vmem:[%s6011_s8 + $0x20c0] sm:$0xff] }
 0xa15   : > { %3242 = vmatpush.msrb.mxu3 %v5237_v11  ;;  %3282 = vmatpush.msrb.mxu2 %v5238_v13  ;;  %v5259_v11 = vld [vmem:[%s6011_s8 + $0x1f98] sm:$0xff]  ;;  %v5256_v13 = vld [vmem:[%s6011_s8 + $0x1f80] sm:$0xff] }
 0xa16   : > { %3216 = vmatpush.msrb.mxu1 %v5217_v45  ;;  %3256 = vmatpush.msrb.mxu0 %v5218_v46  ;;  %v5271_v45 = vld [vmem:[%s6011_s8 + $0x1ff8] sm:$0xff]  ;;  %v5294_v46 = vld [vmem:[%s6011_s8 + $0x20b0] sm:$0xff] }
 0xa17   : > { %3243 = vmatpush.msrb.mxu3 %v5235_v15  ;;  %3283 = vmatpush.msrb.mxu2 %v5236_v17  ;;  %v5257_v15 = vld [vmem:[%s6011_s8 + $0x1f88] sm:$0xff]  ;;  %v5254_v17 = vld [vmem:[%s6011_s8 + $0x1f70] sm:$0xff] }
 0xa18   : > { %3217 = vmatpush.msrb.mxu1 %v5215_v49  ;;  %3257 = vmatpush.msrb.mxu0 %v5216_v50  ;;  %v5268_v49 = vld [vmem:[%s6011_s8 + $0x1fe0] sm:$0xff]  ;;  %v5269_v50 = vld [vmem:[%s6011_s8 + $0x1fe8] sm:$0xff] }
 0xa19   : > { %3244 = vmatpush.msrb.mxu3 %v5233_v19  ;;  %3284 = vmatpush.msrb.mxu2 %v5234_v21  ;;  %v5255_v19 = vld [vmem:[%s6011_s8 + $0x1f78] sm:$0xff]  ;;  %v5252_v21 = vld [vmem:[%s6011_s8 + $0x1f60] sm:$0xff] }
 0xa1a   : > { %3218 = vmatpush.msrb.mxu1 %v5213_v51  ;;  %3258 = vmatpush.msrb.mxu0 %v5214_v52  ;;  %v5293_v51 = vld [vmem:[%s6011_s8 + $0x20a8] sm:$0xff]  ;;  %v5266_v52 = vld [vmem:[%s6011_s8 + $0x1fd0] sm:$0xff] }
 0xa1b   : > { %3245 = vmatpush.msrb.mxu3 %v5231_v23  ;;  %3285 = vmatpush.msrb.mxu2 %v5232_v25  ;;  %v5253_v23 = vld [vmem:[%s6011_s8 + $0x1f68] sm:$0xff]  ;;  %v5250_v25 = vld [vmem:[%s6011_s8 + $0x1f50] sm:$0xff] }
 0xa1c   : > { %3219 = vmatpush.msrb.mxu1 %v5211_v53  ;;  %3259 = vmatpush.msrb.mxu0 %v5212_v54  ;;  %v5267_v53 = vld [vmem:[%s6011_s8 + $0x1fd8] sm:$0xff]  ;;  %v5264_v54 = vld [vmem:[%s6011_s8 + $0x1fc0] sm:$0xff] }
 0xa1d   : > { %3246 = vmatpush.msrb.mxu3 %v5229_v27  ;;  %3286 = vmatpush.msrb.mxu2 %v5230_v29  ;;  %v5251_v27 = vld [vmem:[%s6011_s8 + $0x1f58] sm:$0xff]  ;;  %v5248_v29 = vld [vmem:[%s6011_s8 + $0x1f40] sm:$0xff] }
 0xa1e   : > { %3220 = vmatpush.msrb.mxu1 %v5209_v55  ;;  %3260 = vmatpush.msrb.mxu0 %v5210_v56  ;;  %v5265_v55 = vld [vmem:[%s6011_s8 + $0x1fc8] sm:$0xff]  ;;  %v5262_v56 = vld [vmem:[%s6011_s8 + $0x1fb0] sm:$0xff] }
 0xa1f   : > { %3247 = vmatpush.msrb.mxu3 %v5227_v31  ;;  %3287 = vmatpush.msrb.mxu2 %v5228_v33  ;;  %v5249_v31 = vld [vmem:[%s6011_s8 + $0x1f48] sm:$0xff]  ;;  %v5331_v33 = vld [vmem:[%s6011_s8 + $0x21c0] sm:$0xff] }
 0xa20   : > { %3221 = vmatpush.msrb.mxu1 %v5207_v6  ;;  %3261 = vmatpush.msrb.mxu0 %v5208_v8 }
 0xa22   : > { %3222 = vmatpush.msrb.mxu1 %v5205_v10  ;;  %3262 = vmatpush.msrb.mxu0 %v5206_v12  ;;  %v5290_v10 = vld [vmem:[%s6011_s8 + $0x2090] sm:$0xff]  ;;  %v5291_v12 = vld [vmem:[%s6011_s8 + $0x2098] sm:$0xff] }
 0xa24   : > { %3223 = vmatpush.msrb.mxu1 %v5203_v14  ;;  %3263 = vmatpush.msrb.mxu0 %v5204_v16  ;;  %v5288_v14 = vld [vmem:[%s6011_s8 + $0x2080] sm:$0xff]  ;;  %v5289_v16 = vld [vmem:[%s6011_s8 + $0x2088] sm:$0xff] }
 0xa26   : > { %3224 = vmatpush.msrb.mxu1 %v5201_v18  ;;  %3264 = vmatpush.msrb.mxu0 %v5202_v20  ;;  %v5286_v18 = vld [vmem:[%s6011_s8 + $0x2070] sm:$0xff]  ;;  %v5287_v20 = vld [vmem:[%s6011_s8 + $0x2078] sm:$0xff] }
 0xa28   : > { %3225 = vmatpush.msrb.mxu1 %v5199_v22  ;;  %3265 = vmatpush.msrb.mxu0 %v5200_v24  ;;  %v5284_v22 = vld [vmem:[%s6011_s8 + $0x2060] sm:$0xff]  ;;  %v5285_v24 = vld [vmem:[%s6011_s8 + $0x2068] sm:$0xff] }
 0xa2a   : > { %3226 = vmatpush.msrb.mxu1 %v5197_v26  ;;  %3266 = vmatpush.msrb.mxu0 %v5198_v28  ;;  %v5282_v26 = vld [vmem:[%s6011_s8 + $0x2050] sm:$0xff]  ;;  %v5283_v28 = vld [vmem:[%s6011_s8 + $0x2058] sm:$0xff] }
 0xa2c   : > { %3227 = vmatpush.msrb.mxu1 %v5195_v30  ;;  %3267 = vmatpush.msrb.mxu0 %v5196_v32  ;;  %v5280_v30 = vld [vmem:[%s6011_s8 + $0x2040] sm:$0xff]  ;;  %v5281_v32 = vld [vmem:[%s6011_s8 + $0x2048] sm:$0xff] }
 0xa89   : > { %v2943_v60 = vpop.f32.mrf.mxu1  ;;  %v2983_v61 = vpop.f32.mrf.mxu0 }
 0xa8a   : > { %v2944_v62 = vadd.f32 %v2943_v60, %v2919_v58  ;;  %v2984_v63 = vadd.f32 %v2983_v61, %v2920_v59  ;;  %v5260_v58 = vld [vmem:[%s6011_s8 + $0x1fa0] sm:$0xff]  ;;  %v5261_v59 = vld [vmem:[%s6011_s8 + $0x1fa8] sm:$0xff] }
 0xa8b   : > { %v5192_v60 = vld [vmem:[%s6026_s16 + $0x22] ss:$8 sm:$0x3] }
 0xa8c   : > { %v3062_v61 = vperm.slane %v5192_v60, 0 }
 0xa90   : > { %v2963_v0 = vpop.f32.mrf.mxu3  ;;  %v3003_v1 = vpop.f32.mrf.mxu2 }
 0xa91   : > { %v2964_v2 = vadd.f32 %v2963_v0, %v2944_v62  ;;  %v3004_v3 = vadd.f32 %v3003_v1, %v2984_v63  ;;  %v3063_v62 = vperm.slane %v5192_v60, 1 }
 0xa93   : > { %v3006_v4 = vmax.f32 %v2964_v2, 0.0  ;;  %v3007_v5 = vmax.f32 %v3004_v3, 0.0 }
 0xa95   : > { %3085 = vmatmul.f32.vlgmr.msra.gmra.mxu3 %v3006_v4  ;;  %5193 = vmatmul.msk.f32.vlgmr.msra.gmra.mxu1 %vm491_vm2, %v3007_v5 }
 0xa96   : > { %3125 = vmatmul.f32.vlgmr.msra.gmra.mxu2 %v3006_v4  ;;  %5194 = vmatmul.msk.f32.vlgmr.msra.gmra.mxu0 %vm491_vm2, %v3007_v5 }
 0xa97   : > { %3355 = vmatpush.msra.mxu3 %v5278_v34  ;;  %3395 = vmatpush.msra.mxu2 %v5279_v35  ;;  %v5332_v34 = vld [vmem:[%s6011_s8 + $0x21c8] sm:$0xff]  ;;  %v5329_v35 = vld [vmem:[%s6011_s8 + $0x21b0] sm:$0xff] }
 0xa98   : > { %3382 = vmatpush.msra.mxu1 %v5296_v42  ;;  %3422 = vmatpush.msra.mxu0 %v5297_v43  ;;  %v5350_v42 = vld [vmem:[%s6011_s8 + $0x2258] sm:$0xff]  ;;  %v5323_v43 = vld [vmem:[%s6011_s8 + $0x2180] sm:$0xff] }
 0xa99   : > { %3356 = vmatpush.msra.mxu3 %v5276_v36  ;;  %3396 = vmatpush.msra.mxu2 %v5277_v37  ;;  %v5330_v36 = vld [vmem:[%s6011_s8 + $0x21b8] sm:$0xff]  ;;  %v5327_v37 = vld [vmem:[%s6011_s8 + $0x21a0] sm:$0xff] }
 0xa9a   : > { %3383 = vmatpush.msra.mxu1 %v5294_v46  ;;  %3423 = vmatpush.msra.mxu0 %v5295_v47  ;;  %v5348_v46 = vld [vmem:[%s6011_s8 + $0x2248] sm:$0xff]  ;;  %v5321_v47 = vld [vmem:[%s6011_s8 + $0x2170] sm:$0xff] }
 0xa9b   : > { %3357 = vmatpush.msra.mxu3 %v5274_v38  ;;  %3397 = vmatpush.msra.mxu2 %v5275_v39  ;;  %v5328_v38 = vld [vmem:[%s6011_s8 + $0x21a8] sm:$0xff]  ;;  %v5325_v39 = vld [vmem:[%s6011_s8 + $0x2190] sm:$0xff] }
 0xa9c   : > { %3384 = vmatpush.msra.mxu1 %v5292_v48  ;;  %3424 = vmatpush.msra.mxu0 %v5293_v51  ;;  %v5322_v48 = vld [vmem:[%s6011_s8 + $0x2178] sm:$0xff]  ;;  %v5317_v51 = vld [vmem:[%s6011_s8 + $0x2150] sm:$0xff] }
 0xa9d   : > { %3358 = vmatpush.msra.mxu3 %v5272_v40  ;;  %3398 = vmatpush.msra.mxu2 %v5273_v41  ;;  %v5326_v40 = vld [vmem:[%s6011_s8 + $0x2198] sm:$0xff]  ;;  %v5349_v41 = vld [vmem:[%s6011_s8 + $0x2250] sm:$0xff] }
 0xa9e   : > { %3385 = vmatpush.msra.mxu1 %v5290_v10  ;;  %3425 = vmatpush.msra.mxu0 %v5291_v12  ;;  %v5312_v10 = vld [vmem:[%s6011_s8 + $0x2128] sm:$0xff]  ;;  %v5309_v12 = vld [vmem:[%s6011_s8 + $0x2110] sm:$0xff] }
 0xa9f   : > { %3359 = vmatpush.msra.mxu3 %v5270_v44  ;;  %3399 = vmatpush.msra.mxu2 %v5271_v45  ;;  %v5324_v44 = vld [vmem:[%s6011_s8 + $0x2188] sm:$0xff]  ;;  %v5347_v45 = vld [vmem:[%s6011_s8 + $0x2240] sm:$0xff] }
 0xaa0   : > { %3386 = vmatpush.msra.mxu1 %v5288_v14  ;;  %3426 = vmatpush.msra.mxu0 %v5289_v16  ;;  %v5310_v14 = vld [vmem:[%s6011_s8 + $0x2118] sm:$0xff]  ;;  %v5307_v16 = vld [vmem:[%s6011_s8 + $0x2100] sm:$0xff] }
 0xaa1   : > { %3360 = vmatpush.msra.mxu3 %v5268_v49  ;;  %3400 = vmatpush.msra.mxu2 %v5269_v50  ;;  %v5319_v49 = vld [vmem:[%s6011_s8 + $0x2160] sm:$0xff]  ;;  %v5320_v50 = vld [vmem:[%s6011_s8 + $0x2168] sm:$0xff] }
 0xaa2   : > { %3387 = vmatpush.msra.mxu1 %v5286_v18  ;;  %3427 = vmatpush.msra.mxu0 %v5287_v20  ;;  %v5308_v18 = vld [vmem:[%s6011_s8 + $0x2108] sm:$0xff]  ;;  %v5305_v20 = vld [vmem:[%s6011_s8 + $0x20f0] sm:$0xff] }
 0xaa3   : > { %3361 = vmatpush.msra.mxu3 %v5266_v52  ;;  %3401 = vmatpush.msra.mxu2 %v5267_v53  ;;  %v5318_v52 = vld [vmem:[%s6011_s8 + $0x2158] sm:$0xff]  ;;  %v5315_v53 = vld [vmem:[%s6011_s8 + $0x2140] sm:$0xff] }
 0xaa4   : > { %3388 = vmatpush.msra.mxu1 %v5284_v22  ;;  %3428 = vmatpush.msra.mxu0 %v5285_v24  ;;  %v5306_v22 = vld [vmem:[%s6011_s8 + $0x20f8] sm:$0xff]  ;;  %v5303_v24 = vld [vmem:[%s6011_s8 + $0x20e0] sm:$0xff] }
 0xaa5   : > { %3362 = vmatpush.msra.mxu3 %v5264_v54  ;;  %3402 = vmatpush.msra.mxu2 %v5265_v55  ;;  %v5316_v54 = vld [vmem:[%s6011_s8 + $0x2148] sm:$0xff] }
 0xaa6   : > { %3389 = vmatpush.msra.mxu1 %v5282_v26  ;;  %3429 = vmatpush.msra.mxu0 %v5283_v28  ;;  %v5245_v55 = vld [vmem:[%s6026_s16 + $0x23] ss:$8 sm:$0x3] }
 0xaa7   : > { %3363 = vmatpush.msra.mxu3 %v5262_v56  ;;  %3403 = vmatpush.msra.mxu2 %v5263_v57  ;;  %v3205_v56 = vperm.slane %v5245_v55, 0  ;;  %v3206_v57 = vperm.slane %v5245_v55, 1  ;;  %v5304_v26 = vld [vmem:[%s6011_s8 + $0x20e8] sm:$0xff]  ;;  %v5301_v28 = vld [vmem:[%s6011_s8 + $0x20d0] sm:$0xff]  ;;  %v5369_v55 = vld [vmem:[%s6011_s8 + $0x22d8] sm:$0xff] }
 0xaa8   : > { %3390 = vmatpush.msra.mxu1 %v5280_v30  ;;  %3430 = vmatpush.msra.mxu0 %v5281_v32  ;;  %v5302_v30 = vld [vmem:[%s6011_s8 + $0x20d8] sm:$0xff]  ;;  %v5384_v32 = vld [vmem:[%s6011_s8 + $0x2350] sm:$0xff] }
 0xaa9   : > { %3364 = vmatpush.msra.mxu3 %v5260_v58  ;;  %3404 = vmatpush.msra.mxu2 %v5261_v59 }
 0xaab   : > { %3365 = vmatpush.msra.mxu3 %v5258_v9  ;;  %3405 = vmatpush.msra.mxu2 %v5259_v11  ;;  %v5343_v9 = vld [vmem:[%s6011_s8 + $0x2220] sm:$0xff]  ;;  %v5344_v11 = vld [vmem:[%s6011_s8 + $0x2228] sm:$0xff] }
 0xaad   : > { %3366 = vmatpush.msra.mxu3 %v5256_v13  ;;  %3406 = vmatpush.msra.mxu2 %v5257_v15  ;;  %v5341_v13 = vld [vmem:[%s6011_s8 + $0x2210] sm:$0xff]  ;;  %v5342_v15 = vld [vmem:[%s6011_s8 + $0x2218] sm:$0xff] }
 0xaaf   : > { %3367 = vmatpush.msra.mxu3 %v5254_v17  ;;  %3407 = vmatpush.msra.mxu2 %v5255_v19  ;;  %v5339_v17 = vld [vmem:[%s6011_s8 + $0x2200] sm:$0xff]  ;;  %v5340_v19 = vld [vmem:[%s6011_s8 + $0x2208] sm:$0xff] }
 0xab1   : > { %3368 = vmatpush.msra.mxu3 %v5252_v21  ;;  %3408 = vmatpush.msra.mxu2 %v5253_v23  ;;  %v5337_v21 = vld [vmem:[%s6011_s8 + $0x21f0] sm:$0xff]  ;;  %v5338_v23 = vld [vmem:[%s6011_s8 + $0x21f8] sm:$0xff] }
 0xab3   : > { %3369 = vmatpush.msra.mxu3 %v5250_v25  ;;  %3409 = vmatpush.msra.mxu2 %v5251_v27  ;;  %v5335_v25 = vld [vmem:[%s6011_s8 + $0x21e0] sm:$0xff]  ;;  %v5336_v27 = vld [vmem:[%s6011_s8 + $0x21e8] sm:$0xff] }
 0xab5   : > { %3370 = vmatpush.msra.mxu3 %v5248_v29  ;;  %3410 = vmatpush.msra.mxu2 %v5249_v31  ;;  %v5333_v29 = vld [vmem:[%s6011_s8 + $0x21d0] sm:$0xff]  ;;  %v5334_v31 = vld [vmem:[%s6011_s8 + $0x21d8] sm:$0xff] }
 0xb12   : > { %v3106_v2 = vpop.f32.mrf.mxu1 }
 0xb13   : > { %v3146_v4 = vpop.f32.mrf.mxu0 }
 0xb18   : > { %v3086_v63 = vpop.f32.mrf.mxu3 }
 0xb19   : > { %v3087_v0 = vadd.f32 %v3086_v63, %v3062_v61  ;;  %v3126_v1 = vpop.f32.mrf.mxu2 }
 0xb1a   : > { %v3127_v3 = vadd.f32 %v3126_v1, %v3063_v62 }
 0xb1b   : > { %v3107_v5 = vadd.f32 %v3106_v2, %v3087_v0 }
 0xb1c   : > { %v3147_v6 = vadd.f32 %v3146_v4, %v3127_v3  ;;  %v5313_v4 = vld [vmem:[%s6011_s8 + $0x2130] sm:$0xff] }
 0xb1d   : > { %v3149_v7 = vmax.f32 %v3107_v5, 0.0  ;;  %v5345_v5 = vld [vmem:[%s6011_s8 + $0x2230] sm:$0xff] }
 0xb1e   : > { %v3150_v8 = vmax.f32 %v3147_v6, 0.0  ;;  %v5314_v6 = vld [vmem:[%s6011_s8 + $0x2138] sm:$0xff] }
 0xb1f   : > { %3228 = vmatmul.f32.vlgmr.msrb.gmra.mxu1 %v3149_v7  ;;  %3268 = vmatmul.f32.vlgmr.msrb.gmra.mxu0 %v3149_v7  ;;  %v5346_v7 = vld [vmem:[%s6011_s8 + $0x2238] sm:$0xff] }
 0xb20   : > { %5246 = vmatmul.msk.f32.vlgmr.msrb.gmra.mxu3 %vm491_vm2, %v3150_v8  ;;  %5247 = vmatmul.msk.f32.vlgmr.msrb.gmra.mxu2 %vm491_vm2, %v3150_v8  ;;  %v5311_v8 = vld [vmem:[%s6011_s8 + $0x2120] sm:$0xff] }
 0xb21   : > { %3498 = vmatpush.msrb.mxu1 %v5331_v33  ;;  %3538 = vmatpush.msrb.mxu0 %v5332_v34  ;;  %v5385_v33 = vld [vmem:[%s6011_s8 + $0x2358] sm:$0xff]  ;;  %v5382_v34 = vld [vmem:[%s6011_s8 + $0x2340] sm:$0xff] }
 0xb22   : > { %3525 = vmatpush.msrb.mxu3 %v5349_v41  ;;  %3565 = vmatpush.msrb.mxu2 %v5350_v42  ;;  %v5403_v41 = vld [vmem:[%s6011_s8 + $0x23e8] sm:$0xff]  ;;  %v5376_v42 = vld [vmem:[%s6011_s8 + $0x2310] sm:$0xff] }
 0xb23   : > { %3499 = vmatpush.msrb.mxu1 %v5329_v35  ;;  %3539 = vmatpush.msrb.mxu0 %v5330_v36  ;;  %v5383_v35 = vld [vmem:[%s6011_s8 + $0x2348] sm:$0xff]  ;;  %v5380_v36 = vld [vmem:[%s6011_s8 + $0x2330] sm:$0xff] }
 0xb24   : > { %3526 = vmatpush.msrb.mxu3 %v5347_v45  ;;  %3566 = vmatpush.msrb.mxu2 %v5348_v46  ;;  %v5401_v45 = vld [vmem:[%s6011_s8 + $0x23d8] sm:$0xff]  ;;  %v5398_v46 = vld [vmem:[%s6011_s8 + $0x23c0] sm:$0xff] }
 0xb25   : > { %3500 = vmatpush.msrb.mxu1 %v5327_v37  ;;  %3540 = vmatpush.msrb.mxu0 %v5328_v38  ;;  %v5381_v37 = vld [vmem:[%s6011_s8 + $0x2338] sm:$0xff]  ;;  %v5378_v38 = vld [vmem:[%s6011_s8 + $0x2320] sm:$0xff] }
 0xb26   : > { %3527 = vmatpush.msrb.mxu3 %v5345_v5  ;;  %3567 = vmatpush.msrb.mxu2 %v5346_v7  ;;  %v5364_v7 = vld [vmem:[%s6011_s8 + $0x22b0] sm:$0xff] }
 0xb27   : > { %3501 = vmatpush.msrb.mxu1 %v5325_v39  ;;  %3541 = vmatpush.msrb.mxu0 %v5326_v40  ;;  %v5379_v39 = vld [vmem:[%s6011_s8 + $0x2328] sm:$0xff]  ;;  %v5402_v40 = vld [vmem:[%s6011_s8 + $0x23e0] sm:$0xff] }
 0xb28   : > { %3528 = vmatpush.msrb.mxu3 %v5343_v9  ;;  %3568 = vmatpush.msrb.mxu2 %v5344_v11  ;;  %v5365_v9 = vld [vmem:[%s6011_s8 + $0x22b8] sm:$0xff]  ;;  %v5362_v11 = vld [vmem:[%s6011_s8 + $0x22a0] sm:$0xff] }
 0xb29   : > { %3502 = vmatpush.msrb.mxu1 %v5323_v43  ;;  %3542 = vmatpush.msrb.mxu0 %v5324_v44  ;;  %v5377_v43 = vld [vmem:[%s6011_s8 + $0x2318] sm:$0xff]  ;;  %v5400_v44 = vld [vmem:[%s6011_s8 + $0x23d0] sm:$0xff] }
 0xb2a   : > { %3529 = vmatpush.msrb.mxu3 %v5341_v13  ;;  %3569 = vmatpush.msrb.mxu2 %v5342_v15  ;;  %v5363_v13 = vld [vmem:[%s6011_s8 + $0x22a8] sm:$0xff]  ;;  %v5360_v15 = vld [vmem:[%s6011_s8 + $0x2290] sm:$0xff] }
 0xb2b   : > { %3503 = vmatpush.msrb.mxu1 %v5321_v47  ;;  %3543 = vmatpush.msrb.mxu0 %v5322_v48  ;;  %v5374_v47 = vld [vmem:[%s6011_s8 + $0x2300] sm:$0xff]  ;;  %v5375_v48 = vld [vmem:[%s6011_s8 + $0x2308] sm:$0xff] }
 0xb2c   : > { %3530 = vmatpush.msrb.mxu3 %v5339_v17  ;;  %3570 = vmatpush.msrb.mxu2 %v5340_v19  ;;  %v5361_v17 = vld [vmem:[%s6011_s8 + $0x2298] sm:$0xff]  ;;  %v5358_v19 = vld [vmem:[%s6011_s8 + $0x2280] sm:$0xff] }
 0xb2d   : > { %3504 = vmatpush.msrb.mxu1 %v5319_v49  ;;  %3544 = vmatpush.msrb.mxu0 %v5320_v50  ;;  %v5399_v49 = vld [vmem:[%s6011_s8 + $0x23c8] sm:$0xff]  ;;  %v5372_v50 = vld [vmem:[%s6011_s8 + $0x22f0] sm:$0xff] }
 0xb2e   : > { %3531 = vmatpush.msrb.mxu3 %v5337_v21  ;;  %3571 = vmatpush.msrb.mxu2 %v5338_v23  ;;  %v5359_v21 = vld [vmem:[%s6011_s8 + $0x2288] sm:$0xff]  ;;  %v5356_v23 = vld [vmem:[%s6011_s8 + $0x2270] sm:$0xff] }
 0xb2f   : > { %3505 = vmatpush.msrb.mxu1 %v5317_v51  ;;  %3545 = vmatpush.msrb.mxu0 %v5318_v52  ;;  %v5373_v51 = vld [vmem:[%s6011_s8 + $0x22f8] sm:$0xff]  ;;  %v5370_v52 = vld [vmem:[%s6011_s8 + $0x22e0] sm:$0xff] }
 0xb30   : > { %3532 = vmatpush.msrb.mxu3 %v5335_v25  ;;  %3572 = vmatpush.msrb.mxu2 %v5336_v27  ;;  %v5357_v25 = vld [vmem:[%s6011_s8 + $0x2278] sm:$0xff]  ;;  %v5354_v27 = vld [vmem:[%s6011_s8 + $0x2260] sm:$0xff] }
 0xb31   : > { %3506 = vmatpush.msrb.mxu1 %v5315_v53  ;;  %3546 = vmatpush.msrb.mxu0 %v5316_v54  ;;  %v5371_v53 = vld [vmem:[%s6011_s8 + $0x22e8] sm:$0xff]  ;;  %v5368_v54 = vld [vmem:[%s6011_s8 + $0x22d0] sm:$0xff] }
 0xb32   : > { %3533 = vmatpush.msrb.mxu3 %v5333_v29  ;;  %3573 = vmatpush.msrb.mxu2 %v5334_v31  ;;  %v5355_v29 = vld [vmem:[%s6011_s8 + $0x2268] sm:$0xff]  ;;  %v5437_v31 = vld [vmem:[%s6011_s8 + $0x24e0] sm:$0xff] }
 0xb33   : > { %3507 = vmatpush.msrb.mxu1 %v5313_v4  ;;  %3547 = vmatpush.msrb.mxu0 %v5314_v6 }
 0xb35   : > { %3508 = vmatpush.msrb.mxu1 %v5311_v8  ;;  %3548 = vmatpush.msrb.mxu0 %v5312_v10  ;;  %v5396_v8 = vld [vmem:[%s6011_s8 + $0x23b0] sm:$0xff]  ;;  %v5397_v10 = vld [vmem:[%s6011_s8 + $0x23b8] sm:$0xff] }
 0xb37   : > { %3509 = vmatpush.msrb.mxu1 %v5309_v12  ;;  %3549 = vmatpush.msrb.mxu0 %v5310_v14  ;;  %v5394_v12 = vld [vmem:[%s6011_s8 + $0x23a0] sm:$0xff]  ;;  %v5395_v14 = vld [vmem:[%s6011_s8 + $0x23a8] sm:$0xff] }
 0xb39   : > { %3510 = vmatpush.msrb.mxu1 %v5307_v16  ;;  %3550 = vmatpush.msrb.mxu0 %v5308_v18  ;;  %v5392_v16 = vld [vmem:[%s6011_s8 + $0x2390] sm:$0xff]  ;;  %v5393_v18 = vld [vmem:[%s6011_s8 + $0x2398] sm:$0xff] }
 0xb3b   : > { %3511 = vmatpush.msrb.mxu1 %v5305_v20  ;;  %3551 = vmatpush.msrb.mxu0 %v5306_v22  ;;  %v5390_v20 = vld [vmem:[%s6011_s8 + $0x2380] sm:$0xff]  ;;  %v5391_v22 = vld [vmem:[%s6011_s8 + $0x2388] sm:$0xff] }
 0xb3d   : > { %3512 = vmatpush.msrb.mxu1 %v5303_v24  ;;  %3552 = vmatpush.msrb.mxu0 %v5304_v26  ;;  %v5388_v24 = vld [vmem:[%s6011_s8 + $0x2370] sm:$0xff]  ;;  %v5389_v26 = vld [vmem:[%s6011_s8 + $0x2378] sm:$0xff] }
 0xb3f   : > { %3513 = vmatpush.msrb.mxu1 %v5301_v28  ;;  %3553 = vmatpush.msrb.mxu0 %v5302_v30  ;;  %v5386_v28 = vld [vmem:[%s6011_s8 + $0x2360] sm:$0xff]  ;;  %v5387_v30 = vld [vmem:[%s6011_s8 + $0x2368] sm:$0xff] }
 0xb9c   : > { %v3229_v58 = vpop.f32.mrf.mxu1  ;;  %v3269_v59 = vpop.f32.mrf.mxu0 }
 0xb9d   : > { %v3230_v60 = vadd.f32 %v3229_v58, %v3205_v56  ;;  %v3270_v61 = vadd.f32 %v3269_v59, %v3206_v57  ;;  %v5366_v56 = vld [vmem:[%s6011_s8 + $0x22c0] sm:$0xff]  ;;  %v5367_v57 = vld [vmem:[%s6011_s8 + $0x22c8] sm:$0xff] }
 0xb9e   : > { %v5298_v58 = vld [vmem:[%s6026_s16 + $0x24] ss:$8 sm:$0x3] }
 0xb9f   : > { %v3348_v59 = vperm.slane %v5298_v58, 0 }
 0xba3   : > { %v3249_v62 = vpop.f32.mrf.mxu3  ;;  %v3289_v63 = vpop.f32.mrf.mxu2 }
 0xba4   : > { %v3250_v0 = vadd.f32 %v3249_v62, %v3230_v60  ;;  %v3290_v1 = vadd.f32 %v3289_v63, %v3270_v61  ;;  %v3349_v60 = vperm.slane %v5298_v58, 1 }
 0xba6   : > { %v3292_v2 = vmax.f32 %v3250_v0, 0.0  ;;  %v3293_v3 = vmax.f32 %v3290_v1, 0.0 }
 0xba8   : > { %3371 = vmatmul.f32.vlgmr.msra.gmra.mxu3 %v3292_v2  ;;  %5299 = vmatmul.msk.f32.vlgmr.msra.gmra.mxu1 %vm491_vm2, %v3293_v3 }
 0xba9   : > { %3411 = vmatmul.f32.vlgmr.msra.gmra.mxu2 %v3292_v2  ;;  %5300 = vmatmul.msk.f32.vlgmr.msra.gmra.mxu0 %vm491_vm2, %v3293_v3 }
 0xbaa   : > { %3641 = vmatpush.msra.mxu3 %v5384_v32  ;;  %3681 = vmatpush.msra.mxu2 %v5385_v33  ;;  %v5438_v32 = vld [vmem:[%s6011_s8 + $0x24e8] sm:$0xff]  ;;  %v5435_v33 = vld [vmem:[%s6011_s8 + $0x24d0] sm:$0xff] }
 0xbab   : > { %3668 = vmatpush.msra.mxu1 %v5402_v40  ;;  %3708 = vmatpush.msra.mxu0 %v5403_v41  ;;  %v5456_v40 = vld [vmem:[%s6011_s8 + $0x2578] sm:$0xff]  ;;  %v5429_v41 = vld [vmem:[%s6011_s8 + $0x24a0] sm:$0xff] }
 0xbac   : > { %3642 = vmatpush.msra.mxu3 %v5382_v34  ;;  %3682 = vmatpush.msra.mxu2 %v5383_v35  ;;  %v5436_v34 = vld [vmem:[%s6011_s8 + $0x24d8] sm:$0xff]  ;;  %v5433_v35 = vld [vmem:[%s6011_s8 + $0x24c0] sm:$0xff] }
 0xbad   : > { %3669 = vmatpush.msra.mxu1 %v5400_v44  ;;  %3709 = vmatpush.msra.mxu0 %v5401_v45  ;;  %v5454_v44 = vld [vmem:[%s6011_s8 + $0x2568] sm:$0xff]  ;;  %v5427_v45 = vld [vmem:[%s6011_s8 + $0x2490] sm:$0xff] }
 0xbae   : > { %3643 = vmatpush.msra.mxu3 %v5380_v36  ;;  %3683 = vmatpush.msra.mxu2 %v5381_v37  ;;  %v5434_v36 = vld [vmem:[%s6011_s8 + $0x24c8] sm:$0xff]  ;;  %v5431_v37 = vld [vmem:[%s6011_s8 + $0x24b0] sm:$0xff] }
 0xbaf   : > { %3670 = vmatpush.msra.mxu1 %v5398_v46  ;;  %3710 = vmatpush.msra.mxu0 %v5399_v49  ;;  %v5428_v46 = vld [vmem:[%s6011_s8 + $0x2498] sm:$0xff]  ;;  %v5423_v49 = vld [vmem:[%s6011_s8 + $0x2470] sm:$0xff] }
 0xbb0   : > { %3644 = vmatpush.msra.mxu3 %v5378_v38  ;;  %3684 = vmatpush.msra.mxu2 %v5379_v39  ;;  %v5432_v38 = vld [vmem:[%s6011_s8 + $0x24b8] sm:$0xff]  ;;  %v5455_v39 = vld [vmem:[%s6011_s8 + $0x2570] sm:$0xff] }
 0xbb1   : > { %3671 = vmatpush.msra.mxu1 %v5396_v8  ;;  %3711 = vmatpush.msra.mxu0 %v5397_v10  ;;  %v5418_v8 = vld [vmem:[%s6011_s8 + $0x2448] sm:$0xff]  ;;  %v5415_v10 = vld [vmem:[%s6011_s8 + $0x2430] sm:$0xff] }
 0xbb2   : > { %3645 = vmatpush.msra.mxu3 %v5376_v42  ;;  %3685 = vmatpush.msra.mxu2 %v5377_v43  ;;  %v5430_v42 = vld [vmem:[%s6011_s8 + $0x24a8] sm:$0xff]  ;;  %v5453_v43 = vld [vmem:[%s6011_s8 + $0x2560] sm:$0xff] }
 0xbb3   : > { %3672 = vmatpush.msra.mxu1 %v5394_v12  ;;  %3712 = vmatpush.msra.mxu0 %v5395_v14  ;;  %v5416_v12 = vld [vmem:[%s6011_s8 + $0x2438] sm:$0xff]  ;;  %v5413_v14 = vld [vmem:[%s6011_s8 + $0x2420] sm:$0xff] }
 0xbb4   : > { %3646 = vmatpush.msra.mxu3 %v5374_v47  ;;  %3686 = vmatpush.msra.mxu2 %v5375_v48  ;;  %v5425_v47 = vld [vmem:[%s6011_s8 + $0x2480] sm:$0xff]  ;;  %v5426_v48 = vld [vmem:[%s6011_s8 + $0x2488] sm:$0xff] }
 0xbb5   : > { %3673 = vmatpush.msra.mxu1 %v5392_v16  ;;  %3713 = vmatpush.msra.mxu0 %v5393_v18  ;;  %v5414_v16 = vld [vmem:[%s6011_s8 + $0x2428] sm:$0xff]  ;;  %v5411_v18 = vld [vmem:[%s6011_s8 + $0x2410] sm:$0xff] }
 0xbb6   : > { %3647 = vmatpush.msra.mxu3 %v5372_v50  ;;  %3687 = vmatpush.msra.mxu2 %v5373_v51  ;;  %v5424_v50 = vld [vmem:[%s6011_s8 + $0x2478] sm:$0xff]  ;;  %v5421_v51 = vld [vmem:[%s6011_s8 + $0x2460] sm:$0xff] }
 0xbb7   : > { %3674 = vmatpush.msra.mxu1 %v5390_v20  ;;  %3714 = vmatpush.msra.mxu0 %v5391_v22  ;;  %v5412_v20 = vld [vmem:[%s6011_s8 + $0x2418] sm:$0xff]  ;;  %v5409_v22 = vld [vmem:[%s6011_s8 + $0x2400] sm:$0xff] }
 0xbb8   : > { %3648 = vmatpush.msra.mxu3 %v5370_v52  ;;  %3688 = vmatpush.msra.mxu2 %v5371_v53  ;;  %v5422_v52 = vld [vmem:[%s6011_s8 + $0x2468] sm:$0xff] }
 0xbb9   : > { %3675 = vmatpush.msra.mxu1 %v5388_v24  ;;  %3715 = vmatpush.msra.mxu0 %v5389_v26  ;;  %v5351_v53 = vld [vmem:[%s6026_s16 + $0x25] ss:$8 sm:$0x3] }
 0xbba   : > { %3649 = vmatpush.msra.mxu3 %v5368_v54  ;;  %3689 = vmatpush.msra.mxu2 %v5369_v55  ;;  %v3491_v54 = vperm.slane %v5351_v53, 0  ;;  %v3492_v55 = vperm.slane %v5351_v53, 1  ;;  %v5410_v24 = vld [vmem:[%s6011_s8 + $0x2408] sm:$0xff]  ;;  %v5407_v26 = vld [vmem:[%s6011_s8 + $0x23f0] sm:$0xff]  ;;  %v5475_v53 = vld [vmem:[%s6011_s8 + $0x25f8] sm:$0xff] }
 0xbbb   : > { %3676 = vmatpush.msra.mxu1 %v5386_v28  ;;  %3716 = vmatpush.msra.mxu0 %v5387_v30  ;;  %v5408_v28 = vld [vmem:[%s6011_s8 + $0x23f8] sm:$0xff]  ;;  %v5490_v30 = vld [vmem:[%s6011_s8 + $0x2670] sm:$0xff] }
 0xbbc   : > { %3650 = vmatpush.msra.mxu3 %v5366_v56  ;;  %3690 = vmatpush.msra.mxu2 %v5367_v57 }
 0xbbe   : > { %3651 = vmatpush.msra.mxu3 %v5364_v7  ;;  %3691 = vmatpush.msra.mxu2 %v5365_v9  ;;  %v5449_v7 = vld [vmem:[%s6011_s8 + $0x2540] sm:$0xff]  ;;  %v5450_v9 = vld [vmem:[%s6011_s8 + $0x2548] sm:$0xff] }
 0xbc0   : > { %3652 = vmatpush.msra.mxu3 %v5362_v11  ;;  %3692 = vmatpush.msra.mxu2 %v5363_v13  ;;  %v5447_v11 = vld [vmem:[%s6011_s8 + $0x2530] sm:$0xff]  ;;  %v5448_v13 = vld [vmem:[%s6011_s8 + $0x2538] sm:$0xff] }
 0xbc2   : > { %3653 = vmatpush.msra.mxu3 %v5360_v15  ;;  %3693 = vmatpush.msra.mxu2 %v5361_v17  ;;  %v5445_v15 = vld [vmem:[%s6011_s8 + $0x2520] sm:$0xff]  ;;  %v5446_v17 = vld [vmem:[%s6011_s8 + $0x2528] sm:$0xff] }
 0xbc4   : > { %3654 = vmatpush.msra.mxu3 %v5358_v19  ;;  %3694 = vmatpush.msra.mxu2 %v5359_v21  ;;  %v5443_v19 = vld [vmem:[%s6011_s8 + $0x2510] sm:$0xff]  ;;  %v5444_v21 = vld [vmem:[%s6011_s8 + $0x2518] sm:$0xff] }
 0xbc6   : > { %3655 = vmatpush.msra.mxu3 %v5356_v23  ;;  %3695 = vmatpush.msra.mxu2 %v5357_v25  ;;  %v5441_v23 = vld [vmem:[%s6011_s8 + $0x2500] sm:$0xff]  ;;  %v5442_v25 = vld [vmem:[%s6011_s8 + $0x2508] sm:$0xff] }
 0xbc8   : > { %3656 = vmatpush.msra.mxu3 %v5354_v27  ;;  %3696 = vmatpush.msra.mxu2 %v5355_v29  ;;  %v5439_v27 = vld [vmem:[%s6011_s8 + $0x24f0] sm:$0xff]  ;;  %v5440_v29 = vld [vmem:[%s6011_s8 + $0x24f8] sm:$0xff] }
 0xc25   : > { %v3392_v0 = vpop.f32.mrf.mxu1 }
 0xc26   : > { %v3432_v2 = vpop.f32.mrf.mxu0 }
 0xc2b   : > { %v3372_v61 = vpop.f32.mrf.mxu3 }
 0xc2c   : > { %v3373_v62 = vadd.f32 %v3372_v61, %v3348_v59  ;;  %v3412_v63 = vpop.f32.mrf.mxu2 }
 0xc2d   : > { %v3413_v1 = vadd.f32 %v3412_v63, %v3349_v60 }
 0xc2e   : > { %v3393_v3 = vadd.f32 %v3392_v0, %v3373_v62 }
 0xc2f   : > { %v3433_v4 = vadd.f32 %v3432_v2, %v3413_v1  ;;  %v5419_v2 = vld [vmem:[%s6011_s8 + $0x2450] sm:$0xff] }
 0xc30   : > { %v3435_v5 = vmax.f32 %v3393_v3, 0.0  ;;  %v5451_v3 = vld [vmem:[%s6011_s8 + $0x2550] sm:$0xff] }
 0xc31   : > { %v3436_v6 = vmax.f32 %v3433_v4, 0.0  ;;  %v5420_v4 = vld [vmem:[%s6011_s8 + $0x2458] sm:$0xff] }
 0xc32   : > { %3514 = vmatmul.f32.vlgmr.msrb.gmra.mxu1 %v3435_v5  ;;  %3554 = vmatmul.f32.vlgmr.msrb.gmra.mxu0 %v3435_v5  ;;  %v5452_v5 = vld [vmem:[%s6011_s8 + $0x2558] sm:$0xff] }
 0xc33   : > { %5352 = vmatmul.msk.f32.vlgmr.msrb.gmra.mxu3 %vm491_vm2, %v3436_v6  ;;  %5353 = vmatmul.msk.f32.vlgmr.msrb.gmra.mxu2 %vm491_vm2, %v3436_v6  ;;  %v5417_v6 = vld [vmem:[%s6011_s8 + $0x2440] sm:$0xff] }
 0xc34   : > { %3784 = vmatpush.msrb.mxu1 %v5437_v31  ;;  %3824 = vmatpush.msrb.mxu0 %v5438_v32  ;;  %v5491_v31 = vld [vmem:[%s6011_s8 + $0x2678] sm:$0xff]  ;;  %v5488_v32 = vld [vmem:[%s6011_s8 + $0x2660] sm:$0xff] }
 0xc35   : > { %3811 = vmatpush.msrb.mxu3 %v5455_v39  ;;  %3851 = vmatpush.msrb.mxu2 %v5456_v40  ;;  %v5509_v39 = vld [vmem:[%s6011_s8 + $0x2708] sm:$0xff]  ;;  %v5482_v40 = vld [vmem:[%s6011_s8 + $0x2630] sm:$0xff] }
 0xc36   : > { %3785 = vmatpush.msrb.mxu1 %v5435_v33  ;;  %3825 = vmatpush.msrb.mxu0 %v5436_v34  ;;  %v5489_v33 = vld [vmem:[%s6011_s8 + $0x2668] sm:$0xff]  ;;  %v5486_v34 = vld [vmem:[%s6011_s8 + $0x2650] sm:$0xff] }
 0xc37   : > { %3812 = vmatpush.msrb.mxu3 %v5453_v43  ;;  %3852 = vmatpush.msrb.mxu2 %v5454_v44  ;;  %v5507_v43 = vld [vmem:[%s6011_s8 + $0x26f8] sm:$0xff]  ;;  %v5504_v44 = vld [vmem:[%s6011_s8 + $0x26e0] sm:$0xff] }
 0xc38   : > { %3786 = vmatpush.msrb.mxu1 %v5433_v35  ;;  %3826 = vmatpush.msrb.mxu0 %v5434_v36  ;;  %v5487_v35 = vld [vmem:[%s6011_s8 + $0x2658] sm:$0xff]  ;;  %v5484_v36 = vld [vmem:[%s6011_s8 + $0x2640] sm:$0xff] }
 0xc39   : > { %3813 = vmatpush.msrb.mxu3 %v5451_v3  ;;  %3853 = vmatpush.msrb.mxu2 %v5452_v5  ;;  %v5470_v5 = vld [vmem:[%s6011_s8 + $0x25d0] sm:$0xff] }
 0xc3a   : > { %3787 = vmatpush.msrb.mxu1 %v5431_v37  ;;  %3827 = vmatpush.msrb.mxu0 %v5432_v38  ;;  %v5485_v37 = vld [vmem:[%s6011_s8 + $0x2648] sm:$0xff]  ;;  %v5508_v38 = vld [vmem:[%s6011_s8 + $0x2700] sm:$0xff] }
 0xc3b   : > { %3814 = vmatpush.msrb.mxu3 %v5449_v7  ;;  %3854 = vmatpush.msrb.mxu2 %v5450_v9  ;;  %v5471_v7 = vld [vmem:[%s6011_s8 + $0x25d8] sm:$0xff]  ;;  %v5468_v9 = vld [vmem:[%s6011_s8 + $0x25c0] sm:$0xff] }
 0xc3c   : > { %3788 = vmatpush.msrb.mxu1 %v5429_v41  ;;  %3828 = vmatpush.msrb.mxu0 %v5430_v42  ;;  %v5483_v41 = vld [vmem:[%s6011_s8 + $0x2638] sm:$0xff]  ;;  %v5506_v42 = vld [vmem:[%s6011_s8 + $0x26f0] sm:$0xff] }
 0xc3d   : > { %3815 = vmatpush.msrb.mxu3 %v5447_v11  ;;  %3855 = vmatpush.msrb.mxu2 %v5448_v13  ;;  %v5469_v11 = vld [vmem:[%s6011_s8 + $0x25c8] sm:$0xff]  ;;  %v5466_v13 = vld [vmem:[%s6011_s8 + $0x25b0] sm:$0xff] }
 0xc3e   : > { %3789 = vmatpush.msrb.mxu1 %v5427_v45  ;;  %3829 = vmatpush.msrb.mxu0 %v5428_v46  ;;  %v5480_v45 = vld [vmem:[%s6011_s8 + $0x2620] sm:$0xff]  ;;  %v5481_v46 = vld [vmem:[%s6011_s8 + $0x2628] sm:$0xff] }
 0xc3f   : > { %3816 = vmatpush.msrb.mxu3 %v5445_v15  ;;  %3856 = vmatpush.msrb.mxu2 %v5446_v17  ;;  %v5467_v15 = vld [vmem:[%s6011_s8 + $0x25b8] sm:$0xff]  ;;  %v5464_v17 = vld [vmem:[%s6011_s8 + $0x25a0] sm:$0xff] }
 0xc40   : > { %3790 = vmatpush.msrb.mxu1 %v5425_v47  ;;  %3830 = vmatpush.msrb.mxu0 %v5426_v48  ;;  %v5505_v47 = vld [vmem:[%s6011_s8 + $0x26e8] sm:$0xff]  ;;  %v5478_v48 = vld [vmem:[%s6011_s8 + $0x2610] sm:$0xff] }
 0xc41   : > { %3817 = vmatpush.msrb.mxu3 %v5443_v19  ;;  %3857 = vmatpush.msrb.mxu2 %v5444_v21  ;;  %v5465_v19 = vld [vmem:[%s6011_s8 + $0x25a8] sm:$0xff]  ;;  %v5462_v21 = vld [vmem:[%s6011_s8 + $0x2590] sm:$0xff] }
 0xc42   : > { %3791 = vmatpush.msrb.mxu1 %v5423_v49  ;;  %3831 = vmatpush.msrb.mxu0 %v5424_v50  ;;  %v5479_v49 = vld [vmem:[%s6011_s8 + $0x2618] sm:$0xff]  ;;  %v5476_v50 = vld [vmem:[%s6011_s8 + $0x2600] sm:$0xff] }
 0xc43   : > { %3818 = vmatpush.msrb.mxu3 %v5441_v23  ;;  %3858 = vmatpush.msrb.mxu2 %v5442_v25  ;;  %v5463_v23 = vld [vmem:[%s6011_s8 + $0x2598] sm:$0xff]  ;;  %v5460_v25 = vld [vmem:[%s6011_s8 + $0x2580] sm:$0xff] }
 0xc44   : > { %3792 = vmatpush.msrb.mxu1 %v5421_v51  ;;  %3832 = vmatpush.msrb.mxu0 %v5422_v52  ;;  %v5477_v51 = vld [vmem:[%s6011_s8 + $0x2608] sm:$0xff]  ;;  %v5474_v52 = vld [vmem:[%s6011_s8 + $0x25f0] sm:$0xff] }
 0xc45   : > { %3819 = vmatpush.msrb.mxu3 %v5439_v27  ;;  %3859 = vmatpush.msrb.mxu2 %v5440_v29  ;;  %v5461_v27 = vld [vmem:[%s6011_s8 + $0x2588] sm:$0xff] }
 0xc46   : > { %3793 = vmatpush.msrb.mxu1 %v5419_v2  ;;  %3833 = vmatpush.msrb.mxu0 %v5420_v4  ;;  %v5457_v29 = vld [vmem:[%s6026_s16 + $0x27] ss:$8 sm:$0x3] }
 0xc48   : > { %3794 = vmatpush.msrb.mxu1 %v5417_v6  ;;  %3834 = vmatpush.msrb.mxu0 %v5418_v8  ;;  %v5502_v6 = vld [vmem:[%s6011_s8 + $0x26d0] sm:$0xff]  ;;  %v5503_v8 = vld [vmem:[%s6011_s8 + $0x26d8] sm:$0xff] }
 0xc4a   : > { %3795 = vmatpush.msrb.mxu1 %v5415_v10  ;;  %3835 = vmatpush.msrb.mxu0 %v5416_v12  ;;  %v5500_v10 = vld [vmem:[%s6011_s8 + $0x26c0] sm:$0xff]  ;;  %v5501_v12 = vld [vmem:[%s6011_s8 + $0x26c8] sm:$0xff] }
 0xc4c   : > { %3796 = vmatpush.msrb.mxu1 %v5413_v14  ;;  %3836 = vmatpush.msrb.mxu0 %v5414_v16  ;;  %v5498_v14 = vld [vmem:[%s6011_s8 + $0x26b0] sm:$0xff]  ;;  %v5499_v16 = vld [vmem:[%s6011_s8 + $0x26b8] sm:$0xff] }
 0xc4e   : > { %3797 = vmatpush.msrb.mxu1 %v5411_v18  ;;  %3837 = vmatpush.msrb.mxu0 %v5412_v20  ;;  %v5496_v18 = vld [vmem:[%s6011_s8 + $0x26a0] sm:$0xff]  ;;  %v5497_v20 = vld [vmem:[%s6011_s8 + $0x26a8] sm:$0xff] }
 0xc50   : > { %3798 = vmatpush.msrb.mxu1 %v5409_v22  ;;  %3838 = vmatpush.msrb.mxu0 %v5410_v24  ;;  %v5494_v22 = vld [vmem:[%s6011_s8 + $0x2690] sm:$0xff]  ;;  %v5495_v24 = vld [vmem:[%s6011_s8 + $0x2698] sm:$0xff] }
 0xc52   : > { %3799 = vmatpush.msrb.mxu1 %v5407_v26  ;;  %3839 = vmatpush.msrb.mxu0 %v5408_v28  ;;  %v5492_v26 = vld [vmem:[%s6011_s8 + $0x2680] sm:$0xff]  ;;  %v5493_v28 = vld [vmem:[%s6011_s8 + $0x2688] sm:$0xff] }
 0xcaf   : > { %v3515_v56 = vpop.f32.mrf.mxu1  ;;  %v3555_v57 = vpop.f32.mrf.mxu0 }
 0xcb0   : > { %v3516_v58 = vadd.f32 %v3515_v56, %v3491_v54  ;;  %v3556_v59 = vadd.f32 %v3555_v57, %v3492_v55  ;;  %v5472_v54 = vld [vmem:[%s6011_s8 + $0x25e0] sm:$0xff]  ;;  %v5473_v55 = vld [vmem:[%s6011_s8 + $0x25e8] sm:$0xff] }
 0xcb1   : > { %v5404_v56 = vld [vmem:[%s6026_s16 + $0x26] ss:$8 sm:$0x3] }
 0xcb2   : > { %v3634_v57 = vperm.slane %v5404_v56, 0 }
 0xcb6   : > { %v3535_v60 = vpop.f32.mrf.mxu3  ;;  %v3575_v61 = vpop.f32.mrf.mxu2 }
 0xcb7   : > { %v3536_v62 = vadd.f32 %v3535_v60, %v3516_v58  ;;  %v3576_v63 = vadd.f32 %v3575_v61, %v3556_v59  ;;  %v3635_v58 = vperm.slane %v5404_v56, 1 }
 0xcb9   : > { %v3578_v0 = vmax.f32 %v3536_v62, 0.0  ;;  %v3579_v1 = vmax.f32 %v3576_v63, 0.0 }
 0xcbb   : > { %3657 = vmatmul.f32.vlgmr.msra.gmra.mxu3 %v3578_v0  ;;  %5405 = vmatmul.msk.f32.vlgmr.msra.gmra.mxu1 %vm491_vm2, %v3579_v1 }
 0xcbc   : > { %3697 = vmatmul.f32.vlgmr.msra.gmra.mxu2 %v3578_v0  ;;  %5406 = vmatmul.msk.f32.vlgmr.msra.gmra.mxu0 %vm491_vm2, %v3579_v1 }
 0xcbd   : > { %3927 = vmatpush.msra.mxu3 %v5490_v30  ;;  %3967 = vmatpush.msra.mxu2 %v5491_v31  ;;  %v3777_v30 = vperm.slane %v5457_v29, 0  ;;  %v3778_v31 = vperm.slane %v5457_v29, 1 }
 0xcbe   : > { %3954 = vmatpush.msra.mxu1 %v5508_v38  ;;  %3994 = vmatpush.msra.mxu0 %v5509_v39 }
 0xcbf   : > { %3928 = vmatpush.msra.mxu3 %v5488_v32  ;;  %3968 = vmatpush.msra.mxu2 %v5489_v33 }
 0xcc0   : > { %3955 = vmatpush.msra.mxu1 %v5506_v42  ;;  %3995 = vmatpush.msra.mxu0 %v5507_v43  ;;  %v5510_v42 = vld [vmem:[%s6026_s16 + $0x30] ss:$8 sm:$0x3] }
 0xcc1   : > { %3929 = vmatpush.msra.mxu3 %v5486_v34  ;;  %3969 = vmatpush.msra.mxu2 %v5487_v35  ;;  %v3920_v43 = vperm.slane %v5510_v42, 0 }
 0xcc2   : > { %3956 = vmatpush.msra.mxu1 %v5504_v44  ;;  %3996 = vmatpush.msra.mxu0 %v5505_v47  ;;  %v3921_v44 = vperm.slane %v5510_v42, 1 }
 0xcc3   : > { %3930 = vmatpush.msra.mxu3 %v5484_v36  ;;  %3970 = vmatpush.msra.mxu2 %v5485_v37 }
 0xcc4   : > { %3957 = vmatpush.msra.mxu1 %v5502_v6  ;;  %3997 = vmatpush.msra.mxu0 %v5503_v8 }
 0xcc5   : > { %3931 = vmatpush.msra.mxu3 %v5482_v40  ;;  %3971 = vmatpush.msra.mxu2 %v5483_v41 }
 0xcc6   : > { %3958 = vmatpush.msra.mxu1 %v5500_v10  ;;  %3998 = vmatpush.msra.mxu0 %v5501_v12 }
 0xcc7   : > { %3932 = vmatpush.msra.mxu3 %v5480_v45  ;;  %3972 = vmatpush.msra.mxu2 %v5481_v46 }
 0xcc8   : > { %3959 = vmatpush.msra.mxu1 %v5498_v14  ;;  %3999 = vmatpush.msra.mxu0 %v5499_v16 }
 0xcc9   : > { %3933 = vmatpush.msra.mxu3 %v5478_v48  ;;  %3973 = vmatpush.msra.mxu2 %v5479_v49 }
 0xcca   : > { %3960 = vmatpush.msra.mxu1 %v5496_v18  ;;  %4000 = vmatpush.msra.mxu0 %v5497_v20 }
 0xccb   : > { %3934 = vmatpush.msra.mxu3 %v5476_v50  ;;  %3974 = vmatpush.msra.mxu2 %v5477_v51 }
 0xccc   : > { %3961 = vmatpush.msra.mxu1 %v5494_v22  ;;  %4001 = vmatpush.msra.mxu0 %v5495_v24 }
 0xccd   : > { %3935 = vmatpush.msra.mxu3 %v5474_v52  ;;  %3975 = vmatpush.msra.mxu2 %v5475_v53 }
 0xcce   : > { %3962 = vmatpush.msra.mxu1 %v5492_v26  ;;  %4002 = vmatpush.msra.mxu0 %v5493_v28 }
 0xccf   : > { %3936 = vmatpush.msra.mxu3 %v5472_v54  ;;  %3976 = vmatpush.msra.mxu2 %v5473_v55 }
 0xcd1   : > { %3937 = vmatpush.msra.mxu3 %v5470_v5  ;;  %3977 = vmatpush.msra.mxu2 %v5471_v7 }
 0xcd3   : > { %3938 = vmatpush.msra.mxu3 %v5468_v9  ;;  %3978 = vmatpush.msra.mxu2 %v5469_v11 }
 0xcd5   : > { %3939 = vmatpush.msra.mxu3 %v5466_v13  ;;  %3979 = vmatpush.msra.mxu2 %v5467_v15 }
 0xcd7   : > { %3940 = vmatpush.msra.mxu3 %v5464_v17  ;;  %3980 = vmatpush.msra.mxu2 %v5465_v19 }
 0xcd9   : > { %3941 = vmatpush.msra.mxu3 %v5462_v21  ;;  %3981 = vmatpush.msra.mxu2 %v5463_v23 }
 0xcdb   : > { %3942 = vmatpush.msra.mxu3 %v5460_v25  ;;  %3982 = vmatpush.msra.mxu2 %v5461_v27 }
 0xd38   : > { %v3678_v62 = vpop.f32.mrf.mxu1 }
 0xd39   : > { %v3718_v0 = vpop.f32.mrf.mxu0 }
 0xd3e   : > { %v3658_v59 = vpop.f32.mrf.mxu3 }
 0xd3f   : > { %v3659_v60 = vadd.f32 %v3658_v59, %v3634_v57  ;;  %v3698_v61 = vpop.f32.mrf.mxu2 }
 0xd40   : > { %v3699_v63 = vadd.f32 %v3698_v61, %v3635_v58 }
 0xd41   : > { %v3679_v1 = vadd.f32 %v3678_v62, %v3659_v60 }
 0xd42   : > { %v3719_v2 = vadd.f32 %v3718_v0, %v3699_v63 }
 0xd43   : > { %v3721_v3 = vmax.f32 %v3679_v1, 0.0 }
 0xd44   : > { %v3722_v4 = vmax.f32 %v3719_v2, 0.0 }
 0xd45   : > { %3800 = vmatmul.f32.vlgmr.msrb.gmra.mxu1 %v3721_v3  ;;  %3840 = vmatmul.f32.vlgmr.msrb.gmra.mxu0 %v3721_v3 }
 0xd46   : > { %5458 = vmatmul.msk.f32.vlgmr.msrb.gmra.mxu3 %vm491_vm2, %v3722_v4  ;;  %5459 = vmatmul.msk.f32.vlgmr.msrb.gmra.mxu2 %vm491_vm2, %v3722_v4 }
 0xdc2   : > { %v3801_v32 = vpop.f32.mrf.mxu1  ;;  %v3841_v33 = vpop.f32.mrf.mxu0 }
 0xdc3   : > { %v3802_v34 = vadd.f32 %v3801_v32, %v3777_v30  ;;  %v3842_v35 = vadd.f32 %v3841_v33, %v3778_v31 }
 0xdc9   : > { %v3821_v36 = vpop.f32.mrf.mxu3  ;;  %v3861_v37 = vpop.f32.mrf.mxu2 }
 0xdca   : > { %v3822_v38 = vadd.f32 %v3821_v36, %v3802_v34  ;;  %v3862_v39 = vadd.f32 %v3861_v37, %v3842_v35 }
 0xdcc   : > { %v3864_v40 = vmax.f32 %v3822_v38, 0.0  ;;  %v3865_v41 = vmax.f32 %v3862_v39, 0.0 }
 0xdce   : > { %3943 = vmatmul.f32.vlgmr.msra.gmra.mxu3 %v3864_v40  ;;  %5511 = vmatmul.msk.f32.vlgmr.msra.gmra.mxu1 %vm491_vm2, %v3865_v41 }
 0xdcf   : > { %3983 = vmatmul.f32.vlgmr.msra.gmra.mxu2 %v3864_v40  ;;  %5512 = vmatmul.msk.f32.vlgmr.msra.gmra.mxu0 %vm491_vm2, %v3865_v41 }
 0xe4b   : > { %v3964_v48 = vpop.f32.mrf.mxu1 }
 0xe4c   : > { %v4004_v50 = vpop.f32.mrf.mxu0 }
 0xe51   : > { %v3944_v45 = vpop.f32.mrf.mxu3 }
 0xe52   : > { %v3945_v46 = vadd.f32 %v3944_v45, %v3920_v43  ;;  %v3984_v47 = vpop.f32.mrf.mxu2 }
 0xe53   : > { %v3985_v49 = vadd.f32 %v3984_v47, %v3921_v44 }
 0xe54   : > { %v3965_v51 = vadd.f32 %v3964_v48, %v3945_v46 }
 0xe55   : > { %v4005_v52 = vadd.f32 %v4004_v50, %v3985_v49  ;;  %4014 = sbr.rel (%p5513_p1) target bundleno = 3865 (0xf19), region = 76 }
 0xe56   : > { %v4007_v53 = vmax.f32 %v3965_v51, 0.0 }
 0xe57   : > { %v4008_v54 = vmax.f32 %v4005_v52, 0.0 }
 0xe58   : > { %4009 = vst [vmem:[#allocation2] sm:$0xff] %v4007_v53 }
 0xe59   : > { %4010 = vst.msk [vmem:[#allocation2 + $0x8] sm:$0xff] %vm491_vm2, %v4008_v54 }
 0xe5a   : > { %v4032_v55 = vld [vmem:[%s7455_s5 + $0x78] sm:$0xff]  ;;  %v4031_v56 = vld [vmem:[%s7455_s5 + $0x70] sm:$0xff]  ;;  %v4030_v57 = vld [vmem:[%s7455_s5 + $0x68] sm:$0xff]  ;;  %vm4108_vm6 = vcmask 64512  }
 0xe5b   : > { %4049 = vmatpush.msra.mxu0 %v4032_v55  ;;  %v4041_v58 = vld [vmem:[%s7455_s5 + $0xc0] sm:$0xff]  ;;  %v4040_v59 = vld [vmem:[%s7455_s5 + $0xb8] sm:$0xff]  ;;  %v4039_v61 = vld [vmem:[%s7455_s5 + $0xb0] sm:$0xff] }
 0xe5c   : > { %v4029_v60 = vld [vmem:[%s7455_s5 + $0x60] sm:$0xff]  ;;  %4076 = vmatpush.msra.mxu1 %v4041_v58  ;;  %v4028_v62 = vld [vmem:[%s7455_s5 + $0x58] sm:$0xff]  ;;  %v4038_v63 = vld [vmem:[%s7455_s5 + $0xa8] sm:$0xff] }
 0xe5d   : > { %4050 = vmatpush.msra.mxu0 %v4031_v56  ;;  %v4027_v0 = vld [vmem:[%s7455_s5 + $0x50] sm:$0xff]  ;;  %v4037_v1 = vld [vmem:[%s7455_s5 + $0xa0] sm:$0xff]  ;;  %v4026_v2 = vld [vmem:[%s7455_s5 + $0x48] sm:$0xff] }
 0xe5e   : > { %4077 = vmatpush.msra.mxu1 %v4040_v59  ;;  %v4036_v3 = vld [vmem:[%s7455_s5 + $0x98] sm:$0xff]  ;;  %v4025_v4 = vld [vmem:[%s7455_s5 + $0x40] sm:$0xff]  ;;  %v4035_v5 = vld [vmem:[%s7455_s5 + $0x90] sm:$0xff] }
 0xe5f   : > { %4051 = vmatpush.msra.mxu0 %v4030_v57  ;;  %v4024_v6 = vld [vmem:[%s7455_s5 + $0x38] sm:$0xff]  ;;  %v4034_v7 = vld [vmem:[%s7455_s5 + $0x88] sm:$0xff]  ;;  %v4023_v8 = vld [vmem:[%s7455_s5 + $0x30] sm:$0xff] }
 0xe60   : > { %4078 = vmatpush.msra.mxu1 %v4039_v61  ;;  %v4033_v9 = vld [vmem:[%s7455_s5 + $0x80] sm:$0xff]  ;;  %v4022_v10 = vld [vmem:[%s7455_s5 + $0x28] sm:$0xff]  ;;  %v4020_v13 = vld [vmem:[%s7455_s5 + $0x18] sm:$0xff] }
 0xe61   : > { %4052 = vmatpush.msra.mxu0 %v4029_v60  ;;  %v4016_v11 = vld [vmem:[#allocation2 + $0x8] sm:$0xff]  ;;  %v4021_v12 = vld [vmem:[%s7455_s5 + $0x20] sm:$0xff]  ;;  %v4019_v14 = vld [vmem:[%s7455_s5 + $0x10] sm:$0xff] }
 0xe62   : > { %4079 = vmatpush.msra.mxu1 %v4038_v63  ;;  %v4018_v15 = vld [vmem:[%s7455_s5 + $0x8] sm:$0xff]  ;;  %v4017_v16 = vld [vmem:[%s7455_s5] sm:$0xff]  ;;  %v5614_v18 = vld [vmem:[#allocation11] ss:$0 sm:$0xff] }
 0xe63   : > { %4053 = vmatpush.msra.mxu0 %v4028_v62  ;;  %v4015_v17 = vld [vmem:[#allocation2] sm:$0xff] }
 0xe64   : > { %4080 = vmatpush.msra.mxu1 %v4037_v1 }
 0xe65   : > { %4054 = vmatpush.msra.mxu0 %v4027_v0 }
 0xe66   : > { %4081 = vmatpush.msra.mxu1 %v4036_v3 }
 0xe67   : > { %4055 = vmatpush.msra.mxu0 %v4026_v2 }
 0xe68   : > { %4082 = vmatpush.msra.mxu1 %v4035_v5 }
 0xe69   : > { %4056 = vmatpush.msra.mxu0 %v4025_v4 }
 0xe6a   : > { %4083 = vmatpush.msra.mxu1 %v4034_v7 }
 0xe6b   : > { %4057 = vmatpush.msra.mxu0 %v4024_v6 }
 0xe6c   : > { %4084 = vmatpush.msra.mxu1 %v4033_v9 }
 0xe6d   : > { %4058 = vmatpush.msra.mxu0 %v4023_v8  ;;  %5514 = vmatmul.msk.f32.vlgmr.msra.gmra.mxu1 %vm491_vm2, %v4016_v11 }
 0xe6f   : > { %4059 = vmatpush.msra.mxu0 %v4022_v10 }
 0xe71   : > { %4060 = vmatpush.msra.mxu0 %v4021_v12 }
 0xe73   : > { %4061 = vmatpush.msra.mxu0 %v4020_v13 }
 0xe75   : > { %4062 = vmatpush.msra.mxu0 %v4019_v14 }
 0xe77   : > { %4063 = vmatpush.msra.mxu0 %v4018_v15 }
 0xe79   : > { %4064 = vmatpush.msra.mxu0 %v4017_v16 }
 0xe7a   : > { %4065 = vmatmul.f32.vlgmr.msra.gmra.mxu0 %v4015_v17 }
 0xeea   : > { %v4086_v20 = vpop.f32.mrf.mxu1 }
 0xef7   : > { %v4066_v19 = vpop.f32.mrf.mxu0 }
 0xef8   : > { %v4067_v21 = vadd.f32 %v5614_v18, %v4066_v19 }
 0xefa   : > { %v4087_v22 = vadd.f32 %v4086_v20, %v4067_v21 }
 0xefc   : > { %v5515_v23 = vmul.f32 -1.442695, %v4087_v22 }
 0xefe   : > { %5615 = vpow2.f32 %v5515_v23 }
 0xf04   : > { %v5616_v24 = vpop.eup %5615 }
 0xf05   : > { %v4092_v25 = vadd.f32 1.0, %v5616_v24 }
 0xf07   : > { %5617 = vrcp.f32 %v4092_v25  ;;  %v4104_v29 = vand.u32 2147483648, %v4092_v25  ;;  %v4102_v31 = vand.u32 2147483647, %v4092_v25  ;;  %vm4098_vm4 = vweird.f32 %v4092_v25 }
 0xf09   : > { %v4105_v33 = vor.u32 1.1754944e-38, %v4104_v29  ;;  %vm4103_vm7 = vcmp.eq.f32.partialorder %v4102_v31, 8.507059e+37 }
 0xf0d   : > { %v5618_v26 = vpop.eup %5617 }
 0xf0e   : > { %v4094_v27 = vmul.f32 %v5618_v26, %v4092_v25  ;;  %vm4099_vm3 = vweird.f32 %v5618_v26 }
 0xf0f   : > { %vm4100_vm5 = vmor %vm4098_vm4, %vm4099_vm3 }
 0xf10   : > { %v4095_v28 = vsub.f32 1.0, %v4094_v27 }
 0xf12   : > { %v4096_v30 = vmul.f32 %v5618_v26, %v4095_v28 }
 0xf14   : > { %v4097_v32 = vadd.f32 %v5618_v26, %v4096_v30 }
 0xf16   : > { %v4101_v34 = vsel %vm4100_vm5, %v5618_v26, %v4097_v32 }
 0xf17   : > { %v4106_v35 = vsel %vm4103_vm7, %v4105_v33, %v4101_v34 }
 0xf18   : > { %4109 = vst.msk [vmem:[#allocation12] sm:$0xff] %vm4108_vm6, %v4106_v35 }
 0xf19 PF: > { %p5573_p4 = scmp.eq.s32.totalorder %s5915_s28, 7  ;;  %s5855_s11 = smov [#allocation12]  }
 0xf1a   : > { %s4116_s12 = sshll.u32 %s5855_s11, 4  ;;  %s4118_s29 = sshll.u32 %s7457_s7, 4  ;;  %s4117_s12 = int_to_ptr.vmem [resolvable:$true] %s4116_s12  ;;  %s4119_s29 = int_to_ptr.hbm [resolvable:$true] %s4118_s29 }
 0xf1b   : > { %5543 = dma.vmem_to_hbm [thread:$0]  (%p5573_p4), %s4117_s12, 128, %s4119_s29, [#allocation5]  }
 0xf1c   : > { %5830 = dma.done.wait (%p5573_p4), [#allocation5], 128  }
 0xf1d   : > { %5832 = vsyncadd (%p5573_p4), [#allocation5], 4294967168 }
 0xf1e PF: > { %p20_p5 = scmp.ge.s32.totalorder %s5962_s15, 10   ;;  %s7466_s24 = smov %s5839_s25 }
 0xf1f   : > { %s7467_s25 = smov %s5843_s26  ;;  %s7468_s26 = smov %s5974_s20 }
 0xf20   : > { %s7469_s27 = smov %s5962_s15  ;;  %22 = sbr.rel (!%p20_p5) target bundleno = 6 (0x6), region = 161 }
 0xf25   :  { %4132 = vsyncpa [#allocation4], 1 }
 0xf26   :  { %4134 = vsyncpa [#allocation4 + $0x1], 1 }
 0xf27   :  { %4135 = vsyncpa [#allocation7], 1 }
 0xf28   :  { %4136 = vsyncpa [#allocation10], 1 }
 0xf29   :  { %4138 = vsyncpa [#allocation10 + $0x1], 1 }
 0xf2a   :  { %4139 = vsyncpa [#allocation5], 1 }
 0xf2b   :  { %4141 = vsyncpa [#allocation5 + $0x1], 1 }

</bundles_post_ra>
